<compile_context>
chip_gen: v6e
topology: v6e:2x2x1
jax: 0.10.0
libtpu: 0.0.40
codegen_flags: <defaults>
</compile_context>

<pallas_src>
from functools import partial

import jax
import jax.numpy as jnp
import numpy as np
from jax.experimental import pallas as pl
from jax.experimental.pallas import tpu as pltpu


# ----------------------------------------------------------------------------
# Fused kernel factory: stacked LSTM + additive attention + FC in one body.
# Gate order matches PyTorch nn.LSTM: (i, f, g, o).
# ----------------------------------------------------------------------------
def _make_fused_kernel(num_layers, T, B, Ip, Hp):
    num_deep = num_layers - 1

    def kernel(*refs):
        n_in = 1 + 3 * num_layers + 5
        in_refs = refs[:n_in]
        o_ref = refs[n_in]
        scratch = refs[n_in + 1:]

        x_ref = in_refs[0]                                     # (T*B, Ip) VMEM
        layer_refs = [in_refs[1 + 3 * l: 1 + 3 * l + 3] for l in range(num_layers)]
        uww_ref, uwwb_ref, vw_ref, fcw_ref, fcb_ref = in_refs[1 + 3 * num_layers:]

        wih_bufs = scratch[0:num_deep]                         # VMEM (Hp,4Hp)
        whh_bufs = scratch[num_deep:2 * num_deep]              # VMEM (Hp,4Hp)
        xproj_ref = scratch[2 * num_deep]                      # VMEM (T*B,4Hp)
        seq_ref = scratch[2 * num_deep + 1]                    # VMEM (T*B,Hp)
        sem = scratch[2 * num_deep + 2] if num_deep > 0 else None

        # ---- Kick off deep-layer weight DMAs so they overlap layer-0 compute.
        copies = []
        for d in range(num_deep):
            wih_hbm, whh_hbm, _ = layer_refs[d + 1]
            cw = pltpu.make_async_copy(wih_hbm, wih_bufs[d], sem.at[d, 0])
            ch = pltpu.make_async_copy(whh_hbm, whh_bufs[d], sem.at[d, 1])
            cw.start()
            ch.start()
            copies.append((cw, ch))

        # ---- Stacked LSTM layers (T unrolled; input projection hoisted).
        for l in range(num_layers):
            wih_l_ref, whh_l_ref, b_ref = layer_refs[l]
            if l == 0:
                wih = wih_l_ref[...]
                whh = whh_l_ref[...]
                lhs = x_ref[...]                               # (T*B, Ip)
            else:
                cw, ch = copies[l - 1]
                cw.wait()
                ch.wait()
                wih = wih_bufs[l - 1][...]
                whh = whh_bufs[l - 1][...]
                lhs = seq_ref[...]                             # previous layer seq

            # Hoisted input projection + combined bias, staged in VMEM scratch.
            xproj_ref[...] = (jnp.dot(lhs, wih, preferred_element_type=jnp.float32)
                              + b_ref[...])                    # (T*B, 4Hp)

            h = None
            c = None
            for t in range(T):                                 # fully unrolled
                xt = xproj_ref[t * B:(t + 1) * B, :]           # (B, 4Hp), aligned
                if t == 0:
                    gates = xt                                 # h == 0
                else:
                    gates = xt + jnp.dot(h, whh,
                                         preferred_element_type=jnp.float32)
                # Gate slices are full (B,128) vregs (128-lane aligned).
                i = jax.nn.sigmoid(gates[:, 0:Hp])
                f = jax.nn.sigmoid(gates[:, Hp:2 * Hp])
                g = jnp.tanh(gates[:, 2 * Hp:3 * Hp])
                o = jax.nn.sigmoid(gates[:, 3 * Hp:4 * Hp])
                c = i * g if t == 0 else f * c + i * g         # c0 == 0
                h = o * jnp.tanh(c)
                seq_ref[t * B:(t + 1) * B, :] = h              # aligned 8-row store

        # ---- Additive attention + FC head on the top-layer sequence.
        seq = seq_ref[...]                                     # (T*B, Hp)
        # Fused [U | W] projection: one (T*B,Hp)@(Hp,2Hp) matmul (biases folded).
        uw2 = (jnp.dot(seq, uww_ref[...], preferred_element_type=jnp.float32)
               + uwwb_ref[...])                                # (T*B, 2Hp)
        u3 = uw2[:, 0:Hp].reshape(T, B, Hp)
        w_last = uw2[(T - 1) * B:T * B, Hp:2 * Hp]             # last timestep rows
        z = jnp.tanh(u3 + w_last[None, :, :])                  # (T, B, Hp)

        # v-projection as VPU multiply + cross-lane reduce (v.bias folded out:
        # softmax over time is shift-invariant).
        v_row = vw_ref[...].reshape(1, 1, Hp)
        scores = jnp.sum(z * v_row, axis=-1, keepdims=True)    # (T, B, 1)

        # Softmax over time (PyTorch Softmax(dim=1) on (B,T,1)).
        m = jnp.max(scores, axis=0, keepdims=True)
        e = jnp.exp(scores - m)
        attn = e / jnp.sum(e, axis=0, keepdims=True)           # (T, B, 1)

        context = jnp.sum(attn * seq.reshape(T, B, Hp), axis=0)  # (B, Hp)
        # Lane-dense (B, 128) output store; wrapper slices to the true O.
        o_ref[...] = (jnp.dot(context, fcw_ref[...],
                              preferred_element_type=jnp.float32)
                      + fcb_ref[...])

    return kernel


def _full_spec(shape):
    zeros = (0,) * len(shape)
    return pl.BlockSpec(shape, lambda i: zeros)


@partial(jax.jit, static_argnames=('output_size',))
def lstm3_forward_pallas(x, kparams, *, output_size):
    """x: (B, T, I) batch-first.  kparams: 128-lane-padded kernel params."""
    B, T, I = x.shape
    layers = kparams['lstm']
    num_layers = len(layers)
    Ip = layers[0]['wih'].shape[0]
    Hp = layers[0]['whh'].shape[0]
    Op = kparams['fcw'].shape[1]

    # Batch-first -> time-major relayout + lane padding done by XLA (cheap,
    # overlappable) instead of inside the kernel.
    xtm = jnp.transpose(x, (1, 0, 2)).reshape(T * B, I)
    if Ip > I:
        xtm = jnp.pad(xtm, ((0, 0), (0, Ip - I)))

    kernel = _make_fused_kernel(num_layers, T, B, Ip, Hp)

    inputs = [xtm]
    in_specs = [_full_spec((T * B, Ip))]
    for l, lp in enumerate(layers):
        for name in ('wih', 'whh', 'b'):
            arr = lp[name]
            inputs.append(arr)
            if l > 0 and name in ('wih', 'whh'):
                # Deep-layer weights stay in HBM; DMA'd manually inside the
                # kernel so the transfer overlaps layer-0 compute.
                in_specs.append(pl.BlockSpec(memory_space=pl.ANY))
            else:
                in_specs.append(_full_spec(arr.shape))
    for name in ('uww', 'uwwb', 'vw', 'fcw', 'fcb'):
        arr = kparams[name]
        inputs.append(arr)
        in_specs.append(_full_spec(arr.shape))

    num_deep = num_layers - 1
    scratch_shapes = (
        [pltpu.VMEM((Hp, 4 * Hp), jnp.float32) for _ in range(2 * num_deep)]
        + [pltpu.VMEM((T * B, 4 * Hp), jnp.float32),     # xproj staging
           pltpu.VMEM((T * B, Hp), jnp.float32)]         # hidden-sequence staging
        + ([pltpu.SemaphoreType.DMA((num_deep, 2))] if num_deep > 0 else [])
    )

    out = pl.pallas_call(
        kernel,
        out_shape=jax.ShapeDtypeStruct((B, Op), jnp.float32),
        grid=(1,),
        in_specs=in_specs,
        out_specs=_full_spec((B, Op)),
        scratch_shapes=scratch_shapes,
        compiler_params=pltpu.CompilerParams(
            dimension_semantics=("arbitrary",)),
    )(*inputs)
    return out[:, :output_size]


# ----------------------------------------------------------------------------
# Parameters: PyTorch-style init (unpadded, used by the reference) and the
# 128-lane-padded kernel layout.
# ----------------------------------------------------------------------------
def init_params(key, input_size, hidden_size, num_layers, output_size):
    H = hidden_size
    ks = 1.0 / np.sqrt(H)

    def uni(k, shape, scale):
        return jax.random.uniform(k, shape, jnp.float32, -scale, scale)

    keys = jax.random.split(key, 4 * num_layers + 8)
    params = {'lstm': []}
    in_sz = input_size
    for l in range(num_layers):
        k0, k1, k2, k3 = keys[4 * l:4 * l + 4]
        wih = uni(k0, (4 * H, in_sz), ks)       # torch weight_ih_l{l}
        whh = uni(k1, (4 * H, H), ks)           # torch weight_hh_l{l}
        bih = uni(k2, (4 * H,), ks)
        bhh = uni(k3, (4 * H,), ks)
        params['lstm'].append({
            'wih_t': wih.T,                     # (in_sz, 4H)
            'whh_t': whh.T,                     # (H, 4H)
            'b': (bih + bhh).reshape(1, 4 * H),
        })
        in_sz = H

    kU, kUb, kW, kWb, kv, kvb, kf, kfb = keys[4 * num_layers:4 * num_layers + 8]
    kH = 1.0 / np.sqrt(H)
    params['Uw_t'] = uni(kU, (H, H), kH).T
    params['Ub'] = uni(kUb, (1, H), kH)
    params['Ww_t'] = uni(kW, (H, H), kH).T
    params['Wb'] = uni(kWb, (1, H), kH)
    params['vw'] = uni(kv, (1, H), kH)          # v.weight (1, H)
    params['vb'] = uni(kvb, (1, 1), kH)         # v.bias (no-op under softmax)
    params['fcw_t'] = uni(kf, (output_size, H), kH).T   # (H, O)
    params['fcb'] = uni(kfb, (1, output_size), kH)
    return params


def pad_params_for_kernel(params, input_size, hidden_size, lane=128):
    """Zero-pad hidden/input/output dims to the 128-lane width.

    Gate blocks get Hp-wide slots; U|W projections are fused column-wise."""
    H = hidden_size

    def rup(n):
        return ((n + lane - 1) // lane) * lane

    Hp = rup(H)
    Ip = rup(input_size)

    def pad_gate_w(w_t, kp_rows):
        k = w_t.shape[0]
        out = jnp.zeros((kp_rows, 4 * Hp), jnp.float32)
        for g in range(4):
            out = out.at[:k, g * Hp:g * Hp + H].set(w_t[:, g * H:(g + 1) * H])
        return out

    def pad_gate_b(b):
        out = jnp.zeros((1, 4 * Hp), jnp.float32)
        for g in range(4):
            out = out.at[:, g * Hp:g * Hp + H].set(b[:, g * H:(g + 1) * H])
        return out

    def pad_mat(w, rp, cp):
        out = jnp.zeros((rp, cp), jnp.float32)
        return out.at[:w.shape[0], :w.shape[1]].set(w)

    kp = {'lstm': []}
    for l, lp in enumerate(params['lstm']):
        kin = Ip if l == 0 else Hp              # layer-0 input is lane-padded too
        kp['lstm'].append({
            'wih': pad_gate_w(lp['wih_t'], kin),    # (K, 4Hp)
            'whh': pad_gate_w(lp['whh_t'], Hp),     # (Hp, 4Hp)
            'b': pad_gate_b(lp['b']),               # (1, 4Hp)
        })

    uw = pad_mat(params['Uw_t'], Hp, Hp)
    ww = pad_mat(params['Ww_t'], Hp, Hp)
    ub = pad_mat(params['Ub'], 1, Hp)
    wb = pad_mat(params['Wb'], 1, Hp)
    kp['uww'] = jnp.concatenate([uw, ww], axis=1)       # (Hp, 2Hp) fused [U|W]
    kp['uwwb'] = jnp.concatenate([ub, wb], axis=1)      # (1, 2Hp)
    kp['vw'] = pad_mat(params['vw'], 1, Hp)             # (1, Hp); vb folded out
    O = params['fcw_t'].shape[1]
    Op = rup(O)
    kp['fcw'] = pad_mat(params['fcw_t'], Hp, Op)        # (Hp, 128) lane-dense out
    kp['fcb'] = pad_mat(params['fcb'], 1, Op)           # (1, 128)
    return kp


# ----------------------------------------------------------------------------
# Pure-JAX reference (unpadded params), matching the PyTorch forward.
# ----------------------------------------------------------------------------
def lstm3_forward_ref(x, params):
    B, T, _ = x.shape
    h_in = x
    for layer in params['lstm']:
        H = layer['whh_t'].shape[0]
        h = jnp.zeros((B, H), jnp.float32)
        c = jnp.zeros((B, H), jnp.float32)
        outs = []
        for t in range(T):
            gates = h_in[:, t, :] @ layer['wih_t'] + h @ layer['whh_t'] + layer['b']
            i = jax.nn.sigmoid(gates[:, :H])
            f = jax.nn.sigmoid(gates[:, H:2 * H])
            g = jnp.tanh(gates[:, 2 * H:3 * H])
            o = jax.nn.sigmoid(gates[:, 3 * H:])
            c = f * c + i * g
            h = o * jnp.tanh(c)
            outs.append(h)
        h_in = jnp.stack(outs, axis=1)
    out = h_in                                              # (B, T, H)
    u = out @ params['Uw_t'] + params['Ub']
    w = out[:, -1, :] @ params['Ww_t'] + params['Wb']
    z = jnp.tanh(u + w[:, None, :])
    scores = jnp.sum(z * params['vw'], axis=-1, keepdims=True) + params['vb']
    attn = jax.nn.softmax(scores, axis=1)
    context = jnp.sum(attn * out, axis=1)
    return context @ params['fcw_t'] + params['fcb']


if __name__ == "__main__":
    batch, seq_len = 8, 8
    input_size, hidden_size, num_layers, output_size = 16, 32, 2, 8

    key = jax.random.PRNGKey(0)
    kx, kp = jax.random.split(key)
    x = jax.random.normal(kx, (batch, seq_len, input_size), jnp.float32)
    params = init_params(kp, input_size, hidden_size, num_layers, output_size)
    kparams = pad_params_for_kernel(params, input_size, hidden_size)

    y = lstm3_forward_pallas(x, kparams, output_size=output_size)
    y = jax.block_until_ready(y)

    y_ref = lstm3_forward_ref(x, params)
    np.testing.assert_allclose(np.asarray(y), np.asarray(y_ref),
                               rtol=1e-2, atol=1e-2)

    assert y.shape == (batch, output_size)
    print("KERNEL_OK")
</pallas_src>

<mosaic_0001>
module attributes {stable_mosaic.version = 11 : i64} {
  func.func @kernel(%arg0: i32, %arg1: memref<64x128xf32, #tpu.memory_space<vmem>>, %arg2: memref<128x512xf32, #tpu.memory_space<vmem>>, %arg3: memref<128x512xf32, #tpu.memory_space<vmem>>, %arg4: memref<1x512xf32, #tpu.memory_space<vmem>>, %arg5: memref<128x512xf32, #tpu.memory_space<any>>, %arg6: memref<128x512xf32, #tpu.memory_space<any>>, %arg7: memref<1x512xf32, #tpu.memory_space<vmem>>, %arg8: memref<128x256xf32, #tpu.memory_space<vmem>>, %arg9: memref<1x256xf32, #tpu.memory_space<vmem>>, %arg10: memref<1x128xf32, #tpu.memory_space<vmem>>, %arg11: memref<128x128xf32, #tpu.memory_space<vmem>>, %arg12: memref<1x128xf32, #tpu.memory_space<vmem>>, %arg13: memref<8x128xf32, #tpu.memory_space<vmem>>, %arg14: memref<128x512xf32, #tpu.memory_space<vmem>>, %arg15: memref<128x512xf32, #tpu.memory_space<vmem>>, %arg16: memref<64x512xf32, #tpu.memory_space<vmem>>, %arg17: memref<64x128xf32, #tpu.memory_space<vmem>>, %arg18: memref<1x2x!tpu.dma_semaphore, #tpu.memory_space<semaphore_mem>>) attributes {dimension_semantics = [#tpu.dimension_semantics<arbitrary>], iteration_bounds = array<i64: 1>, scalar_prefetch = 0 : i64, scratch_operands = 5 : i64, tpu.core_type = #tpu.core_type<tc>, window_params = [{pipeline_mode = #tpu.pipeline_mode<synchronous>, transform_indices = @transform_0, window_bounds = array<i64: 64, 128>}, {pipeline_mode = #tpu.pipeline_mode<synchronous>, transform_indices = @transform_1, window_bounds = array<i64: 128, 512>}, {pipeline_mode = #tpu.pipeline_mode<synchronous>, transform_indices = @transform_2, window_bounds = array<i64: 128, 512>}, {pipeline_mode = #tpu.pipeline_mode<synchronous>, transform_indices = @transform_3, window_bounds = array<i64: 1, 512>}, {}, {}, {pipeline_mode = #tpu.pipeline_mode<synchronous>, transform_indices = @transform_6, window_bounds = array<i64: 1, 512>}, {pipeline_mode = #tpu.pipeline_mode<synchronous>, transform_indices = @transform_7, window_bounds = array<i64: 128, 256>}, {pipeline_mode = #tpu.pipeline_mode<synchronous>, transform_indices = @transform_8, window_bounds = array<i64: 1, 256>}, {pipeline_mode = #tpu.pipeline_mode<synchronous>, transform_indices = @transform_9, window_bounds = array<i64: 1, 128>}, {pipeline_mode = #tpu.pipeline_mode<synchronous>, transform_indices = @transform_10, window_bounds = array<i64: 128, 128>}, {pipeline_mode = #tpu.pipeline_mode<synchronous>, transform_indices = @transform_11, window_bounds = array<i64: 1, 128>}, {pipeline_mode = #tpu.pipeline_mode<synchronous>, transform_indices = @transform_12, window_bounds = array<i64: 8, 128>}]} {
    %c0_i32 = arith.constant 0 : i32
    %c0_i32_0 = arith.constant 0 : i32
    %0 = tpu.memref_slice %arg18[%c0_i32, %c0_i32_0] : memref<1x2x!tpu.dma_semaphore, #tpu.memory_space<semaphore_mem>> -> memref<1x1x!tpu.dma_semaphore, #tpu.memory_space<semaphore_mem>>
    %1 = tpu.memref_squeeze %0 : memref<1x1x!tpu.dma_semaphore, #tpu.memory_space<semaphore_mem>> -> memref<!tpu.dma_semaphore, #tpu.memory_space<semaphore_mem>>
    tpu.enqueue_dma source(%arg5 : memref<128x512xf32, #tpu.memory_space<any>>) target(%arg14 : memref<128x512xf32, #tpu.memory_space<vmem>>) target_semaphore(%1 : memref<!tpu.dma_semaphore, #tpu.memory_space<semaphore_mem>>)
    %c0_i32_1 = arith.constant 0 : i32
    %c1_i32 = arith.constant 1 : i32
    %2 = tpu.memref_slice %arg18[%c0_i32_1, %c1_i32] : memref<1x2x!tpu.dma_semaphore, #tpu.memory_space<semaphore_mem>> -> memref<1x1x!tpu.dma_semaphore, #tpu.memory_space<semaphore_mem>>
    %3 = tpu.memref_squeeze %2 : memref<1x1x!tpu.dma_semaphore, #tpu.memory_space<semaphore_mem>> -> memref<!tpu.dma_semaphore, #tpu.memory_space<semaphore_mem>>
    tpu.enqueue_dma source(%arg6 : memref<128x512xf32, #tpu.memory_space<any>>) target(%arg15 : memref<128x512xf32, #tpu.memory_space<vmem>>) target_semaphore(%3 : memref<!tpu.dma_semaphore, #tpu.memory_space<semaphore_mem>>)
    %c0 = arith.constant 0 : index
    %c0_2 = arith.constant 0 : index
    %4 = vector.load %arg2[%c0, %c0_2] : memref<128x512xf32, #tpu.memory_space<vmem>>, vector<128x512xf32>
    %c0_3 = arith.constant 0 : index
    %c0_4 = arith.constant 0 : index
    %5 = vector.load %arg3[%c0_3, %c0_4] : memref<128x512xf32, #tpu.memory_space<vmem>>, vector<128x512xf32>
    %c0_5 = arith.constant 0 : index
    %c0_6 = arith.constant 0 : index
    %6 = vector.load %arg1[%c0_5, %c0_6] : memref<64x128xf32, #tpu.memory_space<vmem>>, vector<64x128xf32>
    %cst = arith.constant dense<0.000000e+00> : vector<64x512xf32>
    %7 = tpu.matmul %6, %4, %cst {dimension_numbers = #tpu.dot_dimension_numbers<[1], [0], [0], [1], [0, 0, 1, 1], [], []>} : vector<64x128xf32>, vector<128x512xf32>, vector<64x512xf32> -> vector<64x512xf32>
    %c0_7 = arith.constant 0 : index
    %c0_8 = arith.constant 0 : index
    %8 = vector.load %arg4[%c0_7, %c0_8] : memref<1x512xf32, #tpu.memory_space<vmem>>, vector<1x512xf32>
    %9 = vector.broadcast %8 : vector<1x512xf32> to vector<64x512xf32>
    %10 = arith.addf %7, %9 : vector<64x512xf32>
    %c0_9 = arith.constant 0 : index
    %c0_10 = arith.constant 0 : index
    %11 = vector.load %arg16[%c0_9, %c0_10] : memref<64x512xf32, #tpu.memory_space<vmem>>, vector<64x512xf32>
    tpu.vector_store %arg16[%c0_9, %c0_10], %10 {strides = array<i32>} : memref<64x512xf32, #tpu.memory_space<vmem>>, vector<64x512xf32>,
    %c0_11 = arith.constant 0 : index
    %c0_12 = arith.constant 0 : index
    %12 = vector.load %arg16[%c0_11, %c0_12] : memref<64x512xf32, #tpu.memory_space<vmem>>, vector<8x512xf32>
    %13 = vector.extract_strided_slice %12 {offsets = [0, 0], sizes = [8, 128], strides = [1, 1]} : vector<8x512xf32> to vector<8x128xf32>
    %14 = arith.negf %13 : vector<8x128xf32>
    %15 = math.exp %14 : vector<8x128xf32>
    %cst_13 = arith.constant 1.000000e+00 : f32
    %16 = vector.broadcast %cst_13 : f32 to vector<8x128xf32>
    %17 = arith.addf %16, %15 : vector<8x128xf32>
    %18 = arith.divf %16, %17 : vector<8x128xf32>
    %19 = vector.extract_strided_slice %12 {offsets = [0, 256], sizes = [8, 128], strides = [1, 1]} : vector<8x512xf32> to vector<8x128xf32>
    %20 = math.tanh %19 : vector<8x128xf32>
    %21 = vector.extract_strided_slice %12 {offsets = [0, 384], sizes = [8, 128], strides = [1, 1]} : vector<8x512xf32> to vector<8x128xf32>
    %22 = arith.negf %21 : vector<8x128xf32>
    %23 = math.exp %22 : vector<8x128xf32>
    %cst_14 = arith.constant 1.000000e+00 : f32
    %24 = vector.broadcast %cst_14 : f32 to vector<8x128xf32>
    %25 = arith.addf %24, %23 : vector<8x128xf32>
    %26 = arith.divf %24, %25 : vector<8x128xf32>
    %27 = arith.mulf %18, %20 : vector<8x128xf32>
    %28 = math.tanh %27 : vector<8x128xf32>
    %29 = arith.mulf %26, %28 : vector<8x128xf32>
    %c0_15 = arith.constant 0 : index
    %c0_16 = arith.constant 0 : index
    %30 = vector.load %arg17[%c0_15, %c0_16] : memref<64x128xf32, #tpu.memory_space<vmem>>, vector<8x128xf32>
    tpu.vector_store %arg17[%c0_15, %c0_16], %29 {strides = array<i32>} : memref<64x128xf32, #tpu.memory_space<vmem>>, vector<8x128xf32>,
    %c8 = arith.constant 8 : index
    %c0_17 = arith.constant 0 : index
    %31 = vector.load %arg16[%c8, %c0_17] : memref<64x512xf32, #tpu.memory_space<vmem>>, vector<8x512xf32>
    %cst_18 = arith.constant dense<0.000000e+00> : vector<8x512xf32>
    %32 = tpu.matmul %29, %5, %cst_18 {dimension_numbers = #tpu.dot_dimension_numbers<[1], [0], [0], [1], [0, 0, 1, 1], [], []>} : vector<8x128xf32>, vector<128x512xf32>, vector<8x512xf32> -> vector<8x512xf32>
    %33 = arith.addf %31, %32 : vector<8x512xf32>
    %34 = vector.extract_strided_slice %33 {offsets = [0, 0], sizes = [8, 128], strides = [1, 1]} : vector<8x512xf32> to vector<8x128xf32>
    %35 = arith.negf %34 : vector<8x128xf32>
    %36 = math.exp %35 : vector<8x128xf32>
    %cst_19 = arith.constant 1.000000e+00 : f32
    %37 = vector.broadcast %cst_19 : f32 to vector<8x128xf32>
    %38 = arith.addf %37, %36 : vector<8x128xf32>
    %39 = arith.divf %37, %38 : vector<8x128xf32>
    %40 = vector.extract_strided_slice %33 {offsets = [0, 128], sizes = [8, 128], strides = [1, 1]} : vector<8x512xf32> to vector<8x128xf32>
    %41 = arith.negf %40 : vector<8x128xf32>
    %42 = math.exp %41 : vector<8x128xf32>
    %cst_20 = arith.constant 1.000000e+00 : f32
    %43 = vector.broadcast %cst_20 : f32 to vector<8x128xf32>
    %44 = arith.addf %43, %42 : vector<8x128xf32>
    %45 = arith.divf %43, %44 : vector<8x128xf32>
    %46 = vector.extract_strided_slice %33 {offsets = [0, 256], sizes = [8, 128], strides = [1, 1]} : vector<8x512xf32> to vector<8x128xf32>
    %47 = math.tanh %46 : vector<8x128xf32>
    %48 = vector.extract_strided_slice %33 {offsets = [0, 384], sizes = [8, 128], strides = [1, 1]} : vector<8x512xf32> to vector<8x128xf32>
    %49 = arith.negf %48 : vector<8x128xf32>
    %50 = math.exp %49 : vector<8x128xf32>
    %cst_21 = arith.constant 1.000000e+00 : f32
    %51 = vector.broadcast %cst_21 : f32 to vector<8x128xf32>
    %52 = arith.addf %51, %50 : vector<8x128xf32>
    %53 = arith.divf %51, %52 : vector<8x128xf32>
    %54 = arith.mulf %45, %27 : vector<8x128xf32>
    %55 = arith.mulf %39, %47 : vector<8x128xf32>
    %56 = arith.addf %54, %55 : vector<8x128xf32>
    %57 = math.tanh %56 : vector<8x128xf32>
    %58 = arith.mulf %53, %57 : vector<8x128xf32>
    %c8_22 = arith.constant 8 : index
    %c0_23 = arith.constant 0 : index
    %59 = vector.load %arg17[%c8_22, %c0_23] : memref<64x128xf32, #tpu.memory_space<vmem>>, vector<8x128xf32>
    tpu.vector_store %arg17[%c8_22, %c0_23], %58 {strides = array<i32>} : memref<64x128xf32, #tpu.memory_space<vmem>>, vector<8x128xf32>,
    %c16 = arith.constant 16 : index
    %c0_24 = arith.constant 0 : index
    %60 = vector.load %arg16[%c16, %c0_24] : memref<64x512xf32, #tpu.memory_space<vmem>>, vector<8x512xf32>
    %cst_25 = arith.constant dense<0.000000e+00> : vector<8x512xf32>
    %61 = tpu.matmul %58, %5, %cst_25 {dimension_numbers = #tpu.dot_dimension_numbers<[1], [0], [0], [1], [0, 0, 1, 1], [], []>} : vector<8x128xf32>, vector<128x512xf32>, vector<8x512xf32> -> vector<8x512xf32>
    %62 = arith.addf %60, %61 : vector<8x512xf32>
    %63 = vector.extract_strided_slice %62 {offsets = [0, 0], sizes = [8, 128], strides = [1, 1]} : vector<8x512xf32> to vector<8x128xf32>
    %64 = arith.negf %63 : vector<8x128xf32>
    %65 = math.exp %64 : vector<8x128xf32>
    %cst_26 = arith.constant 1.000000e+00 : f32
    %66 = vector.broadcast %cst_26 : f32 to vector<8x128xf32>
    %67 = arith.addf %66, %65 : vector<8x128xf32>
    %68 = arith.divf %66, %67 : vector<8x128xf32>
    %69 = vector.extract_strided_slice %62 {offsets = [0, 128], sizes = [8, 128], strides = [1, 1]} : vector<8x512xf32> to vector<8x128xf32>
    %70 = arith.negf %69 : vector<8x128xf32>
    %71 = math.exp %70 : vector<8x128xf32>
    %cst_27 = arith.constant 1.000000e+00 : f32
    %72 = vector.broadcast %cst_27 : f32 to vector<8x128xf32>
    %73 = arith.addf %72, %71 : vector<8x128xf32>
    %74 = arith.divf %72, %73 : vector<8x128xf32>
    %75 = vector.extract_strided_slice %62 {offsets = [0, 256], sizes = [8, 128], strides = [1, 1]} : vector<8x512xf32> to vector<8x128xf32>
    %76 = math.tanh %75 : vector<8x128xf32>
    %77 = vector.extract_strided_slice %62 {offsets = [0, 384], sizes = [8, 128], strides = [1, 1]} : vector<8x512xf32> to vector<8x128xf32>
    %78 = arith.negf %77 : vector<8x128xf32>
    %79 = math.exp %78 : vector<8x128xf32>
    %cst_28 = arith.constant 1.000000e+00 : f32
    %80 = vector.broadcast %cst_28 : f32 to vector<8x128xf32>
    %81 = arith.addf %80, %79 : vector<8x128xf32>
    %82 = arith.divf %80, %81 : vector<8x128xf32>
    %83 = arith.mulf %74, %56 : vector<8x128xf32>
    %84 = arith.mulf %68, %76 : vector<8x128xf32>
    %85 = arith.addf %83, %84 : vector<8x128xf32>
    %86 = math.tanh %85 : vector<8x128xf32>
    %87 = arith.mulf %82, %86 : vector<8x128xf32>
    %c16_29 = arith.constant 16 : index
    %c0_30 = arith.constant 0 : index
    %88 = vector.load %arg17[%c16_29, %c0_30] : memref<64x128xf32, #tpu.memory_space<vmem>>, vector<8x128xf32>
    tpu.vector_store %arg17[%c16_29, %c0_30], %87 {strides = array<i32>} : memref<64x128xf32, #tpu.memory_space<vmem>>, vector<8x128xf32>,
    %c24 = arith.constant 24 : index
    %c0_31 = arith.constant 0 : index
    %89 = vector.load %arg16[%c24, %c0_31] : memref<64x512xf32, #tpu.memory_space<vmem>>, vector<8x512xf32>
    %cst_32 = arith.constant dense<0.000000e+00> : vector<8x512xf32>
    %90 = tpu.matmul %87, %5, %cst_32 {dimension_numbers = #tpu.dot_dimension_numbers<[1], [0], [0], [1], [0, 0, 1, 1], [], []>} : vector<8x128xf32>, vector<128x512xf32>, vector<8x512xf32> -> vector<8x512xf32>
    %91 = arith.addf %89, %90 : vector<8x512xf32>
    %92 = vector.extract_strided_slice %91 {offsets = [0, 0], sizes = [8, 128], strides = [1, 1]} : vector<8x512xf32> to vector<8x128xf32>
    %93 = arith.negf %92 : vector<8x128xf32>
    %94 = math.exp %93 : vector<8x128xf32>
    %cst_33 = arith.constant 1.000000e+00 : f32
    %95 = vector.broadcast %cst_33 : f32 to vector<8x128xf32>
    %96 = arith.addf %95, %94 : vector<8x128xf32>
    %97 = arith.divf %95, %96 : vector<8x128xf32>
    %98 = vector.extract_strided_slice %91 {offsets = [0, 128], sizes = [8, 128], strides = [1, 1]} : vector<8x512xf32> to vector<8x128xf32>
    %99 = arith.negf %98 : vector<8x128xf32>
    %100 = math.exp %99 : vector<8x128xf32>
    %cst_34 = arith.constant 1.000000e+00 : f32
    %101 = vector.broadcast %cst_34 : f32 to vector<8x128xf32>
    %102 = arith.addf %101, %100 : vector<8x128xf32>
    %103 = arith.divf %101, %102 : vector<8x128xf32>
    %104 = vector.extract_strided_slice %91 {offsets = [0, 256], sizes = [8, 128], strides = [1, 1]} : vector<8x512xf32> to vector<8x128xf32>
    %105 = math.tanh %104 : vector<8x128xf32>
    %106 = vector.extract_strided_slice %91 {offsets = [0, 384], sizes = [8, 128], strides = [1, 1]} : vector<8x512xf32> to vector<8x128xf32>
    %107 = arith.negf %106 : vector<8x128xf32>
    %108 = math.exp %107 : vector<8x128xf32>
    %cst_35 = arith.constant 1.000000e+00 : f32
    %109 = vector.broadcast %cst_35 : f32 to vector<8x128xf32>
    %110 = arith.addf %109, %108 : vector<8x128xf32>
    %111 = arith.divf %109, %110 : vector<8x128xf32>
    %112 = arith.mulf %103, %85 : vector<8x128xf32>
    %113 = arith.mulf %97, %105 : vector<8x128xf32>
    %114 = arith.addf %112, %113 : vector<8x128xf32>
    %115 = math.tanh %114 : vector<8x128xf32>
    %116 = arith.mulf %111, %115 : vector<8x128xf32>
    %c24_36 = arith.constant 24 : index
    %c0_37 = arith.constant 0 : index
    %117 = vector.load %arg17[%c24_36, %c0_37] : memref<64x128xf32, #tpu.memory_space<vmem>>, vector<8x128xf32>
    tpu.vector_store %arg17[%c24_36, %c0_37], %116 {strides = array<i32>} : memref<64x128xf32, #tpu.memory_space<vmem>>, vector<8x128xf32>,
    %c32 = arith.constant 32 : index
    %c0_38 = arith.constant 0 : index
    %118 = vector.load %arg16[%c32, %c0_38] : memref<64x512xf32, #tpu.memory_space<vmem>>, vector<8x512xf32>
    %cst_39 = arith.constant dense<0.000000e+00> : vector<8x512xf32>
    %119 = tpu.matmul %116, %5, %cst_39 {dimension_numbers = #tpu.dot_dimension_numbers<[1], [0], [0], [1], [0, 0, 1, 1], [], []>} : vector<8x128xf32>, vector<128x512xf32>, vector<8x512xf32> -> vector<8x512xf32>
    %120 = arith.addf %118, %119 : vector<8x512xf32>
    %121 = vector.extract_strided_slice %120 {offsets = [0, 0], sizes = [8, 128], strides = [1, 1]} : vector<8x512xf32> to vector<8x128xf32>
    %122 = arith.negf %121 : vector<8x128xf32>
    %123 = math.exp %122 : vector<8x128xf32>
    %cst_40 = arith.constant 1.000000e+00 : f32
    %124 = vector.broadcast %cst_40 : f32 to vector<8x128xf32>
    %125 = arith.addf %124, %123 : vector<8x128xf32>
    %126 = arith.divf %124, %125 : vector<8x128xf32>
    %127 = vector.extract_strided_slice %120 {offsets = [0, 128], sizes = [8, 128], strides = [1, 1]} : vector<8x512xf32> to vector<8x128xf32>
    %128 = arith.negf %127 : vector<8x128xf32>
    %129 = math.exp %128 : vector<8x128xf32>
    %cst_41 = arith.constant 1.000000e+00 : f32
    %130 = vector.broadcast %cst_41 : f32 to vector<8x128xf32>
    %131 = arith.addf %130, %129 : vector<8x128xf32>
    %132 = arith.divf %130, %131 : vector<8x128xf32>
    %133 = vector.extract_strided_slice %120 {offsets = [0, 256], sizes = [8, 128], strides = [1, 1]} : vector<8x512xf32> to vector<8x128xf32>
    %134 = math.tanh %133 : vector<8x128xf32>
    %135 = vector.extract_strided_slice %120 {offsets = [0, 384], sizes = [8, 128], strides = [1, 1]} : vector<8x512xf32> to vector<8x128xf32>
    %136 = arith.negf %135 : vector<8x128xf32>
    %137 = math.exp %136 : vector<8x128xf32>
    %cst_42 = arith.constant 1.000000e+00 : f32
    %138 = vector.broadcast %cst_42 : f32 to vector<8x128xf32>
    %139 = arith.addf %138, %137 : vector<8x128xf32>
    %140 = arith.divf %138, %139 : vector<8x128xf32>
    %141 = arith.mulf %132, %114 : vector<8x128xf32>
    %142 = arith.mulf %126, %134 : vector<8x128xf32>
    %143 = arith.addf %141, %142 : vector<8x128xf32>
    %144 = math.tanh %143 : vector<8x128xf32>
    %145 = arith.mulf %140, %144 : vector<8x128xf32>
    %c32_43 = arith.constant 32 : index
    %c0_44 = arith.constant 0 : index
    %146 = vector.load %arg17[%c32_43, %c0_44] : memref<64x128xf32, #tpu.memory_space<vmem>>, vector<8x128xf32>
    tpu.vector_store %arg17[%c32_43, %c0_44], %145 {strides = array<i32>} : memref<64x128xf32, #tpu.memory_space<vmem>>, vector<8x128xf32>,
    %c40 = arith.constant 40 : index
    %c0_45 = arith.constant 0 : index
    %147 = vector.load %arg16[%c40, %c0_45] : memref<64x512xf32, #tpu.memory_space<vmem>>, vector<8x512xf32>
    %cst_46 = arith.constant dense<0.000000e+00> : vector<8x512xf32>
    %148 = tpu.matmul %145, %5, %cst_46 {dimension_numbers = #tpu.dot_dimension_numbers<[1], [0], [0], [1], [0, 0, 1, 1], [], []>} : vector<8x128xf32>, vector<128x512xf32>, vector<8x512xf32> -> vector<8x512xf32>
    %149 = arith.addf %147, %148 : vector<8x512xf32>
    %150 = vector.extract_strided_slice %149 {offsets = [0, 0], sizes = [8, 128], strides = [1, 1]} : vector<8x512xf32> to vector<8x128xf32>
    %151 = arith.negf %150 : vector<8x128xf32>
    %152 = math.exp %151 : vector<8x128xf32>
    %cst_47 = arith.constant 1.000000e+00 : f32
    %153 = vector.broadcast %cst_47 : f32 to vector<8x128xf32>
    %154 = arith.addf %153, %152 : vector<8x128xf32>
    %155 = arith.divf %153, %154 : vector<8x128xf32>
    %156 = vector.extract_strided_slice %149 {offsets = [0, 128], sizes = [8, 128], strides = [1, 1]} : vector<8x512xf32> to vector<8x128xf32>
    %157 = arith.negf %156 : vector<8x128xf32>
    %158 = math.exp %157 : vector<8x128xf32>
    %cst_48 = arith.constant 1.000000e+00 : f32
    %159 = vector.broadcast %cst_48 : f32 to vector<8x128xf32>
    %160 = arith.addf %159, %158 : vector<8x128xf32>
    %161 = arith.divf %159, %160 : vector<8x128xf32>
    %162 = vector.extract_strided_slice %149 {offsets = [0, 256], sizes = [8, 128], strides = [1, 1]} : vector<8x512xf32> to vector<8x128xf32>
    %163 = math.tanh %162 : vector<8x128xf32>
    %164 = vector.extract_strided_slice %149 {offsets = [0, 384], sizes = [8, 128], strides = [1, 1]} : vector<8x512xf32> to vector<8x128xf32>
    %165 = arith.negf %164 : vector<8x128xf32>
    %166 = math.exp %165 : vector<8x128xf32>
    %cst_49 = arith.constant 1.000000e+00 : f32
    %167 = vector.broadcast %cst_49 : f32 to vector<8x128xf32>
    %168 = arith.addf %167, %166 : vector<8x128xf32>
    %169 = arith.divf %167, %168 : vector<8x128xf32>
    %170 = arith.mulf %161, %143 : vector<8x128xf32>
    %171 = arith.mulf %155, %163 : vector<8x128xf32>
    %172 = arith.addf %170, %171 : vector<8x128xf32>
    %173 = math.tanh %172 : vector<8x128xf32>
    %174 = arith.mulf %169, %173 : vector<8x128xf32>
    %c40_50 = arith.constant 40 : index
    %c0_51 = arith.constant 0 : index
    %175 = vector.load %arg17[%c40_50, %c0_51] : memref<64x128xf32, #tpu.memory_space<vmem>>, vector<8x128xf32>
    tpu.vector_store %arg17[%c40_50, %c0_51], %174 {strides = array<i32>} : memref<64x128xf32, #tpu.memory_space<vmem>>, vector<8x128xf32>,
    %c48 = arith.constant 48 : index
    %c0_52 = arith.constant 0 : index
    %176 = vector.load %arg16[%c48, %c0_52] : memref<64x512xf32, #tpu.memory_space<vmem>>, vector<8x512xf32>
    %cst_53 = arith.constant dense<0.000000e+00> : vector<8x512xf32>
    %177 = tpu.matmul %174, %5, %cst_53 {dimension_numbers = #tpu.dot_dimension_numbers<[1], [0], [0], [1], [0, 0, 1, 1], [], []>} : vector<8x128xf32>, vector<128x512xf32>, vector<8x512xf32> -> vector<8x512xf32>
    %178 = arith.addf %176, %177 : vector<8x512xf32>
    %179 = vector.extract_strided_slice %178 {offsets = [0, 0], sizes = [8, 128], strides = [1, 1]} : vector<8x512xf32> to vector<8x128xf32>
    %180 = arith.negf %179 : vector<8x128xf32>
    %181 = math.exp %180 : vector<8x128xf32>
    %cst_54 = arith.constant 1.000000e+00 : f32
    %182 = vector.broadcast %cst_54 : f32 to vector<8x128xf32>
    %183 = arith.addf %182, %181 : vector<8x128xf32>
    %184 = arith.divf %182, %183 : vector<8x128xf32>
    %185 = vector.extract_strided_slice %178 {offsets = [0, 128], sizes = [8, 128], strides = [1, 1]} : vector<8x512xf32> to vector<8x128xf32>
    %186 = arith.negf %185 : vector<8x128xf32>
    %187 = math.exp %186 : vector<8x128xf32>
    %cst_55 = arith.constant 1.000000e+00 : f32
    %188 = vector.broadcast %cst_55 : f32 to vector<8x128xf32>
    %189 = arith.addf %188, %187 : vector<8x128xf32>
    %190 = arith.divf %188, %189 : vector<8x128xf32>
    %191 = vector.extract_strided_slice %178 {offsets = [0, 256], sizes = [8, 128], strides = [1, 1]} : vector<8x512xf32> to vector<8x128xf32>
    %192 = math.tanh %191 : vector<8x128xf32>
    %193 = vector.extract_strided_slice %178 {offsets = [0, 384], sizes = [8, 128], strides = [1, 1]} : vector<8x512xf32> to vector<8x128xf32>
    %194 = arith.negf %193 : vector<8x128xf32>
    %195 = math.exp %194 : vector<8x128xf32>
    %cst_56 = arith.constant 1.000000e+00 : f32
    %196 = vector.broadcast %cst_56 : f32 to vector<8x128xf32>
    %197 = arith.addf %196, %195 : vector<8x128xf32>
    %198 = arith.divf %196, %197 : vector<8x128xf32>
    %199 = arith.mulf %190, %172 : vector<8x128xf32>
    %200 = arith.mulf %184, %192 : vector<8x128xf32>
    %201 = arith.addf %199, %200 : vector<8x128xf32>
    %202 = math.tanh %201 : vector<8x128xf32>
    %203 = arith.mulf %198, %202 : vector<8x128xf32>
    %c48_57 = arith.constant 48 : index
    %c0_58 = arith.constant 0 : index
    %204 = vector.load %arg17[%c48_57, %c0_58] : memref<64x128xf32, #tpu.memory_space<vmem>>, vector<8x128xf32>
    tpu.vector_store %arg17[%c48_57, %c0_58], %203 {strides = array<i32>} : memref<64x128xf32, #tpu.memory_space<vmem>>, vector<8x128xf32>,
    %c56 = arith.constant 56 : index
    %c0_59 = arith.constant 0 : index
    %205 = vector.load %arg16[%c56, %c0_59] : memref<64x512xf32, #tpu.memory_space<vmem>>, vector<8x512xf32>
    %cst_60 = arith.constant dense<0.000000e+00> : vector<8x512xf32>
    %206 = tpu.matmul %203, %5, %cst_60 {dimension_numbers = #tpu.dot_dimension_numbers<[1], [0], [0], [1], [0, 0, 1, 1], [], []>} : vector<8x128xf32>, vector<128x512xf32>, vector<8x512xf32> -> vector<8x512xf32>
    %207 = arith.addf %205, %206 : vector<8x512xf32>
    %208 = vector.extract_strided_slice %207 {offsets = [0, 0], sizes = [8, 128], strides = [1, 1]} : vector<8x512xf32> to vector<8x128xf32>
    %209 = arith.negf %208 : vector<8x128xf32>
    %210 = math.exp %209 : vector<8x128xf32>
    %cst_61 = arith.constant 1.000000e+00 : f32
    %211 = vector.broadcast %cst_61 : f32 to vector<8x128xf32>
    %212 = arith.addf %211, %210 : vector<8x128xf32>
    %213 = arith.divf %211, %212 : vector<8x128xf32>
    %214 = vector.extract_strided_slice %207 {offsets = [0, 128], sizes = [8, 128], strides = [1, 1]} : vector<8x512xf32> to vector<8x128xf32>
    %215 = arith.negf %214 : vector<8x128xf32>
    %216 = math.exp %215 : vector<8x128xf32>
    %cst_62 = arith.constant 1.000000e+00 : f32
    %217 = vector.broadcast %cst_62 : f32 to vector<8x128xf32>
    %218 = arith.addf %217, %216 : vector<8x128xf32>
    %219 = arith.divf %217, %218 : vector<8x128xf32>
    %220 = vector.extract_strided_slice %207 {offsets = [0, 256], sizes = [8, 128], strides = [1, 1]} : vector<8x512xf32> to vector<8x128xf32>
    %221 = math.tanh %220 : vector<8x128xf32>
    %222 = vector.extract_strided_slice %207 {offsets = [0, 384], sizes = [8, 128], strides = [1, 1]} : vector<8x512xf32> to vector<8x128xf32>
    %223 = arith.negf %222 : vector<8x128xf32>
    %224 = math.exp %223 : vector<8x128xf32>
    %cst_63 = arith.constant 1.000000e+00 : f32
    %225 = vector.broadcast %cst_63 : f32 to vector<8x128xf32>
    %226 = arith.addf %225, %224 : vector<8x128xf32>
    %227 = arith.divf %225, %226 : vector<8x128xf32>
    %228 = arith.mulf %219, %201 : vector<8x128xf32>
    %229 = arith.mulf %213, %221 : vector<8x128xf32>
    %230 = arith.addf %228, %229 : vector<8x128xf32>
    %231 = math.tanh %230 : vector<8x128xf32>
    %232 = arith.mulf %227, %231 : vector<8x128xf32>
    %c56_64 = arith.constant 56 : index
    %c0_65 = arith.constant 0 : index
    %233 = vector.load %arg17[%c56_64, %c0_65] : memref<64x128xf32, #tpu.memory_space<vmem>>, vector<8x128xf32>
    tpu.vector_store %arg17[%c56_64, %c0_65], %232 {strides = array<i32>} : memref<64x128xf32, #tpu.memory_space<vmem>>, vector<8x128xf32>,
    %c0_i32_66 = arith.constant 0 : i32
    %c0_i32_67 = arith.constant 0 : i32
    %234 = tpu.memref_slice %arg18[%c0_i32_66, %c0_i32_67] : memref<1x2x!tpu.dma_semaphore, #tpu.memory_space<semaphore_mem>> -> memref<1x1x!tpu.dma_semaphore, #tpu.memory_space<semaphore_mem>>
    %235 = tpu.memref_squeeze %234 : memref<1x1x!tpu.dma_semaphore, #tpu.memory_space<semaphore_mem>> -> memref<!tpu.dma_semaphore, #tpu.memory_space<semaphore_mem>>
    tpu.wait_dma2 semaphore(%235 : memref<!tpu.dma_semaphore, #tpu.memory_space<semaphore_mem>>) src(%arg5 : memref<128x512xf32, #tpu.memory_space<any>>) dst(%arg14 : memref<128x512xf32, #tpu.memory_space<vmem>>)
    %c0_i32_68 = arith.constant 0 : i32
    %c1_i32_69 = arith.constant 1 : i32
    %236 = tpu.memref_slice %arg18[%c0_i32_68, %c1_i32_69] : memref<1x2x!tpu.dma_semaphore, #tpu.memory_space<semaphore_mem>> -> memref<1x1x!tpu.dma_semaphore, #tpu.memory_space<semaphore_mem>>
    %237 = tpu.memref_squeeze %236 : memref<1x1x!tpu.dma_semaphore, #tpu.memory_space<semaphore_mem>> -> memref<!tpu.dma_semaphore, #tpu.memory_space<semaphore_mem>>
    tpu.wait_dma2 semaphore(%237 : memref<!tpu.dma_semaphore, #tpu.memory_space<semaphore_mem>>) src(%arg6 : memref<128x512xf32, #tpu.memory_space<any>>) dst(%arg15 : memref<128x512xf32, #tpu.memory_space<vmem>>)
    %c0_70 = arith.constant 0 : index
    %c0_71 = arith.constant 0 : index
    %238 = vector.load %arg14[%c0_70, %c0_71] : memref<128x512xf32, #tpu.memory_space<vmem>>, vector<128x512xf32>
    %c0_72 = arith.constant 0 : index
    %c0_73 = arith.constant 0 : index
    %239 = vector.load %arg15[%c0_72, %c0_73] : memref<128x512xf32, #tpu.memory_space<vmem>>, vector<128x512xf32>
    %c0_74 = arith.constant 0 : index
    %c0_75 = arith.constant 0 : index
    %240 = vector.load %arg17[%c0_74, %c0_75] : memref<64x128xf32, #tpu.memory_space<vmem>>, vector<64x128xf32>
    %cst_76 = arith.constant dense<0.000000e+00> : vector<64x512xf32>
    %241 = tpu.matmul %240, %238, %cst_76 {dimension_numbers = #tpu.dot_dimension_numbers<[1], [0], [0], [1], [0, 0, 1, 1], [], []>} : vector<64x128xf32>, vector<128x512xf32>, vector<64x512xf32> -> vector<64x512xf32>
    %c0_77 = arith.constant 0 : index
    %c0_78 = arith.constant 0 : index
    %242 = vector.load %arg7[%c0_77, %c0_78] : memref<1x512xf32, #tpu.memory_space<vmem>>, vector<1x512xf32>
    %243 = vector.broadcast %242 : vector<1x512xf32> to vector<64x512xf32>
    %244 = arith.addf %241, %243 : vector<64x512xf32>
    %c0_79 = arith.constant 0 : index
    %c0_80 = arith.constant 0 : index
    %245 = vector.load %arg16[%c0_79, %c0_80] : memref<64x512xf32, #tpu.memory_space<vmem>>, vector<64x512xf32>
    tpu.vector_store %arg16[%c0_79, %c0_80], %244 {strides = array<i32>} : memref<64x512xf32, #tpu.memory_space<vmem>>, vector<64x512xf32>,
    %c0_81 = arith.constant 0 : index
    %c0_82 = arith.constant 0 : index
    %246 = vector.load %arg16[%c0_81, %c0_82] : memref<64x512xf32, #tpu.memory_space<vmem>>, vector<8x512xf32>
    %247 = vector.extract_strided_slice %246 {offsets = [0, 0], sizes = [8, 128], strides = [1, 1]} : vector<8x512xf32> to vector<8x128xf32>
    %248 = arith.negf %247 : vector<8x128xf32>
    %249 = math.exp %248 : vector<8x128xf32>
    %cst_83 = arith.constant 1.000000e+00 : f32
    %250 = vector.broadcast %cst_83 : f32 to vector<8x128xf32>
    %251 = arith.addf %250, %249 : vector<8x128xf32>
    %252 = arith.divf %250, %251 : vector<8x128xf32>
    %253 = vector.extract_strided_slice %246 {offsets = [0, 256], sizes = [8, 128], strides = [1, 1]} : vector<8x512xf32> to vector<8x128xf32>
    %254 = math.tanh %253 : vector<8x128xf32>
    %255 = vector.extract_strided_slice %246 {offsets = [0, 384], sizes = [8, 128], strides = [1, 1]} : vector<8x512xf32> to vector<8x128xf32>
    %256 = arith.negf %255 : vector<8x128xf32>
    %257 = math.exp %256 : vector<8x128xf32>
    %cst_84 = arith.constant 1.000000e+00 : f32
    %258 = vector.broadcast %cst_84 : f32 to vector<8x128xf32>
    %259 = arith.addf %258, %257 : vector<8x128xf32>
    %260 = arith.divf %258, %259 : vector<8x128xf32>
    %261 = arith.mulf %252, %254 : vector<8x128xf32>
    %262 = math.tanh %261 : vector<8x128xf32>
    %263 = arith.mulf %260, %262 : vector<8x128xf32>
    %c0_85 = arith.constant 0 : index
    %c0_86 = arith.constant 0 : index
    %264 = vector.load %arg17[%c0_85, %c0_86] : memref<64x128xf32, #tpu.memory_space<vmem>>, vector<8x128xf32>
    tpu.vector_store %arg17[%c0_85, %c0_86], %263 {strides = array<i32>} : memref<64x128xf32, #tpu.memory_space<vmem>>, vector<8x128xf32>,
    %c8_87 = arith.constant 8 : index
    %c0_88 = arith.constant 0 : index
    %265 = vector.load %arg16[%c8_87, %c0_88] : memref<64x512xf32, #tpu.memory_space<vmem>>, vector<8x512xf32>
    %cst_89 = arith.constant dense<0.000000e+00> : vector<8x512xf32>
    %266 = tpu.matmul %263, %239, %cst_89 {dimension_numbers = #tpu.dot_dimension_numbers<[1], [0], [0], [1], [0, 0, 1, 1], [], []>} : vector<8x128xf32>, vector<128x512xf32>, vector<8x512xf32> -> vector<8x512xf32>
    %267 = arith.addf %265, %266 : vector<8x512xf32>
    %268 = vector.extract_strided_slice %267 {offsets = [0, 0], sizes = [8, 128], strides = [1, 1]} : vector<8x512xf32> to vector<8x128xf32>
    %269 = arith.negf %268 : vector<8x128xf32>
    %270 = math.exp %269 : vector<8x128xf32>
    %cst_90 = arith.constant 1.000000e+00 : f32
    %271 = vector.broadcast %cst_90 : f32 to vector<8x128xf32>
    %272 = arith.addf %271, %270 : vector<8x128xf32>
    %273 = arith.divf %271, %272 : vector<8x128xf32>
    %274 = vector.extract_strided_slice %267 {offsets = [0, 128], sizes = [8, 128], strides = [1, 1]} : vector<8x512xf32> to vector<8x128xf32>
    %275 = arith.negf %274 : vector<8x128xf32>
    %276 = math.exp %275 : vector<8x128xf32>
    %cst_91 = arith.constant 1.000000e+00 : f32
    %277 = vector.broadcast %cst_91 : f32 to vector<8x128xf32>
    %278 = arith.addf %277, %276 : vector<8x128xf32>
    %279 = arith.divf %277, %278 : vector<8x128xf32>
    %280 = vector.extract_strided_slice %267 {offsets = [0, 256], sizes = [8, 128], strides = [1, 1]} : vector<8x512xf32> to vector<8x128xf32>
    %281 = math.tanh %280 : vector<8x128xf32>
    %282 = vector.extract_strided_slice %267 {offsets = [0, 384], sizes = [8, 128], strides = [1, 1]} : vector<8x512xf32> to vector<8x128xf32>
    %283 = arith.negf %282 : vector<8x128xf32>
    %284 = math.exp %283 : vector<8x128xf32>
    %cst_92 = arith.constant 1.000000e+00 : f32
    %285 = vector.broadcast %cst_92 : f32 to vector<8x128xf32>
    %286 = arith.addf %285, %284 : vector<8x128xf32>
    %287 = arith.divf %285, %286 : vector<8x128xf32>
    %288 = arith.mulf %279, %261 : vector<8x128xf32>
    %289 = arith.mulf %273, %281 : vector<8x128xf32>
    %290 = arith.addf %288, %289 : vector<8x128xf32>
    %291 = math.tanh %290 : vector<8x128xf32>
    %292 = arith.mulf %287, %291 : vector<8x128xf32>
    %c8_93 = arith.constant 8 : index
    %c0_94 = arith.constant 0 : index
    %293 = vector.load %arg17[%c8_93, %c0_94] : memref<64x128xf32, #tpu.memory_space<vmem>>, vector<8x128xf32>
    tpu.vector_store %arg17[%c8_93, %c0_94], %292 {strides = array<i32>} : memref<64x128xf32, #tpu.memory_space<vmem>>, vector<8x128xf32>,
    %c16_95 = arith.constant 16 : index
    %c0_96 = arith.constant 0 : index
    %294 = vector.load %arg16[%c16_95, %c0_96] : memref<64x512xf32, #tpu.memory_space<vmem>>, vector<8x512xf32>
    %cst_97 = arith.constant dense<0.000000e+00> : vector<8x512xf32>
    %295 = tpu.matmul %292, %239, %cst_97 {dimension_numbers = #tpu.dot_dimension_numbers<[1], [0], [0], [1], [0, 0, 1, 1], [], []>} : vector<8x128xf32>, vector<128x512xf32>, vector<8x512xf32> -> vector<8x512xf32>
    %296 = arith.addf %294, %295 : vector<8x512xf32>
    %297 = vector.extract_strided_slice %296 {offsets = [0, 0], sizes = [8, 128], strides = [1, 1]} : vector<8x512xf32> to vector<8x128xf32>
    %298 = arith.negf %297 : vector<8x128xf32>
    %299 = math.exp %298 : vector<8x128xf32>
    %cst_98 = arith.constant 1.000000e+00 : f32
    %300 = vector.broadcast %cst_98 : f32 to vector<8x128xf32>
    %301 = arith.addf %300, %299 : vector<8x128xf32>
    %302 = arith.divf %300, %301 : vector<8x128xf32>
    %303 = vector.extract_strided_slice %296 {offsets = [0, 128], sizes = [8, 128], strides = [1, 1]} : vector<8x512xf32> to vector<8x128xf32>
    %304 = arith.negf %303 : vector<8x128xf32>
    %305 = math.exp %304 : vector<8x128xf32>
    %cst_99 = arith.constant 1.000000e+00 : f32
    %306 = vector.broadcast %cst_99 : f32 to vector<8x128xf32>
    %307 = arith.addf %306, %305 : vector<8x128xf32>
    %308 = arith.divf %306, %307 : vector<8x128xf32>
    %309 = vector.extract_strided_slice %296 {offsets = [0, 256], sizes = [8, 128], strides = [1, 1]} : vector<8x512xf32> to vector<8x128xf32>
    %310 = math.tanh %309 : vector<8x128xf32>
    %311 = vector.extract_strided_slice %296 {offsets = [0, 384], sizes = [8, 128], strides = [1, 1]} : vector<8x512xf32> to vector<8x128xf32>
    %312 = arith.negf %311 : vector<8x128xf32>
    %313 = math.exp %312 : vector<8x128xf32>
    %cst_100 = arith.constant 1.000000e+00 : f32
    %314 = vector.broadcast %cst_100 : f32 to vector<8x128xf32>
    %315 = arith.addf %314, %313 : vector<8x128xf32>
    %316 = arith.divf %314, %315 : vector<8x128xf32>
    %317 = arith.mulf %308, %290 : vector<8x128xf32>
    %318 = arith.mulf %302, %310 : vector<8x128xf32>
    %319 = arith.addf %317, %318 : vector<8x128xf32>
    %320 = math.tanh %319 : vector<8x128xf32>
    %321 = arith.mulf %316, %320 : vector<8x128xf32>
    %c16_101 = arith.constant 16 : index
    %c0_102 = arith.constant 0 : index
    %322 = vector.load %arg17[%c16_101, %c0_102] : memref<64x128xf32, #tpu.memory_space<vmem>>, vector<8x128xf32>
    tpu.vector_store %arg17[%c16_101, %c0_102], %321 {strides = array<i32>} : memref<64x128xf32, #tpu.memory_space<vmem>>, vector<8x128xf32>,
    %c24_103 = arith.constant 24 : index
    %c0_104 = arith.constant 0 : index
    %323 = vector.load %arg16[%c24_103, %c0_104] : memref<64x512xf32, #tpu.memory_space<vmem>>, vector<8x512xf32>
    %cst_105 = arith.constant dense<0.000000e+00> : vector<8x512xf32>
    %324 = tpu.matmul %321, %239, %cst_105 {dimension_numbers = #tpu.dot_dimension_numbers<[1], [0], [0], [1], [0, 0, 1, 1], [], []>} : vector<8x128xf32>, vector<128x512xf32>, vector<8x512xf32> -> vector<8x512xf32>
    %325 = arith.addf %323, %324 : vector<8x512xf32>
    %326 = vector.extract_strided_slice %325 {offsets = [0, 0], sizes = [8, 128], strides = [1, 1]} : vector<8x512xf32> to vector<8x128xf32>
    %327 = arith.negf %326 : vector<8x128xf32>
    %328 = math.exp %327 : vector<8x128xf32>
    %cst_106 = arith.constant 1.000000e+00 : f32
    %329 = vector.broadcast %cst_106 : f32 to vector<8x128xf32>
    %330 = arith.addf %329, %328 : vector<8x128xf32>
    %331 = arith.divf %329, %330 : vector<8x128xf32>
    %332 = vector.extract_strided_slice %325 {offsets = [0, 128], sizes = [8, 128], strides = [1, 1]} : vector<8x512xf32> to vector<8x128xf32>
    %333 = arith.negf %332 : vector<8x128xf32>
    %334 = math.exp %333 : vector<8x128xf32>
    %cst_107 = arith.constant 1.000000e+00 : f32
    %335 = vector.broadcast %cst_107 : f32 to vector<8x128xf32>
    %336 = arith.addf %335, %334 : vector<8x128xf32>
    %337 = arith.divf %335, %336 : vector<8x128xf32>
    %338 = vector.extract_strided_slice %325 {offsets = [0, 256], sizes = [8, 128], strides = [1, 1]} : vector<8x512xf32> to vector<8x128xf32>
    %339 = math.tanh %338 : vector<8x128xf32>
    %340 = vector.extract_strided_slice %325 {offsets = [0, 384], sizes = [8, 128], strides = [1, 1]} : vector<8x512xf32> to vector<8x128xf32>
    %341 = arith.negf %340 : vector<8x128xf32>
    %342 = math.exp %341 : vector<8x128xf32>
    %cst_108 = arith.constant 1.000000e+00 : f32
    %343 = vector.broadcast %cst_108 : f32 to vector<8x128xf32>
    %344 = arith.addf %343, %342 : vector<8x128xf32>
    %345 = arith.divf %343, %344 : vector<8x128xf32>
    %346 = arith.mulf %337, %319 : vector<8x128xf32>
    %347 = arith.mulf %331, %339 : vector<8x128xf32>
    %348 = arith.addf %346, %347 : vector<8x128xf32>
    %349 = math.tanh %348 : vector<8x128xf32>
    %350 = arith.mulf %345, %349 : vector<8x128xf32>
    %c24_109 = arith.constant 24 : index
    %c0_110 = arith.constant 0 : index
    %351 = vector.load %arg17[%c24_109, %c0_110] : memref<64x128xf32, #tpu.memory_space<vmem>>, vector<8x128xf32>
    tpu.vector_store %arg17[%c24_109, %c0_110], %350 {strides = array<i32>} : memref<64x128xf32, #tpu.memory_space<vmem>>, vector<8x128xf32>,
    %c32_111 = arith.constant 32 : index
    %c0_112 = arith.constant 0 : index
    %352 = vector.load %arg16[%c32_111, %c0_112] : memref<64x512xf32, #tpu.memory_space<vmem>>, vector<8x512xf32>
    %cst_113 = arith.constant dense<0.000000e+00> : vector<8x512xf32>
    %353 = tpu.matmul %350, %239, %cst_113 {dimension_numbers = #tpu.dot_dimension_numbers<[1], [0], [0], [1], [0, 0, 1, 1], [], []>} : vector<8x128xf32>, vector<128x512xf32>, vector<8x512xf32> -> vector<8x512xf32>
    %354 = arith.addf %352, %353 : vector<8x512xf32>
    %355 = vector.extract_strided_slice %354 {offsets = [0, 0], sizes = [8, 128], strides = [1, 1]} : vector<8x512xf32> to vector<8x128xf32>
    %356 = arith.negf %355 : vector<8x128xf32>
    %357 = math.exp %356 : vector<8x128xf32>
    %cst_114 = arith.constant 1.000000e+00 : f32
    %358 = vector.broadcast %cst_114 : f32 to vector<8x128xf32>
    %359 = arith.addf %358, %357 : vector<8x128xf32>
    %360 = arith.divf %358, %359 : vector<8x128xf32>
    %361 = vector.extract_strided_slice %354 {offsets = [0, 128], sizes = [8, 128], strides = [1, 1]} : vector<8x512xf32> to vector<8x128xf32>
    %362 = arith.negf %361 : vector<8x128xf32>
    %363 = math.exp %362 : vector<8x128xf32>
    %cst_115 = arith.constant 1.000000e+00 : f32
    %364 = vector.broadcast %cst_115 : f32 to vector<8x128xf32>
    %365 = arith.addf %364, %363 : vector<8x128xf32>
    %366 = arith.divf %364, %365 : vector<8x128xf32>
    %367 = vector.extract_strided_slice %354 {offsets = [0, 256], sizes = [8, 128], strides = [1, 1]} : vector<8x512xf32> to vector<8x128xf32>
    %368 = math.tanh %367 : vector<8x128xf32>
    %369 = vector.extract_strided_slice %354 {offsets = [0, 384], sizes = [8, 128], strides = [1, 1]} : vector<8x512xf32> to vector<8x128xf32>
    %370 = arith.negf %369 : vector<8x128xf32>
    %371 = math.exp %370 : vector<8x128xf32>
    %cst_116 = arith.constant 1.000000e+00 : f32
    %372 = vector.broadcast %cst_116 : f32 to vector<8x128xf32>
    %373 = arith.addf %372, %371 : vector<8x128xf32>
    %374 = arith.divf %372, %373 : vector<8x128xf32>
    %375 = arith.mulf %366, %348 : vector<8x128xf32>
    %376 = arith.mulf %360, %368 : vector<8x128xf32>
    %377 = arith.addf %375, %376 : vector<8x128xf32>
    %378 = math.tanh %377 : vector<8x128xf32>
    %379 = arith.mulf %374, %378 : vector<8x128xf32>
    %c32_117 = arith.constant 32 : index
    %c0_118 = arith.constant 0 : index
    %380 = vector.load %arg17[%c32_117, %c0_118] : memref<64x128xf32, #tpu.memory_space<vmem>>, vector<8x128xf32>
    tpu.vector_store %arg17[%c32_117, %c0_118], %379 {strides = array<i32>} : memref<64x128xf32, #tpu.memory_space<vmem>>, vector<8x128xf32>,
    %c40_119 = arith.constant 40 : index
    %c0_120 = arith.constant 0 : index
    %381 = vector.load %arg16[%c40_119, %c0_120] : memref<64x512xf32, #tpu.memory_space<vmem>>, vector<8x512xf32>
    %cst_121 = arith.constant dense<0.000000e+00> : vector<8x512xf32>
    %382 = tpu.matmul %379, %239, %cst_121 {dimension_numbers = #tpu.dot_dimension_numbers<[1], [0], [0], [1], [0, 0, 1, 1], [], []>} : vector<8x128xf32>, vector<128x512xf32>, vector<8x512xf32> -> vector<8x512xf32>
    %383 = arith.addf %381, %382 : vector<8x512xf32>
    %384 = vector.extract_strided_slice %383 {offsets = [0, 0], sizes = [8, 128], strides = [1, 1]} : vector<8x512xf32> to vector<8x128xf32>
    %385 = arith.negf %384 : vector<8x128xf32>
    %386 = math.exp %385 : vector<8x128xf32>
    %cst_122 = arith.constant 1.000000e+00 : f32
    %387 = vector.broadcast %cst_122 : f32 to vector<8x128xf32>
    %388 = arith.addf %387, %386 : vector<8x128xf32>
    %389 = arith.divf %387, %388 : vector<8x128xf32>
    %390 = vector.extract_strided_slice %383 {offsets = [0, 128], sizes = [8, 128], strides = [1, 1]} : vector<8x512xf32> to vector<8x128xf32>
    %391 = arith.negf %390 : vector<8x128xf32>
    %392 = math.exp %391 : vector<8x128xf32>
    %cst_123 = arith.constant 1.000000e+00 : f32
    %393 = vector.broadcast %cst_123 : f32 to vector<8x128xf32>
    %394 = arith.addf %393, %392 : vector<8x128xf32>
    %395 = arith.divf %393, %394 : vector<8x128xf32>
    %396 = vector.extract_strided_slice %383 {offsets = [0, 256], sizes = [8, 128], strides = [1, 1]} : vector<8x512xf32> to vector<8x128xf32>
    %397 = math.tanh %396 : vector<8x128xf32>
    %398 = vector.extract_strided_slice %383 {offsets = [0, 384], sizes = [8, 128], strides = [1, 1]} : vector<8x512xf32> to vector<8x128xf32>
    %399 = arith.negf %398 : vector<8x128xf32>
    %400 = math.exp %399 : vector<8x128xf32>
    %cst_124 = arith.constant 1.000000e+00 : f32
    %401 = vector.broadcast %cst_124 : f32 to vector<8x128xf32>
    %402 = arith.addf %401, %400 : vector<8x128xf32>
    %403 = arith.divf %401, %402 : vector<8x128xf32>
    %404 = arith.mulf %395, %377 : vector<8x128xf32>
    %405 = arith.mulf %389, %397 : vector<8x128xf32>
    %406 = arith.addf %404, %405 : vector<8x128xf32>
    %407 = math.tanh %406 : vector<8x128xf32>
    %408 = arith.mulf %403, %407 : vector<8x128xf32>
    %c40_125 = arith.constant 40 : index
    %c0_126 = arith.constant 0 : index
    %409 = vector.load %arg17[%c40_125, %c0_126] : memref<64x128xf32, #tpu.memory_space<vmem>>, vector<8x128xf32>
    tpu.vector_store %arg17[%c40_125, %c0_126], %408 {strides = array<i32>} : memref<64x128xf32, #tpu.memory_space<vmem>>, vector<8x128xf32>,
    %c48_127 = arith.constant 48 : index
    %c0_128 = arith.constant 0 : index
    %410 = vector.load %arg16[%c48_127, %c0_128] : memref<64x512xf32, #tpu.memory_space<vmem>>, vector<8x512xf32>
    %cst_129 = arith.constant dense<0.000000e+00> : vector<8x512xf32>
    %411 = tpu.matmul %408, %239, %cst_129 {dimension_numbers = #tpu.dot_dimension_numbers<[1], [0], [0], [1], [0, 0, 1, 1], [], []>} : vector<8x128xf32>, vector<128x512xf32>, vector<8x512xf32> -> vector<8x512xf32>
    %412 = arith.addf %410, %411 : vector<8x512xf32>
    %413 = vector.extract_strided_slice %412 {offsets = [0, 0], sizes = [8, 128], strides = [1, 1]} : vector<8x512xf32> to vector<8x128xf32>
    %414 = arith.negf %413 : vector<8x128xf32>
    %415 = math.exp %414 : vector<8x128xf32>
    %cst_130 = arith.constant 1.000000e+00 : f32
    %416 = vector.broadcast %cst_130 : f32 to vector<8x128xf32>
    %417 = arith.addf %416, %415 : vector<8x128xf32>
    %418 = arith.divf %416, %417 : vector<8x128xf32>
    %419 = vector.extract_strided_slice %412 {offsets = [0, 128], sizes = [8, 128], strides = [1, 1]} : vector<8x512xf32> to vector<8x128xf32>
    %420 = arith.negf %419 : vector<8x128xf32>
    %421 = math.exp %420 : vector<8x128xf32>
    %cst_131 = arith.constant 1.000000e+00 : f32
    %422 = vector.broadcast %cst_131 : f32 to vector<8x128xf32>
    %423 = arith.addf %422, %421 : vector<8x128xf32>
    %424 = arith.divf %422, %423 : vector<8x128xf32>
    %425 = vector.extract_strided_slice %412 {offsets = [0, 256], sizes = [8, 128], strides = [1, 1]} : vector<8x512xf32> to vector<8x128xf32>
    %426 = math.tanh %425 : vector<8x128xf32>
    %427 = vector.extract_strided_slice %412 {offsets = [0, 384], sizes = [8, 128], strides = [1, 1]} : vector<8x512xf32> to vector<8x128xf32>
    %428 = arith.negf %427 : vector<8x128xf32>
    %429 = math.exp %428 : vector<8x128xf32>
    %cst_132 = arith.constant 1.000000e+00 : f32
    %430 = vector.broadcast %cst_132 : f32 to vector<8x128xf32>
    %431 = arith.addf %430, %429 : vector<8x128xf32>
    %432 = arith.divf %430, %431 : vector<8x128xf32>
    %433 = arith.mulf %424, %406 : vector<8x128xf32>
    %434 = arith.mulf %418, %426 : vector<8x128xf32>
    %435 = arith.addf %433, %434 : vector<8x128xf32>
    %436 = math.tanh %435 : vector<8x128xf32>
    %437 = arith.mulf %432, %436 : vector<8x128xf32>
    %c48_133 = arith.constant 48 : index
    %c0_134 = arith.constant 0 : index
    %438 = vector.load %arg17[%c48_133, %c0_134] : memref<64x128xf32, #tpu.memory_space<vmem>>, vector<8x128xf32>
    tpu.vector_store %arg17[%c48_133, %c0_134], %437 {strides = array<i32>} : memref<64x128xf32, #tpu.memory_space<vmem>>, vector<8x128xf32>,
    %c56_135 = arith.constant 56 : index
    %c0_136 = arith.constant 0 : index
    %439 = vector.load %arg16[%c56_135, %c0_136] : memref<64x512xf32, #tpu.memory_space<vmem>>, vector<8x512xf32>
    %cst_137 = arith.constant dense<0.000000e+00> : vector<8x512xf32>
    %440 = tpu.matmul %437, %239, %cst_137 {dimension_numbers = #tpu.dot_dimension_numbers<[1], [0], [0], [1], [0, 0, 1, 1], [], []>} : vector<8x128xf32>, vector<128x512xf32>, vector<8x512xf32> -> vector<8x512xf32>
    %441 = arith.addf %439, %440 : vector<8x512xf32>
    %442 = vector.extract_strided_slice %441 {offsets = [0, 0], sizes = [8, 128], strides = [1, 1]} : vector<8x512xf32> to vector<8x128xf32>
    %443 = arith.negf %442 : vector<8x128xf32>
    %444 = math.exp %443 : vector<8x128xf32>
    %cst_138 = arith.constant 1.000000e+00 : f32
    %445 = vector.broadcast %cst_138 : f32 to vector<8x128xf32>
    %446 = arith.addf %445, %444 : vector<8x128xf32>
    %447 = arith.divf %445, %446 : vector<8x128xf32>
    %448 = vector.extract_strided_slice %441 {offsets = [0, 128], sizes = [8, 128], strides = [1, 1]} : vector<8x512xf32> to vector<8x128xf32>
    %449 = arith.negf %448 : vector<8x128xf32>
    %450 = math.exp %449 : vector<8x128xf32>
    %cst_139 = arith.constant 1.000000e+00 : f32
    %451 = vector.broadcast %cst_139 : f32 to vector<8x128xf32>
    %452 = arith.addf %451, %450 : vector<8x128xf32>
    %453 = arith.divf %451, %452 : vector<8x128xf32>
    %454 = vector.extract_strided_slice %441 {offsets = [0, 256], sizes = [8, 128], strides = [1, 1]} : vector<8x512xf32> to vector<8x128xf32>
    %455 = math.tanh %454 : vector<8x128xf32>
    %456 = vector.extract_strided_slice %441 {offsets = [0, 384], sizes = [8, 128], strides = [1, 1]} : vector<8x512xf32> to vector<8x128xf32>
    %457 = arith.negf %456 : vector<8x128xf32>
    %458 = math.exp %457 : vector<8x128xf32>
    %cst_140 = arith.constant 1.000000e+00 : f32
    %459 = vector.broadcast %cst_140 : f32 to vector<8x128xf32>
    %460 = arith.addf %459, %458 : vector<8x128xf32>
    %461 = arith.divf %459, %460 : vector<8x128xf32>
    %462 = arith.mulf %453, %435 : vector<8x128xf32>
    %463 = arith.mulf %447, %455 : vector<8x128xf32>
    %464 = arith.addf %462, %463 : vector<8x128xf32>
    %465 = math.tanh %464 : vector<8x128xf32>
    %466 = arith.mulf %461, %465 : vector<8x128xf32>
    %c56_141 = arith.constant 56 : index
    %c0_142 = arith.constant 0 : index
    %467 = vector.load %arg17[%c56_141, %c0_142] : memref<64x128xf32, #tpu.memory_space<vmem>>, vector<8x128xf32>
    tpu.vector_store %arg17[%c56_141, %c0_142], %466 {strides = array<i32>} : memref<64x128xf32, #tpu.memory_space<vmem>>, vector<8x128xf32>,
    %c0_143 = arith.constant 0 : index
    %c0_144 = arith.constant 0 : index
    %468 = vector.load %arg17[%c0_143, %c0_144] : memref<64x128xf32, #tpu.memory_space<vmem>>, vector<64x128xf32>
    %c0_145 = arith.constant 0 : index
    %c0_146 = arith.constant 0 : index
    %469 = vector.load %arg8[%c0_145, %c0_146] : memref<128x256xf32, #tpu.memory_space<vmem>>, vector<128x256xf32>
    %cst_147 = arith.constant dense<0.000000e+00> : vector<64x256xf32>
    %470 = tpu.matmul %468, %469, %cst_147 {dimension_numbers = #tpu.dot_dimension_numbers<[1], [0], [0], [1], [0, 0, 1, 1], [], []>} : vector<64x128xf32>, vector<128x256xf32>, vector<64x256xf32> -> vector<64x256xf32>
    %c0_148 = arith.constant 0 : index
    %c0_149 = arith.constant 0 : index
    %471 = vector.load %arg9[%c0_148, %c0_149] : memref<1x256xf32, #tpu.memory_space<vmem>>, vector<1x256xf32>
    %472 = vector.broadcast %471 : vector<1x256xf32> to vector<64x256xf32>
    %473 = arith.addf %470, %472 : vector<64x256xf32>
    %474 = vector.extract_strided_slice %473 {offsets = [0, 0], sizes = [64, 128], strides = [1, 1]} : vector<64x256xf32> to vector<64x128xf32>
    %475 = vector.shape_cast %474 : vector<64x128xf32> to vector<8x8x128xf32>
    %476 = vector.extract_strided_slice %473 {offsets = [56, 128], sizes = [8, 128], strides = [1, 1]} : vector<64x256xf32> to vector<8x128xf32>
    %477 = vector.shape_cast %476 : vector<8x128xf32> to vector<1x8x128xf32>
    %478 = vector.broadcast %477 : vector<1x8x128xf32> to vector<8x8x128xf32>
    %479 = arith.addf %475, %478 : vector<8x8x128xf32>
    %480 = math.tanh %479 : vector<8x8x128xf32>
    %c0_150 = arith.constant 0 : index
    %c0_151 = arith.constant 0 : index
    %481 = vector.load %arg10[%c0_150, %c0_151] : memref<1x128xf32, #tpu.memory_space<vmem>>, vector<1x128xf32>
    %482 = vector.shape_cast %481 : vector<1x128xf32> to vector<1x1x128xf32>
    %483 = vector.broadcast %482 : vector<1x1x128xf32> to vector<8x8x128xf32>
    %484 = arith.mulf %480, %483 : vector<8x8x128xf32>
    %cst_152 = arith.constant dense<0.000000e+00> : vector<8x8xf32>
    %485 = vector.multi_reduction <add>, %484, %cst_152 [2] : vector<8x8x128xf32> to vector<8x8xf32>
    %486 = vector.shape_cast %485 : vector<8x8xf32> to vector<8x8x1xf32>
    %cst_153 = arith.constant dense<0xFF800000> : vector<8x1xf32>
    %487 = vector.multi_reduction <maximumf>, %486, %cst_153 [0] : vector<8x8x1xf32> to vector<8x1xf32>
    %488 = vector.shape_cast %487 : vector<8x1xf32> to vector<1x8x1xf32>
    %489 = vector.broadcast %488 : vector<1x8x1xf32> to vector<8x8x1xf32>
    %490 = arith.subf %486, %489 : vector<8x8x1xf32>
    %491 = math.exp %490 : vector<8x8x1xf32>
    %cst_154 = arith.constant dense<0.000000e+00> : vector<8x1xf32>
    %492 = vector.multi_reduction <add>, %491, %cst_154 [0] : vector<8x8x1xf32> to vector<8x1xf32>
    %493 = vector.shape_cast %492 : vector<8x1xf32> to vector<1x8x1xf32>
    %494 = vector.broadcast %493 : vector<1x8x1xf32> to vector<8x8x1xf32>
    %495 = arith.divf %491, %494 : vector<8x8x1xf32>
    %496 = vector.shape_cast %468 : vector<64x128xf32> to vector<8x8x128xf32>
    %497 = vector.broadcast %495 : vector<8x8x1xf32> to vector<8x8x128xf32>
    %498 = arith.mulf %497, %496 : vector<8x8x128xf32>
    %cst_155 = arith.constant dense<0.000000e+00> : vector<8x128xf32>
    %499 = vector.multi_reduction <add>, %498, %cst_155 [0] : vector<8x8x128xf32> to vector<8x128xf32>
    %c0_156 = arith.constant 0 : index
    %c0_157 = arith.constant 0 : index
    %500 = vector.load %arg11[%c0_156, %c0_157] : memref<128x128xf32, #tpu.memory_space<vmem>>, vector<128x128xf32>
    %cst_158 = arith.constant dense<0.000000e+00> : vector<8x128xf32>
    %501 = tpu.matmul %499, %500, %cst_158 {dimension_numbers = #tpu.dot_dimension_numbers<[1], [0], [0], [1], [0, 0, 1, 1], [], []>} : vector<8x128xf32>, vector<128x128xf32>, vector<8x128xf32> -> vector<8x128xf32>
    %c0_159 = arith.constant 0 : index
    %c0_160 = arith.constant 0 : index
    %502 = vector.load %arg12[%c0_159, %c0_160] : memref<1x128xf32, #tpu.memory_space<vmem>>, vector<1x128xf32>
    %503 = vector.broadcast %502 : vector<1x128xf32> to vector<8x128xf32>
    %504 = arith.addf %501, %503 : vector<8x128xf32>
    %c0_161 = arith.constant 0 : index
    %c0_162 = arith.constant 0 : index
    %505 = vector.load %arg13[%c0_161, %c0_162] : memref<8x128xf32, #tpu.memory_space<vmem>>, vector<8x128xf32>
    tpu.vector_store %arg13[%c0_161, %c0_162], %504 {strides = array<i32>} : memref<8x128xf32, #tpu.memory_space<vmem>>, vector<8x128xf32>,
    return
  }
  func.func @transform_0(%arg0: i32) -> (i32, i32) {
    %c0_i32 = arith.constant 0 : i32
    %c0_i32_0 = arith.constant 0 : i32
    %c0_i32_1 = arith.constant 0 : i32
    return %c0_i32, %c0_i32_0 : i32, i32
  }
  func.func @transform_1(%arg0: i32) -> (i32, i32) {
    %c0_i32 = arith.constant 0 : i32
    %c0_i32_0 = arith.constant 0 : i32
    %c0_i32_1 = arith.constant 0 : i32
    return %c0_i32, %c0_i32_0 : i32, i32
  }
  func.func @transform_2(%arg0: i32) -> (i32, i32) {
    %c0_i32 = arith.constant 0 : i32
    %c0_i32_0 = arith.constant 0 : i32
    %c0_i32_1 = arith.constant 0 : i32
    return %c0_i32, %c0_i32_0 : i32, i32
  }
  func.func @transform_3(%arg0: i32) -> (i32, i32) {
    %c0_i32 = arith.constant 0 : i32
    %c0_i32_0 = arith.constant 0 : i32
    %c0_i32_1 = arith.constant 0 : i32
    return %c0_i32, %c0_i32_0 : i32, i32
  }
  func.func @transform_6(%arg0: i32) -> (i32, i32) {
    %c0_i32 = arith.constant 0 : i32
    %c0_i32_0 = arith.constant 0 : i32
    %c0_i32_1 = arith.constant 0 : i32
    return %c0_i32, %c0_i32_0 : i32, i32
  }
  func.func @transform_7(%arg0: i32) -> (i32, i32) {
    %c0_i32 = arith.constant 0 : i32
    %c0_i32_0 = arith.constant 0 : i32
    %c0_i32_1 = arith.constant 0 : i32
    return %c0_i32, %c0_i32_0 : i32, i32
  }
  func.func @transform_8(%arg0: i32) -> (i32, i32) {
    %c0_i32 = arith.constant 0 : i32
    %c0_i32_0 = arith.constant 0 : i32
    %c0_i32_1 = arith.constant 0 : i32
    return %c0_i32, %c0_i32_0 : i32, i32
  }
  func.func @transform_9(%arg0: i32) -> (i32, i32) {
    %c0_i32 = arith.constant 0 : i32
    %c0_i32_0 = arith.constant 0 : i32
    %c0_i32_1 = arith.constant 0 : i32
    return %c0_i32, %c0_i32_0 : i32, i32
  }
  func.func @transform_10(%arg0: i32) -> (i32, i32) {
    %c0_i32 = arith.constant 0 : i32
    %c0_i32_0 = arith.constant 0 : i32
    %c0_i32_1 = arith.constant 0 : i32
    return %c0_i32, %c0_i32_0 : i32, i32
  }
  func.func @transform_11(%arg0: i32) -> (i32, i32) {
    %c0_i32 = arith.constant 0 : i32
    %c0_i32_0 = arith.constant 0 : i32
    %c0_i32_1 = arith.constant 0 : i32
    return %c0_i32, %c0_i32_0 : i32, i32
  }
  func.func @transform_12(%arg0: i32) -> (i32, i32) {
    %c0_i32 = arith.constant 0 : i32
    %c0_i32_0 = arith.constant 0 : i32
    %c0_i32_1 = arith.constant 0 : i32
    return %c0_i32, %c0_i32_0 : i32, i32
  }
}

</mosaic_0001>

<bundles_post_ra>
// kernel: lstm3_forward_pallas.1
= control target key start
LH: loop header
LB: loop body
LE: loop exit
PB: predicated region body
PF: predicated region fallthrough
CT: control target
= control target key end

     0   :  { %17 = vsyncpa [#allocation8], 0  ;;  %s6605_s0 = inlined_call_operand.vmem [shape: f32[64,128], index: 0, kind: input, shape index: {}]   ;;  %s6606_s1 = inlined_call_operand.hbm [shape: f32[128,512], index: 1, kind: input, shape index: {}]   ;;  %s6607_s2 = inlined_call_operand.hbm [shape: f32[128,512], index: 2, kind: input, shape index: {}]   ;;  %s6608_s3 = inlined_call_operand.vmem [shape: f32[1,512], index: 3, kind: input, shape index: {}]   ;;  %s6609_s4 = inlined_call_operand.hbm [shape: f32[128,512], index: 4, kind: input, shape index: {}]   ;;  %s6610_s5 = inlined_call_operand.hbm [shape: f32[128,512], index: 5, kind: input, shape index: {}]   ;;  %s6611_s6 = inlined_call_operand.vmem [shape: f32[1,512], index: 6, kind: input, shape index: {}]   ;;  %s6612_s7 = inlined_call_operand.vmem [shape: f32[128,256], index: 7, kind: input, shape index: {}]   ;;  %s6613_s8 = inlined_call_operand.vmem [shape: f32[1,256], index: 8, kind: input, shape index: {}]   ;;  %s6614_s9 = inlined_call_operand.vmem [shape: f32[1,128], index: 9, kind: input, shape index: {}]   ;;  %s6615_s10 = inlined_call_operand.hbm [shape: f32[128,128], index: 10, kind: input, shape index: {}]   ;;  %s6616_s11 = inlined_call_operand.vmem [shape: f32[1,128], index: 11, kind: input, shape index: {}]   ;;  %s6617_s12 = inlined_call_operand.hbm [shape: f32[8,128], index: 12, kind: output, shape index: {}]  }
   0x1   :  { %18 = vsyncpa [#allocation11], 0 }
   0x2   :  { %19 = vsyncpa [#allocation9], 0  ;;  %s4474_s21 = smov [#allocation10]   ;;  %s4475_s23 = smov [#allocation7]  }
   0x3   :  { %s39_s22 = sshll.u32 %s4474_s21, 4  ;;  %s27_s24 = sshll.u32 %s4475_s23, 4  ;;  %s40_s22 = int_to_ptr.vmem [resolvable:$true] %s39_s22  ;;  %s28_s24 = int_to_ptr.vmem [resolvable:$true] %s27_s24 }
   0x4   :  { %s4352_s25 = scalar_lea.vmem %s40_s22, 8192  ;;  %p4357_p1 = scmp.lt.s32.totalorder %s40_s22, %s40_s22 }
   0x5   :  { %p4353_p0 = scmp.ne.s32.totalorder %s40_s22, %s4352_s25  ;;  %p4358_p2 = scmp.lt.s32.totalorder %s4352_s25, %s4352_s25 }
   0x7   :  { %p4359_p3 = por %p4358_p2, %p4357_p1 }
   0x9   :  { %p4360_p4 = pnand %p4359_p3, %p4353_p0 }
   0xb   :  { %4363 = shalt.err (!%p4360_p4)
}
   0xc   :  { %s4476_s26 = smov 512   ;;  %s4477_s27 = smov 32  }
   0xd   :  { %45 = dma.hbm_to_vmem [thread:$0]  %s6607_s2, 8192, %s40_s22, [#allocation11], %s4476_s26, %s4476_s26, %s4477_s27  }
   0xe   :  { %s4372_s30 = scalar_lea.vmem %s28_s24, 8192  ;;  %p4377_p6 = scmp.lt.s32.totalorder %s28_s24, %s28_s24 }
   0xf   :  { %p4373_p5 = scmp.ne.s32.totalorder %s28_s24, %s4372_s30  ;;  %p4378_p7 = scmp.lt.s32.totalorder %s4372_s30, %s4372_s30 }
  0x11   :  { %p4379_p8 = por %p4378_p7, %p4377_p6 }
  0x13   :  { %p4380_p9 = pnand %p4379_p8, %p4373_p5 }
  0x15   :  { %4383 = shalt.err (!%p4380_p9)
}
  0x16   :  { %33 = dma.hbm_to_vmem [thread:$0]  %s6606_s1, 8192, %s28_s24, [#allocation8], %s4476_s26, %s4476_s26, %s4477_s27  }
  0x17   :  { %s4478_s15 = smov [#allocation12]  }
  0x18   :  { %s61_s16 = sshll.u32 %s4478_s15, 4  ;;  %s62_s16 = int_to_ptr.vmem [resolvable:$true] %s61_s16 }
  0x19   :  { %s4392_s17 = scalar_lea.vmem %s62_s16, 2048  ;;  %p4397_p11 = scmp.lt.s32.totalorder %s62_s16, %s62_s16 }
  0x1a   :  { %p4393_p10 = scmp.ne.s32.totalorder %s62_s16, %s4392_s17  ;;  %p4398_p12 = scmp.lt.s32.totalorder %s4392_s17, %s4392_s17 }
  0x1c   :  { %p4399_p13 = por %p4398_p12, %p4397_p11 }
  0x1e   :  { %p4400_p0 = pnand %p4399_p13, %p4393_p10 }
  0x20   :  { %4403 = shalt.err (!%p4400_p0)
}
  0x21   :  { %s4479_s2 = smov 128   ;;  %s4480_s18 = smov 8  }
  0x22   :  { %67 = dma.hbm_to_vmem [thread:$0]  %s6615_s10, 2048, %s62_s16, [#allocation11], %s4479_s2, %s4479_s2, %s4480_s18  }
  0x23   :  { %4464 = dma.done.wait [#allocation8], 8192  }
  0x24   :  { %4465 = vsyncadd [#allocation8], 4294959104 }
  0x25   :  { %4466 = dma.done.wait [#allocation11], 10240  }
  0x26   :  { %4467 = vsyncadd [#allocation11], 4294957056  ;;  %v6620_v0 = vmov 0.0   ;;  %v163_v1 = vld [vmem:[#allocation7 + $0x1e8] sm:$0xff]  ;;  %v162_v2 = vld [vmem:[#allocation7 + $0x1e0] sm:$0xff]  ;;  %s4483_s18 = smov [#allocation3]  }
  0x27   :  { %324 = vmatprep.mubr.f32.mxu0 %v6620_v0  ;;  %437 = vmatprep.mubr.f32.mxu1 %v6620_v0  ;;  %v159_v3 = vld [vmem:[#allocation7 + $0x1c8] sm:$0xff]  ;;  %v158_v4 = vld [vmem:[#allocation7 + $0x1c0] sm:$0xff]  ;;  %v165_v8 = vld [vmem:[#allocation7 + $0x1f8] sm:$0xff]  ;;  %s98_s19 = sshll.u32 %s4483_s18, 4  ;;  %s99_s19 = int_to_ptr.vmem [resolvable:$true] %s98_s19 }
  0x28   :  { %260 = vmatprep.subr.mxu0 %v163_v1  ;;  %v155_v5 = vld [vmem:[#allocation7 + $0x1a8] sm:$0xff]  ;;  %v154_v6 = vld [vmem:[#allocation7 + $0x1a0] sm:$0xff]  ;;  %373 = vmatprep.subr.mxu1 %v165_v8  ;;  %v164_v10 = vld [vmem:[#allocation7 + $0x1f0] sm:$0xff] }
  0x29   :  { %261 = vmatpush1.msra.mxu0 %v162_v2  ;;  %v151_v7 = vld [vmem:[#allocation7 + $0x188] sm:$0xff]  ;;  %v150_v9 = vld [vmem:[#allocation7 + $0x180] sm:$0xff]  ;;  %v161_v11 = vld [vmem:[#allocation7 + $0x1d8] sm:$0xff]  ;;  %374 = vmatpush1.msra.mxu1 %v164_v10 }
  0x2a   :  { %262 = vmatprep.subr.mxu0 %v159_v3  ;;  %v147_v12 = vld [vmem:[#allocation7 + $0x168] sm:$0xff]  ;;  %v160_v13 = vld [vmem:[#allocation7 + $0x1d0] sm:$0xff]  ;;  %v146_v14 = vld [vmem:[#allocation7 + $0x160] sm:$0xff]  ;;  %375 = vmatprep.subr.mxu1 %v161_v11 }
  0x2b   :  { %263 = vmatpush1.msra.mxu0 %v158_v4  ;;  %v157_v15 = vld [vmem:[#allocation7 + $0x1b8] sm:$0xff]  ;;  %v156_v16 = vld [vmem:[#allocation7 + $0x1b0] sm:$0xff]  ;;  %v143_v17 = vld [vmem:[#allocation7 + $0x148] sm:$0xff]  ;;  %376 = vmatpush1.msra.mxu1 %v160_v13 }
  0x2c   :  { %264 = vmatprep.subr.mxu0 %v155_v5  ;;  %v153_v18 = vld [vmem:[#allocation7 + $0x198] sm:$0xff]  ;;  %v142_v19 = vld [vmem:[#allocation7 + $0x140] sm:$0xff]  ;;  %377 = vmatprep.subr.mxu1 %v157_v15  ;;  %v152_v20 = vld [vmem:[#allocation7 + $0x190] sm:$0xff] }
  0x2d   :  { %265 = vmatpush1.msra.mxu0 %v154_v6  ;;  %v139_v21 = vld [vmem:[#allocation7 + $0x128] sm:$0xff]  ;;  %378 = vmatpush1.msra.mxu1 %v156_v16  ;;  %v149_v22 = vld [vmem:[#allocation7 + $0x178] sm:$0xff]  ;;  %v138_v23 = vld [vmem:[#allocation7 + $0x120] sm:$0xff] }
  0x2e   :  { %266 = vmatprep.subr.mxu0 %v151_v7  ;;  %379 = vmatprep.subr.mxu1 %v153_v18  ;;  %v148_v24 = vld [vmem:[#allocation7 + $0x170] sm:$0xff]  ;;  %v135_v25 = vld [vmem:[#allocation7 + $0x108] sm:$0xff]  ;;  %v145_v26 = vld [vmem:[#allocation7 + $0x158] sm:$0xff] }
  0x2f   :  { %267 = vmatpush1.msra.mxu0 %v150_v9  ;;  %380 = vmatpush1.msra.mxu1 %v152_v20  ;;  %v134_v27 = vld [vmem:[#allocation7 + $0x100] sm:$0xff]  ;;  %v144_v28 = vld [vmem:[#allocation7 + $0x150] sm:$0xff]  ;;  %v131_v29 = vld [vmem:[#allocation7 + $0xe8] sm:$0xff] }
  0x30   :  { %268 = vmatprep.subr.mxu0 %v147_v12  ;;  %381 = vmatprep.subr.mxu1 %v149_v22  ;;  %v141_v30 = vld [vmem:[#allocation7 + $0x138] sm:$0xff]  ;;  %v130_v31 = vld [vmem:[#allocation7 + $0xe0] sm:$0xff]  ;;  %v140_v32 = vld [vmem:[#allocation7 + $0x130] sm:$0xff] }
  0x31   :  { %269 = vmatpush1.msra.mxu0 %v146_v14  ;;  %382 = vmatpush1.msra.mxu1 %v148_v24  ;;  %v127_v33 = vld [vmem:[#allocation7 + $0xc8] sm:$0xff]  ;;  %v137_v34 = vld [vmem:[#allocation7 + $0x118] sm:$0xff]  ;;  %v126_v35 = vld [vmem:[#allocation7 + $0xc0] sm:$0xff] }
  0x32   :  { %270 = vmatprep.subr.mxu0 %v143_v17  ;;  %383 = vmatprep.subr.mxu1 %v145_v26  ;;  %v136_v36 = vld [vmem:[#allocation7 + $0x110] sm:$0xff]  ;;  %v123_v37 = vld [vmem:[#allocation7 + $0xa8] sm:$0xff]  ;;  %v133_v38 = vld [vmem:[#allocation7 + $0xf8] sm:$0xff] }
  0x33   :  { %271 = vmatpush1.msra.mxu0 %v142_v19  ;;  %384 = vmatpush1.msra.mxu1 %v144_v28  ;;  %v122_v39 = vld [vmem:[#allocation7 + $0xa0] sm:$0xff]  ;;  %v132_v40 = vld [vmem:[#allocation7 + $0xf0] sm:$0xff]  ;;  %v119_v41 = vld [vmem:[#allocation7 + $0x88] sm:$0xff] }
  0x34   :  { %272 = vmatprep.subr.mxu0 %v139_v21  ;;  %385 = vmatprep.subr.mxu1 %v141_v30  ;;  %v129_v42 = vld [vmem:[#allocation7 + $0xd8] sm:$0xff]  ;;  %v118_v43 = vld [vmem:[#allocation7 + $0x80] sm:$0xff]  ;;  %v128_v44 = vld [vmem:[#allocation7 + $0xd0] sm:$0xff] }
  0x35   :  { %273 = vmatpush1.msra.mxu0 %v138_v23  ;;  %386 = vmatpush1.msra.mxu1 %v140_v32  ;;  %v115_v45 = vld [vmem:[#allocation7 + $0x68] sm:$0xff]  ;;  %v125_v46 = vld [vmem:[#allocation7 + $0xb8] sm:$0xff]  ;;  %v114_v47 = vld [vmem:[#allocation7 + $0x60] sm:$0xff] }
  0x36   :  { %274 = vmatprep.subr.mxu0 %v135_v25  ;;  %387 = vmatprep.subr.mxu1 %v137_v34  ;;  %v124_v48 = vld [vmem:[#allocation7 + $0xb0] sm:$0xff]  ;;  %v111_v49 = vld [vmem:[#allocation7 + $0x48] sm:$0xff]  ;;  %v121_v50 = vld [vmem:[#allocation7 + $0x98] sm:$0xff] }
  0x37   :  { %275 = vmatpush1.msra.mxu0 %v134_v27  ;;  %388 = vmatpush1.msra.mxu1 %v136_v36  ;;  %v110_v51 = vld [vmem:[#allocation7 + $0x40] sm:$0xff]  ;;  %v120_v52 = vld [vmem:[#allocation7 + $0x90] sm:$0xff]  ;;  %v107_v53 = vld [vmem:[#allocation7 + $0x28] sm:$0xff] }
  0x38   :  { %276 = vmatprep.subr.mxu0 %v131_v29  ;;  %389 = vmatprep.subr.mxu1 %v133_v38  ;;  %v117_v54 = vld [vmem:[#allocation7 + $0x78] sm:$0xff]  ;;  %v106_v55 = vld [vmem:[#allocation7 + $0x20] sm:$0xff]  ;;  %v116_v56 = vld [vmem:[#allocation7 + $0x70] sm:$0xff] }
  0x39   :  { %277 = vmatpush1.msra.mxu0 %v130_v31  ;;  %390 = vmatpush1.msra.mxu1 %v132_v40  ;;  %v103_v57 = vld [vmem:[#allocation7 + $0x8] sm:$0xff]  ;;  %v113_v58 = vld [vmem:[#allocation7 + $0x58] sm:$0xff]  ;;  %v102_v59 = vld [vmem:[#allocation7] sm:$0xff] }
  0x3a   :  { %278 = vmatprep.subr.mxu0 %v127_v33  ;;  %391 = vmatprep.subr.mxu1 %v129_v42  ;;  %v112_v60 = vld [vmem:[#allocation7 + $0x50] sm:$0xff]  ;;  %v230_v61 = vld [vmem:[%s6605_s0] sm:$0xff]  ;;  %v109_v62 = vld [vmem:[#allocation7 + $0x38] sm:$0xff] }
  0x3b   :  { %279 = vmatpush1.msra.mxu0 %v126_v35  ;;  %392 = vmatpush1.msra.mxu1 %v128_v44  ;;  %v108_v63 = vld [vmem:[#allocation7 + $0x30] sm:$0xff]  ;;  %v105_v1 = vld [vmem:[#allocation7 + $0x18] sm:$0xff]  ;;  %v4567_v3 = vld [vmem:[#allocation10 + $0x1e8] sm:$0xff] }
  0x3c   :  { %280 = vmatprep.subr.mxu0 %v123_v37  ;;  %393 = vmatprep.subr.mxu1 %v125_v46  ;;  %v104_v2 = vld [vmem:[#allocation7 + $0x10] sm:$0xff]  ;;  %6799 = vst [vmem:[#allocation25_spill] sm:$0xff] %v4567_v3  ;;  %v4569_v4 = vld [vmem:[#allocation10 + $0x1f8] sm:$0xff]  ;;  %v4572_v5 = vld [vmem:[#allocation10 + $0x1e0] sm:$0xff] }
  0x3d   :  { %281 = vmatpush1.msra.mxu0 %v122_v39  ;;  %394 = vmatpush1.msra.mxu1 %v124_v48  ;;  %6800 = vst [vmem:[#allocation26_spill] sm:$0xff] %v4569_v4  ;;  %v4575_v6 = vld [vmem:[#allocation10 + $0x1f0] sm:$0xff]  ;;  %v4578_v7 = vld [vmem:[#allocation10 + $0x1c8] sm:$0xff]  ;;  %v4584_v9 = vld [vmem:[#allocation10 + $0x1d8] sm:$0xff] }
  0x3e   :  { %282 = vmatprep.subr.mxu0 %v119_v41  ;;  %395 = vmatprep.subr.mxu1 %v121_v50  ;;  %v231_v8 = vld [vmem:[%s6605_s0 + $0x8] sm:$0xff]  ;;  %v4587_v10 = vld [vmem:[#allocation10 + $0x1c0] sm:$0xff]  ;;  %v4589_v11 = vld [vmem:[#allocation10 + $0x1d0] sm:$0xff] }
  0x3f   :  { %283 = vmatpush1.msra.mxu0 %v118_v43  ;;  %396 = vmatpush1.msra.mxu1 %v120_v52  ;;  %v4593_v12 = vld [vmem:[#allocation10 + $0x1a8] sm:$0xff]  ;;  %v4595_v13 = vld [vmem:[#allocation10 + $0x1b8] sm:$0xff]  ;;  %v4599_v14 = vld [vmem:[#allocation10 + $0x1a0] sm:$0xff] }
  0x40   :  { %284 = vmatprep.subr.mxu0 %v115_v45  ;;  %397 = vmatprep.subr.mxu1 %v117_v54  ;;  %v4601_v15 = vld [vmem:[#allocation10 + $0x1b0] sm:$0xff]  ;;  %v4604_v16 = vld [vmem:[#allocation10 + $0x188] sm:$0xff]  ;;  %v4609_v18 = vld [vmem:[#allocation10 + $0x198] sm:$0xff] }
  0x41   :  { %285 = vmatpush1.msra.mxu0 %v114_v47  ;;  %398 = vmatpush1.msra.mxu1 %v116_v56  ;;  %v232_v17 = vld [vmem:[%s6605_s0 + $0x10] sm:$0xff]  ;;  %v4613_v19 = vld [vmem:[#allocation10 + $0x180] sm:$0xff]  ;;  %v4617_v20 = vld [vmem:[#allocation10 + $0x168] sm:$0xff] }
  0x42   :  { %286 = vmatprep.subr.mxu0 %v111_v49  ;;  %399 = vmatprep.subr.mxu1 %v113_v58  ;;  %v4619_v21 = vld [vmem:[#allocation10 + $0x190] sm:$0xff]  ;;  %v4622_v22 = vld [vmem:[#allocation10 + $0x160] sm:$0xff]  ;;  %v4626_v23 = vld [vmem:[#allocation10 + $0x178] sm:$0xff] }
  0x43   :  { %287 = vmatpush1.msra.mxu0 %v110_v51  ;;  %400 = vmatpush1.msra.mxu1 %v112_v60  ;;  %v4630_v24 = vld [vmem:[#allocation10 + $0x148] sm:$0xff]  ;;  %v4632_v25 = vld [vmem:[#allocation10 + $0x170] sm:$0xff]  ;;  %v233_v26 = vld [vmem:[%s6605_s0 + $0x18] sm:$0xff] }
  0x44   :  { %288 = vmatprep.subr.mxu0 %v107_v53  ;;  %401 = vmatprep.subr.mxu1 %v109_v62  ;;  %v4638_v27 = vld [vmem:[#allocation10 + $0x158] sm:$0xff]  ;;  %v4642_v28 = vld [vmem:[#allocation10 + $0x140] sm:$0xff]  ;;  %v4646_v29 = vld [vmem:[#allocation10 + $0x128] sm:$0xff] }
  0x45   :  { %289 = vmatpush1.msra.mxu0 %v106_v55  ;;  %402 = vmatpush1.msra.mxu1 %v108_v63  ;;  %v4648_v30 = vld [vmem:[#allocation10 + $0x150] sm:$0xff]  ;;  %v4651_v31 = vld [vmem:[#allocation10 + $0x120] sm:$0xff]  ;;  %v4655_v32 = vld [vmem:[#allocation10 + $0x138] sm:$0xff] }
  0x46   :  { %290 = vmatprep.subr.mxu0 %v103_v57  ;;  %403 = vmatprep.subr.mxu1 %v105_v1  ;;  %v4659_v33 = vld [vmem:[#allocation10 + $0x108] sm:$0xff]  ;;  %v4661_v34 = vld [vmem:[#allocation10 + $0x130] sm:$0xff]  ;;  %v234_v35 = vld [vmem:[%s6605_s0 + $0x20] sm:$0xff] }
  0x47   :  { %291 = vmatpush1.msra.mxu0 %v102_v59  ;;  %404 = vmatpush1.msra.mxu1 %v104_v2  ;;  %v4667_v36 = vld [vmem:[#allocation10 + $0x118] sm:$0xff]  ;;  %v4671_v37 = vld [vmem:[#allocation10 + $0x100] sm:$0xff]  ;;  %v4675_v38 = vld [vmem:[#allocation10 + $0xe8] sm:$0xff] }
  0x48   :  { %325 = vmatmul.mubr.f32.vlgmr.msra.gmra.mxu0 %v230_v61  ;;  %438 = vmatmul.mubr.f32.vlgmr.msra.gmra.mxu1 %v230_v61  ;;  %v4677_v39 = vld [vmem:[#allocation10 + $0x110] sm:$0xff]  ;;  %v4680_v40 = vld [vmem:[#allocation10 + $0xe0] sm:$0xff]  ;;  %v4684_v41 = vld [vmem:[#allocation10 + $0xf8] sm:$0xff] }
  0x49   :  { %330 = vmatprep.mubr.f32.mxu0 %v6620_v0  ;;  %443 = vmatprep.mubr.f32.mxu1 %v6620_v0  ;;  %v4688_v42 = vld [vmem:[#allocation10 + $0xc8] sm:$0xff]  ;;  %v4690_v43 = vld [vmem:[#allocation10 + $0xf0] sm:$0xff]  ;;  %v4696_v45 = vld [vmem:[#allocation10 + $0xd8] sm:$0xff] }
  0x4a   :  { %542 = vmatprep.subr.mxu0 %v4567_v3  ;;  %613 = vmatprep.subr.mxu1 %v4569_v4  ;;  %v235_v44 = vld [vmem:[%s6605_s0 + $0x28] sm:$0xff]  ;;  %v4700_v46 = vld [vmem:[#allocation10 + $0xc0] sm:$0xff]  ;;  %v4706_v48 = vld [vmem:[#allocation10 + $0xd0] sm:$0xff] }
  0x4b   :  { %543 = vmatpush1.msra.mxu0 %v4572_v5  ;;  %614 = vmatpush1.msra.mxu1 %v4575_v6  ;;  %v4704_v47 = vld [vmem:[#allocation10 + $0xa8] sm:$0xff]  ;;  %v4709_v49 = vld [vmem:[#allocation10 + $0xa0] sm:$0xff]  ;;  %v4713_v50 = vld [vmem:[#allocation10 + $0xb8] sm:$0xff] }
  0x4c   :  { %544 = vmatprep.subr.mxu0 %v4578_v7  ;;  %331 = vmatmul.mubr.f32.gmra.mxu0 %v231_v8  ;;  %6801 = vst [vmem:[#allocation27_spill] sm:$0xff] %v4709_v49  ;;  %v4717_v51 = vld [vmem:[#allocation10 + $0x88] sm:$0xff]  ;;  %v4719_v52 = vld [vmem:[#allocation10 + $0xb0] sm:$0xff]  ;;  %v4725_v54 = vld [vmem:[#allocation10 + $0x98] sm:$0xff] }
  0x4d   :  { %545 = vmatpush1.msra.mxu0 %v4587_v10  ;;  %615 = vmatprep.subr.mxu1 %v4584_v9  ;;  %6802 = vst [vmem:[#allocation28_spill] sm:$0xff] %v4717_v51  ;;  %6803 = vst [vmem:[#allocation29_spill] sm:$0xff] %v4719_v52  ;;  %v236_v53 = vld [vmem:[%s6605_s0 + $0x30] sm:$0xff]  ;;  %v4729_v55 = vld [vmem:[#allocation10 + $0x80] sm:$0xff] }
  0x4e   :  { %546 = vmatprep.subr.mxu0 %v4593_v12  ;;  %616 = vmatpush1.msra.mxu1 %v4589_v11  ;;  %6804 = vst [vmem:[#allocation30_spill] sm:$0xff] %v4725_v54  ;;  %6805 = vst [vmem:[#allocation31_spill] sm:$0xff] %v4729_v55  ;;  %v4733_v56 = vld [vmem:[#allocation10 + $0x68] sm:$0xff]  ;;  %v4735_v57 = vld [vmem:[#allocation10 + $0x90] sm:$0xff] }
  0x4f   :  { %444 = vmatmul.mubr.f32.gmra.mxu1 %v231_v8  ;;  %547 = vmatpush1.msra.mxu0 %v4599_v14  ;;  %6806 = vst [vmem:[#allocation32_spill] sm:$0xff] %v4733_v56  ;;  %6807 = vst [vmem:[#allocation33_spill] sm:$0xff] %v4735_v57  ;;  %v4738_v58 = vld [vmem:[#allocation10 + $0x60] sm:$0xff]  ;;  %v4742_v59 = vld [vmem:[#allocation10 + $0x78] sm:$0xff] }
  0x50   :  { %617 = vmatprep.subr.mxu1 %v4595_v13  ;;  %336 = vmatprep.mubr.f32.mxu0 %v6620_v0  ;;  %6808 = vst [vmem:[#allocation34_spill] sm:$0xff] %v4738_v58  ;;  %6809 = vst [vmem:[#allocation35_spill] sm:$0xff] %v4742_v59  ;;  %v4746_v60 = vld [vmem:[#allocation10 + $0x48] sm:$0xff]  ;;  %v4748_v61 = vld [vmem:[#allocation10 + $0x70] sm:$0xff] }
  0x51   :  { %548 = vmatprep.subr.mxu0 %v4604_v16  ;;  %618 = vmatpush1.msra.mxu1 %v4601_v15  ;;  %6810 = vst [vmem:[#allocation36_spill] sm:$0xff] %v4746_v60  ;;  %6811 = vst [vmem:[#allocation37_spill] sm:$0xff] %v4748_v61  ;;  %v237_v62 = vld [vmem:[%s6605_s0 + $0x38] sm:$0xff]  ;;  %v4758_v1 = vld [vmem:[#allocation10 + $0x40] sm:$0xff] }
  0x52   :  { %337 = vmatmul.mubr.f32.gmra.mxu0 %v232_v17  ;;  %619 = vmatprep.subr.mxu1 %v4609_v18  ;;  %v4754_v63 = vld [vmem:[#allocation10 + $0x58] sm:$0xff]  ;;  %6813 = vst [vmem:[#allocation39_spill] sm:$0xff] %v4758_v1  ;;  %v4762_v2 = vld [vmem:[#allocation10 + $0x28] sm:$0xff]  ;;  %v4764_v8 = vld [vmem:[#allocation10 + $0x50] sm:$0xff] }
  0x53   :  { %549 = vmatpush1.msra.mxu0 %v4613_v19  ;;  %449 = vmatprep.mubr.f32.mxu1 %v6620_v0  ;;  %6812 = vst [vmem:[#allocation38_spill] sm:$0xff] %v4754_v63  ;;  %6814 = vst [vmem:[#allocation40_spill] sm:$0xff] %v4762_v2 }
  0x54   :  { %550 = vmatprep.subr.mxu0 %v4617_v20  ;;  %620 = vmatpush1.msra.mxu1 %v4619_v21  ;;  %6815 = vst [vmem:[#allocation41_spill] sm:$0xff] %v4764_v8 }
  0x55   :  { %450 = vmatmul.mubr.f32.gmra.mxu1 %v232_v17  ;;  %551 = vmatpush1.msra.mxu0 %v4622_v22  ;;  %v4767_v17 = vld [vmem:[#allocation10 + $0x20] sm:$0xff] }
  0x56   :  { %621 = vmatprep.subr.mxu1 %v4626_v23  ;;  %342 = vmatprep.mubr.f32.mxu0 %v6620_v0  ;;  %6816 = vst [vmem:[#allocation42_spill] sm:$0xff] %v4767_v17 }
  0x57   :  { %552 = vmatprep.subr.mxu0 %v4630_v24  ;;  %622 = vmatpush1.msra.mxu1 %v4632_v25 }
  0x58   :  { %343 = vmatmul.mubr.f32.gmra.mxu0 %v233_v26  ;;  %623 = vmatprep.subr.mxu1 %v4638_v27 }
  0x59   :  { %553 = vmatpush1.msra.mxu0 %v4642_v28  ;;  %455 = vmatprep.mubr.f32.mxu1 %v6620_v0 }
  0x5a   :  { %554 = vmatprep.subr.mxu0 %v4646_v29  ;;  %624 = vmatpush1.msra.mxu1 %v4648_v30 }
  0x5b   :  { %456 = vmatmul.mubr.f32.gmra.mxu1 %v233_v26  ;;  %555 = vmatpush1.msra.mxu0 %v4651_v31  ;;  %v4771_v26 = vld [vmem:[#allocation10 + $0x38] sm:$0xff] }
  0x5c   :  { %625 = vmatprep.subr.mxu1 %v4655_v32  ;;  %348 = vmatprep.mubr.f32.mxu0 %v6620_v0  ;;  %6817 = vst [vmem:[#allocation43_spill] sm:$0xff] %v4771_v26 }
  0x5d   :  { %556 = vmatprep.subr.mxu0 %v4659_v33  ;;  %626 = vmatpush1.msra.mxu1 %v4661_v34 }
  0x5e   :  { %349 = vmatmul.mubr.f32.gmra.mxu0 %v234_v35  ;;  %627 = vmatprep.subr.mxu1 %v4667_v36 }
  0x5f   :  { %557 = vmatpush1.msra.mxu0 %v4671_v37  ;;  %461 = vmatprep.mubr.f32.mxu1 %v6620_v0 }
  0x60   :  { %558 = vmatprep.subr.mxu0 %v4675_v38  ;;  %628 = vmatpush1.msra.mxu1 %v4677_v39 }
  0x61   :  { %462 = vmatmul.mubr.f32.gmra.mxu1 %v234_v35  ;;  %559 = vmatpush1.msra.mxu0 %v4680_v40  ;;  %v4773_v35 = vld [vmem:[#allocation10 + $0x8] sm:$0xff] }
  0x62   :  { %629 = vmatprep.subr.mxu1 %v4684_v41  ;;  %354 = vmatprep.mubr.f32.mxu0 %v6620_v0  ;;  %6818 = vst [vmem:[#allocation44_spill] sm:$0xff] %v4773_v35 }
  0x63   :  { %560 = vmatprep.subr.mxu0 %v4688_v42  ;;  %630 = vmatpush1.msra.mxu1 %v4690_v43 }
  0x64   :  { %355 = vmatmul.mubr.f32.gmra.mxu0 %v235_v44  ;;  %631 = vmatprep.subr.mxu1 %v4696_v45 }
  0x65   :  { %561 = vmatpush1.msra.mxu0 %v4700_v46  ;;  %467 = vmatprep.mubr.f32.mxu1 %v6620_v0 }
  0x66   :  { %562 = vmatprep.subr.mxu0 %v4704_v47  ;;  %632 = vmatpush1.msra.mxu1 %v4706_v48 }
  0x67   :  { %468 = vmatmul.mubr.f32.gmra.mxu1 %v235_v44  ;;  %563 = vmatpush1.msra.mxu0 %v4709_v49  ;;  %v4777_v44 = vld [vmem:[#allocation10 + $0x30] sm:$0xff] }
  0x68   :  { %633 = vmatprep.subr.mxu1 %v4713_v50  ;;  %360 = vmatprep.mubr.f32.mxu0 %v6620_v0  ;;  %6819 = vst [vmem:[#allocation45_spill] sm:$0xff] %v4777_v44 }
  0x69   :  { %564 = vmatprep.subr.mxu0 %v4717_v51  ;;  %634 = vmatpush1.msra.mxu1 %v4719_v52 }
  0x6a   :  { %361 = vmatmul.mubr.f32.gmra.mxu0 %v236_v53  ;;  %635 = vmatprep.subr.mxu1 %v4725_v54 }
  0x6b   :  { %565 = vmatpush1.msra.mxu0 %v4729_v55  ;;  %473 = vmatprep.mubr.f32.mxu1 %v6620_v0 }
  0x6c   :  { %566 = vmatprep.subr.mxu0 %v4733_v56  ;;  %636 = vmatpush1.msra.mxu1 %v4735_v57 }
  0x6d   :  { %474 = vmatmul.mubr.f32.gmra.mxu1 %v236_v53  ;;  %567 = vmatpush1.msra.mxu0 %v4738_v58  ;;  %v4779_v53 = vld [vmem:[#allocation10] sm:$0xff] }
  0x6e   :  { %637 = vmatprep.subr.mxu1 %v4742_v59  ;;  %366 = vmatprep.mubr.f32.mxu0 %v6620_v0  ;;  %6820 = vst [vmem:[#allocation46_spill] sm:$0xff] %v4779_v53 }
  0x6f   :  { %568 = vmatprep.subr.mxu0 %v4746_v60  ;;  %638 = vmatpush1.msra.mxu1 %v4748_v61 }
  0x70   :  { %367 = vmatmul.mubr.f32.gmra.mxu0 %v237_v62  ;;  %639 = vmatprep.subr.mxu1 %v4754_v63  ;;  %v4782_v63 = vld [vmem:[#allocation10 + $0x18] sm:$0xff] }
  0x71   :  { %569 = vmatpush1.msra.mxu0 %v4758_v1  ;;  %479 = vmatprep.mubr.f32.mxu1 %v6620_v0  ;;  %6821 = vst [vmem:[#allocation47_spill] sm:$0xff] %v4782_v63  ;;  %v4786_v0 = vld [vmem:[#allocation10 + $0x10] sm:$0xff] }
  0x72   :  { %570 = vmatprep.subr.mxu0 %v4762_v2  ;;  %640 = vmatpush1.msra.mxu1 %v4764_v8  ;;  %6822 = vst [vmem:[#allocation48_spill] sm:$0xff] %v4786_v0  ;;  %v6823_v2 = vmov 0.0  }
  0x73   :  { %480 = vmatmul.mubr.f32.gmra.mxu1 %v237_v62  ;;  %571 = vmatpush1.msra.mxu0 %v4767_v17  ;;  %v240_v62 = vlaneseq }
  0x74   :  { %641 = vmatprep.subr.mxu1 %v4771_v26  ;;  %572 = vmatprep.subr.mxu0 %v4773_v35 }
  0x75   :  { %642 = vmatpush1.msra.mxu1 %v4777_v44  ;;  %573 = vmatpush1.msra.mxu0 %v4779_v53  ;;  %v4796_v35 = vshrl.u32 %v240_v62, 7  ;;  %v4804_v53 = vld [vmem:[%s6608_s3] sm:$0xf]  ;;  %s4482_s3 = smov [#allocation2]  }
  0x76   :  { %643 = vmatprep.subr.mxu1 %v4782_v63  ;;  %606 = vmatprep.mubr.f32.mxu0 %v6823_v2  ;;  %s86_s2 = sshll.u32 %s4482_s3, 4  ;;  %s87_s2 = int_to_ptr.vmem [resolvable:$true] %s86_s2 }
  0x77   :  { %644 = vmatpush1.msra.mxu1 %v4786_v0  ;;  %677 = vmatprep.mubr.f32.mxu1 %v6823_v2  ;;  %6824 = vst [vmem:[#allocation49_spill] sm:$0xff] %v4796_v35  ;;  %v4799_v17 = vsub.s32 0, %v4796_v35  ;;  %v6660_v1 = vsub.s32 2, %v4796_v35  ;;  %s4412_s20 = scalar_lea.vmem %s87_s2, 8192  ;;  %p4417_p2 = scmp.lt.s32.totalorder %s87_s2, %s87_s2 }
  0x78   :  { %717 = vmatprep.subr.mxu0 %v4567_v3  ;;  %788 = vmatprep.subr.mxu1 %v4569_v4  ;;  %v6653_v3 = vsub.s32 3, %v4796_v35  ;;  %p4413_p1 = scmp.ne.s32.totalorder %s87_s2, %s4412_s20  ;;  %p4418_p3 = scmp.lt.s32.totalorder %s4412_s20, %s4412_s20 }
  0x79   :  { %6825 = vst [vmem:[#allocation50_spill] sm:$0xff] %v4799_v17  ;;  %v4808_v0 = vrot.slane %v4804_v53, %v4799_v17  ;;  %v4822_v60 = vrot.slane %v4804_v53, %v6660_v1 }
  0x7a   :  { %v4815_v26 = vrot.slane %v4804_v53, %v6653_v3  ;;  %p4419_p4 = por %p4418_p3, %p4417_p2 }
  0x7b   :  { %6826 = vst [vmem:[#allocation51_spill] sm:$0xff] %v4808_v0 }
  0x7c   :  { %6827 = vst [vmem:[#allocation52_spill] sm:$0xff] %v4815_v26  ;;  %p4420_p5 = pnand %p4419_p4, %p4413_p1 }
 0x108   :  { %v326_v2 = vpop.f32.mrf.mxu0  ;;  %v439_v44 = vpop.f32.mrf.mxu1 }
 0x109   :  { %v327_v4 = vadd.f32 %v326_v2, %v4808_v0 }
 0x10a   :  { %v328_v63 = vpop.f32.mrf.mxu0  ;;  %v441_v8 = vpop.f32.mrf.mxu1 }
 0x10b   :  { %v3820_v62 = vmul.f32 -1.442695, %v327_v4  ;;  %v442_v17 = vadd.f32 %v441_v8, %v4815_v26  ;;  %v440_v4 = vadd.f32 %v439_v44, %v4822_v60  ;;  %v6835_v44 = vld [vmem:[#allocation41_spill] sm:$0xff] }
 0x10d   :  { %3934 = vpow2.f32 %v3820_v62  ;;  %v3821_v2 = vmul.f32 -1.442695, %v442_v17  ;;  %v6834_v17 = vld [vmem:[#allocation39_spill] sm:$0xff] }
 0x10f   :  { %3936 = vpow2.f32 %v3821_v2  ;;  %v6836_v2 = vld [vmem:[#allocation40_spill] sm:$0xff] }
 0x110   :  { %3938 = vtanh.f32 %v440_v4  ;;  %v6837_v4 = vld [vmem:[#allocation43_spill] sm:$0xff] }
 0x11a   :  { %v3935_v63 = vpop.eup %3934 }
 0x11b   :  { %v524_v0 = vadd.f32 1.0, %v3935_v63  ;;  %v6838_v63 = vld [vmem:[#allocation42_spill] sm:$0xff] }
 0x11c   :  { %v3937_v3 = vpop.eup %3936 }
 0x11d   :  { %3940 = vrcp.f32 %v524_v0  ;;  %v531_v62 = vadd.f32 1.0, %v3937_v3  ;;  %v3939_v61 = vpop.eup %3938  ;;  %v6829_v0 = vld [vmem:[#allocation35_spill] sm:$0xff]  ;;  %v6830_v3 = vld [vmem:[#allocation34_spill] sm:$0xff] }
 0x11f   :  { %3942 = vrcp.f32 %v531_v62  ;;  %v6839_v62 = vld [vmem:[#allocation45_spill] sm:$0xff] }
 0x12a   :  { %v3941_v58 = vpop.eup %3940 }
 0x12b   :  { %v4825_v59 = vmul.f32 %v3941_v58, %v3939_v61  ;;  %v6831_v58 = vld [vmem:[#allocation37_spill] sm:$0xff]  ;;  %v6832_v61 = vld [vmem:[#allocation36_spill] sm:$0xff] }
 0x12c   :  { %v3943_v8 = vpop.eup %3942 }
 0x12d   :  { %3944 = vtanh.f32 %v4825_v59 }
 0x13a   :  { %v3945_v1 = vpop.eup %3944 }
 0x13b   :  { %v4828_v26 = vmul.f32 %v3945_v1, %v3943_v8  ;;  %v6833_v1 = vld [vmem:[#allocation38_spill] sm:$0xff]  ;;  %v6840_v8 = vld [vmem:[#allocation44_spill] sm:$0xff] }
 0x13d   :  { %6828 = vst [vmem:[#allocation53_spill] sm:$0xff] %v4828_v26  ;;  %607 = vmatmul.mubr.f32.vlgmr.msra.gmra.mxu0 %v4828_v26  ;;  %678 = vmatmul.mubr.f32.vlgmr.msra.gmra.mxu1 %v4828_v26  ;;  %v6841_v26 = vld [vmem:[#allocation47_spill] sm:$0xff] }
 0x13e   :  { %718 = vmatpush1.msra.mxu0 %v4572_v5  ;;  %789 = vmatpush1.msra.mxu1 %v4575_v6 }
 0x13f   :  { %719 = vmatprep.subr.mxu0 %v4578_v7  ;;  %790 = vmatprep.subr.mxu1 %v4584_v9 }
 0x140   :  { %720 = vmatpush1.msra.mxu0 %v4587_v10  ;;  %791 = vmatpush1.msra.mxu1 %v4589_v11 }
 0x141   :  { %721 = vmatprep.subr.mxu0 %v4593_v12  ;;  %792 = vmatprep.subr.mxu1 %v4595_v13 }
 0x142   :  { %722 = vmatpush1.msra.mxu0 %v4599_v14  ;;  %793 = vmatpush1.msra.mxu1 %v4601_v15 }
 0x143   :  { %723 = vmatprep.subr.mxu0 %v4604_v16  ;;  %794 = vmatprep.subr.mxu1 %v4609_v18 }
 0x144   :  { %724 = vmatpush1.msra.mxu0 %v4613_v19  ;;  %795 = vmatpush1.msra.mxu1 %v4619_v21 }
 0x145   :  { %725 = vmatprep.subr.mxu0 %v4617_v20  ;;  %796 = vmatprep.subr.mxu1 %v4626_v23 }
 0x146   :  { %726 = vmatpush1.msra.mxu0 %v4622_v22  ;;  %797 = vmatpush1.msra.mxu1 %v4632_v25 }
 0x147   :  { %727 = vmatprep.subr.mxu0 %v4630_v24  ;;  %798 = vmatprep.subr.mxu1 %v4638_v27 }
 0x148   :  { %728 = vmatpush1.msra.mxu0 %v4642_v28  ;;  %799 = vmatpush1.msra.mxu1 %v4648_v30 }
 0x149   :  { %729 = vmatprep.subr.mxu0 %v4646_v29  ;;  %800 = vmatprep.subr.mxu1 %v4655_v32 }
 0x14a   :  { %730 = vmatpush1.msra.mxu0 %v4651_v31  ;;  %801 = vmatpush1.msra.mxu1 %v4661_v34 }
 0x14b   :  { %731 = vmatprep.subr.mxu0 %v4659_v33  ;;  %802 = vmatprep.subr.mxu1 %v4667_v36 }
 0x14c   :  { %732 = vmatpush1.msra.mxu0 %v4671_v37  ;;  %803 = vmatpush1.msra.mxu1 %v4677_v39 }
 0x14d   :  { %733 = vmatprep.subr.mxu0 %v4675_v38  ;;  %804 = vmatprep.subr.mxu1 %v4684_v41 }
 0x14e   :  { %734 = vmatpush1.msra.mxu0 %v4680_v40  ;;  %805 = vmatpush1.msra.mxu1 %v4690_v43 }
 0x14f   :  { %735 = vmatprep.subr.mxu0 %v4688_v42  ;;  %806 = vmatprep.subr.mxu1 %v4696_v45 }
 0x150   :  { %736 = vmatpush1.msra.mxu0 %v4700_v46  ;;  %807 = vmatpush1.msra.mxu1 %v4706_v48 }
 0x151   :  { %737 = vmatprep.subr.mxu0 %v4704_v47  ;;  %808 = vmatprep.subr.mxu1 %v4713_v50 }
 0x152   :  { %738 = vmatpush1.msra.mxu0 %v4709_v49  ;;  %809 = vmatpush1.msra.mxu1 %v4719_v52 }
 0x153   :  { %739 = vmatprep.subr.mxu0 %v4717_v51  ;;  %810 = vmatprep.subr.mxu1 %v4725_v54  ;;  %v6874_v51 = vld [vmem:[#allocation52_spill] sm:$0xff] }
 0x154   :  { %740 = vmatpush1.msra.mxu0 %v4729_v55  ;;  %811 = vmatpush1.msra.mxu1 %v4735_v57 }
 0x155   :  { %741 = vmatprep.subr.mxu0 %v4733_v56  ;;  %812 = vmatprep.subr.mxu1 %v6829_v0 }
 0x156   :  { %742 = vmatpush1.msra.mxu0 %v6830_v3  ;;  %813 = vmatpush1.msra.mxu1 %v6831_v58  ;;  %v6842_v58 = vld [vmem:[#allocation46_spill] sm:$0xff] }
 0x157   :  { %743 = vmatprep.subr.mxu0 %v6832_v61  ;;  %814 = vmatprep.subr.mxu1 %v6833_v1  ;;  %v6843_v61 = vmov 0.0   ;;  %v6844_v1 = vld [vmem:[#allocation48_spill] sm:$0xff] }
 0x158   :  { %744 = vmatpush1.msra.mxu0 %v6834_v17  ;;  %815 = vmatpush1.msra.mxu1 %v6835_v44  ;;  %v6845_v44 = vld [vmem:[#allocation25_spill] sm:$0xff] }
 0x159   :  { %745 = vmatprep.subr.mxu0 %v6836_v2  ;;  %816 = vmatprep.subr.mxu1 %v6837_v4  ;;  %v6846_v2 = vld [vmem:[#allocation26_spill] sm:$0xff]  ;;  %v332_v4 = vpop.f32.mrf.mxu0 }
 0x15a   :  { %746 = vmatpush1.msra.mxu0 %v6838_v63  ;;  %817 = vmatpush1.msra.mxu1 %v6839_v62  ;;  %v4899_v62 = vsub.s32 1, %v4796_v35 }
 0x15b   :  { %747 = vmatprep.subr.mxu0 %v6840_v8  ;;  %818 = vmatprep.subr.mxu1 %v6841_v26  ;;  %v334_v63 = vpop.f32.mrf.mxu0 }
 0x15c   :  { %748 = vmatpush1.msra.mxu0 %v6842_v58  ;;  %781 = vmatprep.mubr.f32.mxu0 %v6843_v61  ;;  %6847 = vst [vmem:[#allocation54_spill] sm:$0xff] %v4899_v62  ;;  %v4905_v58 = vrot.slane %v4804_v53, %v4899_v62 }
 0x15d   :  { %819 = vmatpush1.msra.mxu1 %v6844_v1  ;;  %852 = vmatprep.mubr.f32.mxu1 %v6843_v61  ;;  %v4901_v8 = vpop.f32.mrf.mxu0 }
 0x15e   :  { %892 = vmatprep.subr.mxu0 %v6845_v44  ;;  %963 = vmatprep.subr.mxu1 %v6846_v2  ;;  %6848 = vst [vmem:[#allocation55_spill] sm:$0xff] %v4901_v8  ;;  %6849 = vst [vmem:[#allocation56_spill] sm:$0xff] %v4905_v58 }
 0x15f   :  { %v340_v26 = vpop.f32.mrf.mxu0 }
 0x160   :  { %v4908_v1 = vadd.f32 %v340_v26, %v4905_v58 }
 0x161   :  { %v4910_v61 = vpop.f32.mrf.mxu0 }
 0x162   :  { %6850 = vst [vmem:[#allocation57_spill] sm:$0xff] %v4908_v1  ;;  %6851 = vst [vmem:[#allocation58_spill] sm:$0xff] %v4910_v61 }
 0x163   :  { %v346_v44 = vpop.f32.mrf.mxu0 }
 0x164   :  { %v4913_v2 = vadd.f32 %v346_v44, %v4905_v58  ;;  %v445_v44 = vpop.f32.mrf.mxu1 }
 0x165   :  { %v4915_v17 = vpop.f32.mrf.mxu0 }
 0x166   :  { %6852 = vst [vmem:[#allocation59_spill] sm:$0xff] %v4913_v2  ;;  %6853 = vst [vmem:[#allocation60_spill] sm:$0xff] %v4915_v17  ;;  %v447_v2 = vpop.f32.mrf.mxu1 }
 0x167   :  { %v352_v35 = vpop.f32.mrf.mxu0 }
 0x168   :  { %v4918_v3 = vadd.f32 %v352_v35, %v4905_v58  ;;  %v4930_v0 = vpop.f32.mrf.mxu1 }
 0x169   :  { %v4920_v8 = vpop.f32.mrf.mxu0  ;;  %6859 = vst [vmem:[#allocation66_spill] sm:$0xff] %v4930_v0 }
 0x16a   :  { %6854 = vst [vmem:[#allocation61_spill] sm:$0xff] %v4918_v3  ;;  %6855 = vst [vmem:[#allocation62_spill] sm:$0xff] %v4920_v8  ;;  %v4932_v17 = vpop.f32.mrf.mxu1 }
 0x16b   :  { %v358_v53 = vpop.f32.mrf.mxu0  ;;  %6860 = vst [vmem:[#allocation67_spill] sm:$0xff] %v4932_v17 }
 0x16c   :  { %v4923_v62 = vadd.f32 %v358_v53, %v4905_v58  ;;  %v4934_v35 = vpop.f32.mrf.mxu1 }
 0x16d   :  { %v4925_v26 = vpop.f32.mrf.mxu0  ;;  %6861 = vst [vmem:[#allocation68_spill] sm:$0xff] %v4934_v35  ;;  %v6872_v35 = vld [vmem:[#allocation51_spill] sm:$0xff] }
 0x16e   :  { %6856 = vst [vmem:[#allocation63_spill] sm:$0xff] %v4923_v62  ;;  %6857 = vst [vmem:[#allocation64_spill] sm:$0xff] %v4925_v26  ;;  %v4936_v3 = vpop.f32.mrf.mxu1 }
 0x16f   :  { %v364_v1 = vpop.f32.mrf.mxu0  ;;  %6862 = vst [vmem:[#allocation69_spill] sm:$0xff] %v4936_v3  ;;  %v333_v3 = vadd.f32 %v332_v4, %v6872_v35 }
 0x170   :  { %v4928_v61 = vadd.f32 %v364_v1, %v4905_v58  ;;  %v4938_v8 = vpop.f32.mrf.mxu1 }
 0x171   :  { %6863 = vst [vmem:[#allocation70_spill] sm:$0xff] %v4938_v8  ;;  %v4950_v56 = vpop.f32.mrf.mxu0  ;;  %v335_v8 = vadd.f32 %v334_v63, %v4905_v58 }
 0x172   :  { %6858 = vst [vmem:[#allocation65_spill] sm:$0xff] %v4928_v61  ;;  %v4940_v53 = vpop.f32.mrf.mxu1  ;;  %6869 = vst [vmem:[#allocation76_spill] sm:$0xff] %v4950_v56 }
 0x173   :  { %6864 = vst [vmem:[#allocation71_spill] sm:$0xff] %v4940_v53  ;;  %v4954_v17 = vpop.f32.mrf.mxu0 }
 0x174   :  { %v4942_v62 = vpop.f32.mrf.mxu1  ;;  %6871 = vst [vmem:[#allocation78_spill] sm:$0xff] %v4954_v17  ;;  %v446_v17 = vadd.f32 %v445_v44, %v4822_v60  ;;  %v6880_v44 = vld [vmem:[#allocation31_spill] sm:$0xff] }
 0x175   :  { %6865 = vst [vmem:[#allocation72_spill] sm:$0xff] %v4942_v62 }
 0x176   :  { %v4944_v26 = vpop.f32.mrf.mxu1 }
 0x177   :  { %6866 = vst [vmem:[#allocation73_spill] sm:$0xff] %v4944_v26 }
 0x178   :  { %v4946_v1 = vpop.f32.mrf.mxu1 }
 0x179   :  { %6867 = vst [vmem:[#allocation74_spill] sm:$0xff] %v4946_v1 }
 0x17a   :  { %v4948_v61 = vpop.f32.mrf.mxu1 }
 0x17b   :  { %6868 = vst [vmem:[#allocation75_spill] sm:$0xff] %v4948_v61 }
 0x17c   :  { %v4952_v0 = vpop.f32.mrf.mxu1 }
 0x17d   :  { %6870 = vst [vmem:[#allocation77_spill] sm:$0xff] %v4952_v0  ;;  %v448_v0 = vadd.f32 %v447_v2, %v6874_v51 }
 0x17e   :  { %v4958_v53 = vpop.f32.mrf.mxu1 }
 0x17f   :  { %6873 = vst [vmem:[#allocation79_spill] sm:$0xff] %v4958_v53  ;;  %v6896_v53 = vld [vmem:[#allocation46_spill] sm:$0xff] }
 0x1fd   :  { %v608_v57 = vpop.f32.mrf.mxu0  ;;  %v679_v1 = vpop.f32.mrf.mxu1 }
 0x1fe   :  { %v684_v62 = vadd.f32 %v608_v57, %v333_v3  ;;  %v686_v49 = vadd.f32 %v679_v1, %v446_v17  ;;  %v6882_v1 = vld [vmem:[#allocation32_spill] sm:$0xff] }
 0x1ff   :  { %v610_v55 = vpop.f32.mrf.mxu0  ;;  %v681_v56 = vpop.f32.mrf.mxu1 }
 0x200   :  { %v3822_v26 = vmul.f32 -1.442695, %v684_v62  ;;  %v685_v54 = vadd.f32 %v610_v55, %v335_v8  ;;  %v687_v52 = vadd.f32 %v681_v56, %v448_v0 }
 0x202   :  { %3946 = vpow2.f32 %v3822_v26  ;;  %v3823_v61 = vmul.f32 -1.442695, %v685_v54  ;;  %v3824_v4 = vmul.f32 -1.442695, %v687_v52  ;;  %v6879_v26 = vld [vmem:[#allocation30_spill] sm:$0xff] }
 0x204   :  { %3948 = vpow2.f32 %v3823_v61 }
 0x205   :  { %3950 = vpow2.f32 %v3824_v4  ;;  %v6883_v4 = vld [vmem:[#allocation35_spill] sm:$0xff] }
 0x20f   :  { %v3947_v35 = vpop.eup %3946 }
 0x210   :  { %v691_v63 = vadd.f32 1.0, %v3947_v35  ;;  %v6881_v35 = vld [vmem:[#allocation33_spill] sm:$0xff] }
 0x211   :  { %v3949_v58 = vpop.eup %3948 }
 0x212   :  { %3952 = vrcp.f32 %v691_v63  ;;  %v697_v57 = vadd.f32 1.0, %v3949_v58  ;;  %v3951_v55 = vpop.eup %3950  ;;  %v6878_v58 = vld [vmem:[#allocation28_spill] sm:$0xff]  ;;  %v6884_v63 = vld [vmem:[#allocation34_spill] sm:$0xff] }
 0x213   :  { %3954 = vtanh.f32 %v686_v49  ;;  %v704_v62 = vadd.f32 1.0, %v3951_v55  ;;  %v6876_v49 = vld [vmem:[#allocation27_spill] sm:$0xff]  ;;  %v6886_v55 = vld [vmem:[#allocation36_spill] sm:$0xff] }
 0x214   :  { %3956 = vrcp.f32 %v697_v57  ;;  %v6885_v57 = vld [vmem:[#allocation37_spill] sm:$0xff] }
 0x215   :  { %3958 = vrcp.f32 %v704_v62  ;;  %v6890_v62 = vld [vmem:[#allocation40_spill] sm:$0xff] }
 0x21f   :  { %v3953_v3 = vpop.eup %3952 }
 0x220   :  { %v3955_v54 = vpop.eup %3954 }
 0x221   :  { %v3957_v61 = vpop.eup %3956  ;;  %v708_v8 = vmul.f32 %v3955_v54, %v3953_v3  ;;  %v6887_v3 = vld [vmem:[#allocation38_spill] sm:$0xff]  ;;  %v6888_v54 = vld [vmem:[#allocation39_spill] sm:$0xff] }
 0x222   :  { %v707_v56 = vmul.f32 %v3957_v61, %v4825_v59  ;;  %v3959_v52 = vpop.eup %3958  ;;  %v6877_v59 = vld [vmem:[#allocation29_spill] sm:$0xff] }
 0x223   :  { %v6889_v61 = vld [vmem:[#allocation41_spill] sm:$0xff] }
 0x224   :  { %v4963_v0 = vadd.f32 %v708_v8, %v707_v56  ;;  %v6891_v8 = vld [vmem:[#allocation43_spill] sm:$0xff]  ;;  %v6892_v56 = vld [vmem:[#allocation42_spill] sm:$0xff] }
 0x226   :  { %3960 = vtanh.f32 %v4963_v0 }
 0x233   :  { %v3961_v17 = vpop.eup %3960 }
 0x234   :  { %v4966_v2 = vmul.f32 %v3961_v17, %v3959_v52  ;;  %v6893_v52 = vld [vmem:[#allocation45_spill] sm:$0xff]  ;;  %v6894_v17 = vld [vmem:[#allocation44_spill] sm:$0xff] }
 0x236   :  { %6875 = vst [vmem:[#allocation52_spill] sm:$0xff] %v4966_v2  ;;  %782 = vmatmul.mubr.f32.vlgmr.msra.gmra.mxu0 %v4966_v2  ;;  %853 = vmatmul.mubr.f32.vlgmr.msra.gmra.mxu1 %v4966_v2  ;;  %v6895_v2 = vld [vmem:[#allocation47_spill] sm:$0xff] }
 0x237   :  { %893 = vmatpush1.msra.mxu0 %v4572_v5  ;;  %964 = vmatpush1.msra.mxu1 %v4575_v6 }
 0x238   :  { %894 = vmatprep.subr.mxu0 %v4578_v7  ;;  %965 = vmatprep.subr.mxu1 %v4584_v9 }
 0x239   :  { %895 = vmatpush1.msra.mxu0 %v4587_v10  ;;  %966 = vmatpush1.msra.mxu1 %v4589_v11 }
 0x23a   :  { %896 = vmatprep.subr.mxu0 %v4593_v12  ;;  %967 = vmatprep.subr.mxu1 %v4595_v13 }
 0x23b   :  { %897 = vmatpush1.msra.mxu0 %v4599_v14  ;;  %968 = vmatpush1.msra.mxu1 %v4601_v15 }
 0x23c   :  { %898 = vmatprep.subr.mxu0 %v4604_v16  ;;  %969 = vmatprep.subr.mxu1 %v4609_v18 }
 0x23d   :  { %899 = vmatpush1.msra.mxu0 %v4613_v19  ;;  %970 = vmatpush1.msra.mxu1 %v4619_v21 }
 0x23e   :  { %900 = vmatprep.subr.mxu0 %v4617_v20  ;;  %971 = vmatprep.subr.mxu1 %v4626_v23 }
 0x23f   :  { %901 = vmatpush1.msra.mxu0 %v4622_v22  ;;  %972 = vmatpush1.msra.mxu1 %v4632_v25 }
 0x240   :  { %902 = vmatprep.subr.mxu0 %v4630_v24  ;;  %973 = vmatprep.subr.mxu1 %v4638_v27 }
 0x241   :  { %903 = vmatpush1.msra.mxu0 %v4642_v28  ;;  %974 = vmatpush1.msra.mxu1 %v4648_v30 }
 0x242   :  { %904 = vmatprep.subr.mxu0 %v4646_v29  ;;  %975 = vmatprep.subr.mxu1 %v4655_v32 }
 0x243   :  { %905 = vmatpush1.msra.mxu0 %v4651_v31  ;;  %976 = vmatpush1.msra.mxu1 %v4661_v34 }
 0x244   :  { %906 = vmatprep.subr.mxu0 %v4659_v33  ;;  %977 = vmatprep.subr.mxu1 %v4667_v36 }
 0x245   :  { %907 = vmatpush1.msra.mxu0 %v4671_v37  ;;  %978 = vmatpush1.msra.mxu1 %v4677_v39 }
 0x246   :  { %908 = vmatprep.subr.mxu0 %v4675_v38  ;;  %979 = vmatprep.subr.mxu1 %v4684_v41 }
 0x247   :  { %909 = vmatpush1.msra.mxu0 %v4680_v40  ;;  %980 = vmatpush1.msra.mxu1 %v4690_v43 }
 0x248   :  { %910 = vmatprep.subr.mxu0 %v4688_v42  ;;  %981 = vmatprep.subr.mxu1 %v4696_v45 }
 0x249   :  { %911 = vmatpush1.msra.mxu0 %v4700_v46  ;;  %982 = vmatpush1.msra.mxu1 %v4706_v48 }
 0x24a   :  { %912 = vmatprep.subr.mxu0 %v4704_v47  ;;  %983 = vmatprep.subr.mxu1 %v4713_v50 }
 0x24b   :  { %913 = vmatpush1.msra.mxu0 %v6876_v49  ;;  %984 = vmatpush1.msra.mxu1 %v6877_v59 }
 0x24c   :  { %914 = vmatprep.subr.mxu0 %v6878_v58  ;;  %985 = vmatprep.subr.mxu1 %v6879_v26 }
 0x24d   :  { %915 = vmatpush1.msra.mxu0 %v6880_v44  ;;  %986 = vmatpush1.msra.mxu1 %v6881_v35 }
 0x24e   :  { %916 = vmatprep.subr.mxu0 %v6882_v1  ;;  %987 = vmatprep.subr.mxu1 %v6883_v4 }
 0x24f   :  { %917 = vmatpush1.msra.mxu0 %v6884_v63  ;;  %988 = vmatpush1.msra.mxu1 %v6885_v57 }
 0x250   :  { %918 = vmatprep.subr.mxu0 %v6886_v55  ;;  %989 = vmatprep.subr.mxu1 %v6887_v3  ;;  %v6897_v55 = vmov 0.0   ;;  %v6898_v3 = vld [vmem:[#allocation48_spill] sm:$0xff] }
 0x251   :  { %919 = vmatpush1.msra.mxu0 %v6888_v54  ;;  %990 = vmatpush1.msra.mxu1 %v6889_v61  ;;  %v6899_v61 = vld [vmem:[#allocation25_spill] sm:$0xff] }
 0x252   :  { %920 = vmatprep.subr.mxu0 %v6890_v62  ;;  %991 = vmatprep.subr.mxu1 %v6891_v8  ;;  %v6900_v62 = vld [vmem:[#allocation26_spill] sm:$0xff]  ;;  %v6901_v8 = vld [vmem:[#allocation51_spill] sm:$0xff] }
 0x253   :  { %921 = vmatpush1.msra.mxu0 %v6892_v56  ;;  %992 = vmatpush1.msra.mxu1 %v6893_v52  ;;  %v6902_v56 = vld [vmem:[#allocation55_spill] sm:$0xff] }
 0x254   :  { %922 = vmatprep.subr.mxu0 %v6894_v17  ;;  %993 = vmatprep.subr.mxu1 %v6895_v2  ;;  %v339_v54 = vadd.f32 %v6902_v56, %v6901_v8  ;;  %v6903_v2 = vld [vmem:[#allocation57_spill] sm:$0xff] }
 0x255   :  { %923 = vmatpush1.msra.mxu0 %v6896_v53  ;;  %956 = vmatprep.mubr.f32.mxu0 %v6897_v55 }
 0x256   :  { %994 = vmatpush1.msra.mxu1 %v6898_v3  ;;  %1027 = vmatprep.mubr.f32.mxu1 %v6897_v55  ;;  %v6904_v55 = vld [vmem:[#allocation67_spill] sm:$0xff] }
 0x257   :  { %1067 = vmatprep.subr.mxu0 %v6899_v61  ;;  %1138 = vmatprep.subr.mxu1 %v6900_v62  ;;  %v454_v35 = vadd.f32 %v6904_v55, %v6874_v51  ;;  %v6905_v62 = vld [vmem:[#allocation66_spill] sm:$0xff] }
 0x258   :  { %v452_v44 = vadd.f32 %v6905_v62, %v4822_v60  ;;  %v6931_v62 = vld [vmem:[#allocation59_spill] sm:$0xff] }
 0x2f6   :  { %v783_v52 = vpop.f32.mrf.mxu0  ;;  %v854_v53 = vpop.f32.mrf.mxu1 }
 0x2f7   :  { %v859_v57 = vadd.f32 %v783_v52, %v339_v54  ;;  %v861_v26 = vadd.f32 %v854_v53, %v452_v44 }
 0x2f8   :  { %v785_v17 = vpop.f32.mrf.mxu0  ;;  %v856_v3 = vpop.f32.mrf.mxu1 }
 0x2f9   :  { %v3825_v63 = vmul.f32 -1.442695, %v859_v57  ;;  %v860_v4 = vadd.f32 %v785_v17, %v6903_v2  ;;  %v862_v61 = vadd.f32 %v856_v3, %v454_v35 }
 0x2fb   :  { %3962 = vpow2.f32 %v3825_v63  ;;  %v3826_v1 = vmul.f32 -1.442695, %v860_v4  ;;  %v3827_v56 = vmul.f32 -1.442695, %v862_v61 }
 0x2fd   :  { %3964 = vpow2.f32 %v3826_v1 }
 0x2fe   :  { %3966 = vtanh.f32 %v861_v26 }
 0x2ff   :  { %3968 = vpow2.f32 %v3827_v56 }
 0x308   :  { %v3963_v8 = vpop.eup %3962 }
 0x309   :  { %v866_v54 = vadd.f32 1.0, %v3963_v8 }
 0x30a   :  { %v3965_v57 = vpop.eup %3964 }
 0x30b   :  { %3970 = vrcp.f32 %v866_v54  ;;  %v872_v2 = vadd.f32 1.0, %v3965_v57  ;;  %v3967_v4 = vpop.eup %3966 }
 0x30c   :  { %v3969_v1 = vpop.eup %3968 }
 0x30d   :  { %3972 = vrcp.f32 %v872_v2  ;;  %v879_v55 = vadd.f32 1.0, %v3969_v1  ;;  %v6932_v2 = vld [vmem:[#allocation69_spill] sm:$0xff] }
 0x30f   :  { %3974 = vrcp.f32 %v879_v55 }
 0x318   :  { %v3971_v63 = vpop.eup %3970 }
 0x319   :  { %v883_v52 = vmul.f32 %v3971_v63, %v3967_v4  ;;  %v460_v4 = vadd.f32 %v6932_v2, %v6874_v51  ;;  %v6933_v63 = vld [vmem:[#allocation68_spill] sm:$0xff]  ;;  %v5135_v2 = vld [vmem:[#allocation10 + $0x1f0] sm:$0xff] }
 0x31a   :  { %v3973_v17 = vpop.eup %3972 }
 0x31b   :  { %v882_v35 = vmul.f32 %v3973_v17, %v4963_v0 }
 0x31c   :  { %v3975_v53 = vpop.eup %3974 }
 0x31d   :  { %v5044_v3 = vadd.f32 %v883_v52, %v882_v35  ;;  %v458_v52 = vadd.f32 %v6933_v63, %v4822_v60  ;;  %v5147_v63 = vld [vmem:[#allocation10 + $0x1d0] sm:$0xff] }
 0x31f   :  { %3976 = vtanh.f32 %v5044_v3 }
 0x32c   :  { %v3977_v26 = vpop.eup %3976 }
 0x32d   :  { %v5047_v44 = vmul.f32 %v3977_v26, %v3975_v53 }
 0x32f   :  { %6906 = vst [vmem:[#allocation27_spill] sm:$0xff] %v5047_v44  ;;  %957 = vmatmul.mubr.f32.vlgmr.msra.gmra.mxu0 %v5047_v44  ;;  %1028 = vmatmul.mubr.f32.vlgmr.msra.gmra.mxu1 %v5047_v44  ;;  %v5201_v44 = vld [vmem:[#allocation10 + $0x138] sm:$0xff] }
 0x330   :  { %1068 = vmatpush1.msra.mxu0 %v4572_v5  ;;  %1139 = vmatpush1.msra.mxu1 %v4575_v6  ;;  %v6907_v5 = vld [vmem:[#allocation30_spill] sm:$0xff]  ;;  %v6908_v6 = vld [vmem:[#allocation31_spill] sm:$0xff] }
 0x331   :  { %1069 = vmatprep.subr.mxu0 %v4578_v7  ;;  %1140 = vmatprep.subr.mxu1 %v4584_v9  ;;  %v6909_v7 = vld [vmem:[#allocation33_spill] sm:$0xff]  ;;  %v6910_v9 = vld [vmem:[#allocation32_spill] sm:$0xff] }
 0x332   :  { %1070 = vmatpush1.msra.mxu0 %v4587_v10  ;;  %1141 = vmatpush1.msra.mxu1 %v4589_v11  ;;  %v6911_v10 = vld [vmem:[#allocation35_spill] sm:$0xff]  ;;  %v6912_v11 = vld [vmem:[#allocation34_spill] sm:$0xff] }
 0x333   :  { %1071 = vmatprep.subr.mxu0 %v4593_v12  ;;  %1142 = vmatprep.subr.mxu1 %v4595_v13  ;;  %v6913_v12 = vld [vmem:[#allocation37_spill] sm:$0xff]  ;;  %v6914_v13 = vld [vmem:[#allocation36_spill] sm:$0xff] }
 0x334   :  { %1072 = vmatpush1.msra.mxu0 %v4599_v14  ;;  %1143 = vmatpush1.msra.mxu1 %v4601_v15  ;;  %v6915_v14 = vld [vmem:[#allocation38_spill] sm:$0xff]  ;;  %v6916_v15 = vld [vmem:[#allocation39_spill] sm:$0xff] }
 0x335   :  { %1073 = vmatprep.subr.mxu0 %v4604_v16  ;;  %1144 = vmatprep.subr.mxu1 %v4609_v18  ;;  %v6917_v16 = vld [vmem:[#allocation41_spill] sm:$0xff]  ;;  %v6918_v18 = vld [vmem:[#allocation40_spill] sm:$0xff] }
 0x336   :  { %1074 = vmatpush1.msra.mxu0 %v4613_v19  ;;  %1145 = vmatpush1.msra.mxu1 %v4619_v21  ;;  %v6919_v19 = vld [vmem:[#allocation43_spill] sm:$0xff]  ;;  %v6921_v21 = vld [vmem:[#allocation45_spill] sm:$0xff] }
 0x337   :  { %1075 = vmatprep.subr.mxu0 %v4617_v20  ;;  %1146 = vmatprep.subr.mxu1 %v4626_v23  ;;  %v6920_v20 = vld [vmem:[#allocation42_spill] sm:$0xff]  ;;  %v6923_v23 = vld [vmem:[#allocation47_spill] sm:$0xff] }
 0x338   :  { %1076 = vmatpush1.msra.mxu0 %v4622_v22  ;;  %1147 = vmatpush1.msra.mxu1 %v4632_v25  ;;  %v6922_v22 = vld [vmem:[#allocation44_spill] sm:$0xff]  ;;  %v6925_v25 = vmov 0.0  }
 0x339   :  { %1077 = vmatprep.subr.mxu0 %v4630_v24  ;;  %1148 = vmatprep.subr.mxu1 %v4638_v27  ;;  %v6924_v24 = vld [vmem:[#allocation46_spill] sm:$0xff]  ;;  %v6926_v27 = vld [vmem:[#allocation48_spill] sm:$0xff] }
 0x33a   :  { %1078 = vmatpush1.msra.mxu0 %v4642_v28  ;;  %1149 = vmatpush1.msra.mxu1 %v4648_v30  ;;  %v6927_v28 = vld [vmem:[#allocation25_spill] sm:$0xff]  ;;  %v6929_v30 = vld [vmem:[#allocation51_spill] sm:$0xff] }
 0x33b   :  { %1079 = vmatprep.subr.mxu0 %v4646_v29  ;;  %1150 = vmatprep.subr.mxu1 %v4655_v32  ;;  %v6928_v29 = vld [vmem:[#allocation26_spill] sm:$0xff] }
 0x33c   :  { %1080 = vmatpush1.msra.mxu0 %v4651_v31  ;;  %1151 = vmatpush1.msra.mxu1 %v4661_v34  ;;  %v6930_v31 = vld [vmem:[#allocation58_spill] sm:$0xff] }
 0x33d   :  { %1081 = vmatprep.subr.mxu0 %v4659_v33  ;;  %1152 = vmatprep.subr.mxu1 %v4667_v36  ;;  %v345_v32 = vadd.f32 %v6930_v31, %v6929_v30 }
 0x33e   :  { %1082 = vmatpush1.msra.mxu0 %v4671_v37  ;;  %1153 = vmatpush1.msra.mxu1 %v4677_v39 }
 0x33f   :  { %1083 = vmatprep.subr.mxu0 %v4675_v38  ;;  %1154 = vmatprep.subr.mxu1 %v4684_v41 }
 0x340   :  { %1084 = vmatpush1.msra.mxu0 %v4680_v40  ;;  %1155 = vmatpush1.msra.mxu1 %v4690_v43 }
 0x341   :  { %1085 = vmatprep.subr.mxu0 %v4688_v42  ;;  %1156 = vmatprep.subr.mxu1 %v4696_v45 }
 0x342   :  { %1086 = vmatpush1.msra.mxu0 %v4700_v46  ;;  %1157 = vmatpush1.msra.mxu1 %v4706_v48 }
 0x343   :  { %1087 = vmatprep.subr.mxu0 %v4704_v47  ;;  %1158 = vmatprep.subr.mxu1 %v4713_v50 }
 0x344   :  { %1088 = vmatpush1.msra.mxu0 %v6876_v49  ;;  %1159 = vmatpush1.msra.mxu1 %v6877_v59 }
 0x345   :  { %1089 = vmatprep.subr.mxu0 %v6878_v58  ;;  %1160 = vmatprep.subr.mxu1 %v6907_v5 }
 0x346   :  { %1090 = vmatpush1.msra.mxu0 %v6908_v6  ;;  %1161 = vmatpush1.msra.mxu1 %v6909_v7 }
 0x347   :  { %1091 = vmatprep.subr.mxu0 %v6910_v9  ;;  %1162 = vmatprep.subr.mxu1 %v6911_v10 }
 0x348   :  { %1092 = vmatpush1.msra.mxu0 %v6912_v11  ;;  %1163 = vmatpush1.msra.mxu1 %v6913_v12 }
 0x349   :  { %1093 = vmatprep.subr.mxu0 %v6914_v13  ;;  %1164 = vmatprep.subr.mxu1 %v6915_v14 }
 0x34a   :  { %1094 = vmatpush1.msra.mxu0 %v6916_v15  ;;  %1165 = vmatpush1.msra.mxu1 %v6917_v16 }
 0x34b   :  { %1095 = vmatprep.subr.mxu0 %v6918_v18  ;;  %1166 = vmatprep.subr.mxu1 %v6919_v19 }
 0x34c   :  { %1096 = vmatpush1.msra.mxu0 %v6920_v20  ;;  %1167 = vmatpush1.msra.mxu1 %v6921_v21 }
 0x34d   :  { %1097 = vmatprep.subr.mxu0 %v6922_v22  ;;  %1168 = vmatprep.subr.mxu1 %v6923_v23 }
 0x34e   :  { %1098 = vmatpush1.msra.mxu0 %v6924_v24  ;;  %1131 = vmatprep.mubr.f32.mxu0 %v6925_v25 }
 0x34f   :  { %1169 = vmatpush1.msra.mxu1 %v6926_v27  ;;  %1202 = vmatprep.mubr.f32.mxu1 %v6925_v25 }
 0x350   :  { %1242 = vmatprep.subr.mxu0 %v6927_v28  ;;  %1313 = vmatprep.subr.mxu1 %v6928_v29 }
 0x3ef   :  { %v958_v33 = vpop.f32.mrf.mxu0  ;;  %v1029_v56 = vpop.f32.mrf.mxu1 }
 0x3f0   :  { %v1034_v34 = vadd.f32 %v958_v33, %v345_v32  ;;  %v1036_v17 = vadd.f32 %v1029_v56, %v458_v52  ;;  %v5150_v52 = vld [vmem:[#allocation10 + $0x1a8] sm:$0xff] }
 0x3f1   :  { %v960_v0 = vpop.f32.mrf.mxu0  ;;  %v1031_v57 = vpop.f32.mrf.mxu1 }
 0x3f2   :  { %v3828_v61 = vmul.f32 -1.442695, %v1034_v34  ;;  %v1035_v8 = vadd.f32 %v960_v0, %v6931_v62  ;;  %v1037_v1 = vadd.f32 %v1031_v57, %v460_v4  ;;  %v5132_v57 = vld [vmem:[#allocation10 + $0x1e0] sm:$0xff]  ;;  %v5141_v4 = vld [vmem:[#allocation10 + $0x1d8] sm:$0xff] }
 0x3f4   :  { %3978 = vpow2.f32 %v3828_v61  ;;  %v3829_v54 = vmul.f32 -1.442695, %v1035_v8  ;;  %v3830_v55 = vmul.f32 -1.442695, %v1037_v1  ;;  %v5144_v1 = vld [vmem:[#allocation10 + $0x1c0] sm:$0xff] }
 0x3f6   :  { %3980 = vpow2.f32 %v3829_v54 }
 0x3f7   :  { %3982 = vtanh.f32 %v1036_v17  ;;  %v5153_v17 = vld [vmem:[#allocation10 + $0x1b8] sm:$0xff] }
 0x3f8   :  { %3984 = vpow2.f32 %v3830_v55  ;;  %v5156_v55 = vld [vmem:[#allocation10 + $0x1a0] sm:$0xff] }
 0x401   :  { %v3979_v35 = vpop.eup %3978 }
 0x402   :  { %v1041_v53 = vadd.f32 1.0, %v3979_v35  ;;  %v5159_v35 = vld [vmem:[#allocation10 + $0x1b0] sm:$0xff] }
 0x403   :  { %v3981_v26 = vpop.eup %3980 }
 0x404   :  { %3986 = vrcp.f32 %v1041_v53  ;;  %v1047_v28 = vadd.f32 1.0, %v3981_v26  ;;  %v3983_v29 = vpop.eup %3982  ;;  %v5162_v53 = vld [vmem:[#allocation10 + $0x188] sm:$0xff]  ;;  %v5165_v26 = vld [vmem:[#allocation10 + $0x198] sm:$0xff] }
 0x405   :  { %v3985_v31 = vpop.eup %3984 }
 0x406   :  { %3988 = vrcp.f32 %v1047_v28  ;;  %v1054_v0 = vadd.f32 1.0, %v3985_v31  ;;  %v5168_v28 = vld [vmem:[#allocation10 + $0x180] sm:$0xff]  ;;  %v5174_v31 = vld [vmem:[#allocation10 + $0x168] sm:$0xff] }
 0x408   :  { %3990 = vrcp.f32 %v1054_v0  ;;  %v5186_v0 = vld [vmem:[#allocation10 + $0x148] sm:$0xff] }
 0x409   :  { %6935 = vst [vmem:[#allocation28_spill] sm:$0xff] %v5186_v0 }
 0x411   :  { %v3987_v32 = vpop.eup %3986 }
 0x412   :  { %v1058_v33 = vmul.f32 %v3987_v32, %v3983_v29  ;;  %v5171_v29 = vld [vmem:[#allocation10 + $0x190] sm:$0xff]  ;;  %v5177_v32 = vld [vmem:[#allocation10 + $0x178] sm:$0xff] }
 0x413   :  { %v3989_v34 = vpop.eup %3988 }
 0x414   :  { %v1057_v61 = vmul.f32 %v3989_v34, %v5044_v3  ;;  %v5138_v3 = vld [vmem:[#allocation10 + $0x1c8] sm:$0xff]  ;;  %v5183_v34 = vld [vmem:[#allocation10 + $0x170] sm:$0xff] }
 0x415   :  { %v3991_v8 = vpop.eup %3990 }
 0x416   :  { %v5125_v62 = vadd.f32 %v1058_v33, %v1057_v61  ;;  %v5180_v33 = vld [vmem:[#allocation10 + $0x160] sm:$0xff]  ;;  %v5189_v61 = vld [vmem:[#allocation10 + $0x158] sm:$0xff] }
 0x417   :  { %6936 = vst [vmem:[#allocation55_spill] sm:$0xff] %v5189_v61 }
 0x418   :  { %3992 = vtanh.f32 %v5125_v62 }
 0x425   :  { %v3993_v56 = vpop.eup %3992 }
 0x426   :  { %v5128_v54 = vmul.f32 %v3993_v56, %v3991_v8  ;;  %v5192_v8 = vld [vmem:[#allocation10 + $0x140] sm:$0xff]  ;;  %v5195_v56 = vld [vmem:[#allocation10 + $0x150] sm:$0xff] }
 0x427   :  { %6937 = vst [vmem:[#allocation57_spill] sm:$0xff] %v5192_v8 }
 0x428   :  { %6934 = vst [vmem:[#allocation29_spill] sm:$0xff] %v5128_v54  ;;  %1132 = vmatmul.mubr.f32.vlgmr.msra.gmra.mxu0 %v5128_v54  ;;  %1203 = vmatmul.mubr.f32.vlgmr.msra.gmra.mxu1 %v5128_v54  ;;  %v5198_v54 = vld [vmem:[#allocation10 + $0x128] sm:$0xff] }
 0x429   :  { %1243 = vmatpush1.msra.mxu0 %v5132_v57  ;;  %1314 = vmatpush1.msra.mxu1 %v5135_v2 }
 0x42a   :  { %1244 = vmatprep.subr.mxu0 %v5138_v3  ;;  %1315 = vmatprep.subr.mxu1 %v5141_v4 }
 0x42b   :  { %1245 = vmatpush1.msra.mxu0 %v5144_v1  ;;  %1316 = vmatpush1.msra.mxu1 %v5147_v63 }
 0x42c   :  { %1246 = vmatprep.subr.mxu0 %v5150_v52  ;;  %1317 = vmatprep.subr.mxu1 %v5153_v17 }
 0x42d   :  { %1247 = vmatpush1.msra.mxu0 %v5156_v55  ;;  %1318 = vmatpush1.msra.mxu1 %v5159_v35 }
 0x42e   :  { %1248 = vmatprep.subr.mxu0 %v5162_v53  ;;  %1319 = vmatprep.subr.mxu1 %v5165_v26 }
 0x42f   :  { %1249 = vmatpush1.msra.mxu0 %v5168_v28  ;;  %1320 = vmatpush1.msra.mxu1 %v5171_v29 }
 0x430   :  { %1250 = vmatprep.subr.mxu0 %v5174_v31  ;;  %1321 = vmatprep.subr.mxu1 %v5177_v32 }
 0x431   :  { %1251 = vmatpush1.msra.mxu0 %v5180_v33  ;;  %1322 = vmatpush1.msra.mxu1 %v5183_v34 }
 0x432   :  { %1252 = vmatprep.subr.mxu0 %v5186_v0  ;;  %1323 = vmatprep.subr.mxu1 %v5189_v61  ;;  %v5204_v0 = vld [vmem:[#allocation10 + $0x120] sm:$0xff]  ;;  %v5207_v61 = vld [vmem:[#allocation10 + $0x130] sm:$0xff] }
 0x433   :  { %1253 = vmatpush1.msra.mxu0 %v5192_v8  ;;  %1324 = vmatpush1.msra.mxu1 %v5195_v56  ;;  %v5210_v8 = vld [vmem:[#allocation10 + $0x108] sm:$0xff] }
 0x434   :  { %1254 = vmatprep.subr.mxu0 %v5198_v54  ;;  %1325 = vmatprep.subr.mxu1 %v5201_v44 }
 0x435   :  { %1255 = vmatpush1.msra.mxu0 %v5204_v0  ;;  %1326 = vmatpush1.msra.mxu1 %v5207_v61 }
 0x436   :  { %1256 = vmatprep.subr.mxu0 %v5210_v8  ;;  %1327 = vmatprep.subr.mxu1 %v4667_v36  ;;  %v5250_v36 = vld [vmem:[#allocation10 + $0x1e8] sm:$0xff] }
 0x437   :  { %1257 = vmatpush1.msra.mxu0 %v4671_v37  ;;  %1328 = vmatpush1.msra.mxu1 %v4677_v39  ;;  %v5253_v37 = vld [vmem:[#allocation10 + $0x1f8] sm:$0xff] }
 0x438   :  { %1258 = vmatprep.subr.mxu0 %v4675_v38  ;;  %1329 = vmatprep.subr.mxu1 %v4684_v41  ;;  %v6938_v38 = vld [vmem:[#allocation60_spill] sm:$0xff] }
 0x439   :  { %1259 = vmatpush1.msra.mxu0 %v4680_v40  ;;  %1330 = vmatpush1.msra.mxu1 %v4690_v43  ;;  %v351_v39 = vadd.f32 %v6938_v38, %v6929_v30  ;;  %v6944_v38 = vld [vmem:[#allocation55_spill] sm:$0xff] }
 0x43a   :  { %1260 = vmatprep.subr.mxu0 %v4688_v42  ;;  %1331 = vmatprep.subr.mxu1 %v4696_v45  ;;  %v6939_v45 = vld [vmem:[#allocation61_spill] sm:$0xff] }
 0x43b   :  { %1261 = vmatpush1.msra.mxu0 %v4700_v46  ;;  %1332 = vmatpush1.msra.mxu1 %v4706_v48 }
 0x43c   :  { %1262 = vmatprep.subr.mxu0 %v4704_v47  ;;  %1333 = vmatprep.subr.mxu1 %v4713_v50 }
 0x43d   :  { %1263 = vmatpush1.msra.mxu0 %v6876_v49  ;;  %1334 = vmatpush1.msra.mxu1 %v6877_v59  ;;  %v6940_v49 = vld [vmem:[#allocation71_spill] sm:$0xff] }
 0x43e   :  { %1264 = vmatprep.subr.mxu0 %v6878_v58  ;;  %1335 = vmatprep.subr.mxu1 %v6907_v5  ;;  %v466_v59 = vadd.f32 %v6940_v49, %v6874_v51  ;;  %v6941_v5 = vld [vmem:[#allocation70_spill] sm:$0xff]  ;;  %v5325_v49 = vld [vmem:[#allocation10 + $0xc0] sm:$0xff] }
 0x43f   :  { %1265 = vmatpush1.msra.mxu0 %v6908_v6  ;;  %1336 = vmatpush1.msra.mxu1 %v6909_v7  ;;  %v464_v6 = vadd.f32 %v6941_v5, %v4822_v60  ;;  %v5334_v5 = vld [vmem:[#allocation10 + $0xb8] sm:$0xff] }
 0x440   :  { %1266 = vmatprep.subr.mxu0 %v6910_v9  ;;  %1337 = vmatprep.subr.mxu1 %v6911_v10 }
 0x441   :  { %1267 = vmatpush1.msra.mxu0 %v6912_v11  ;;  %1338 = vmatpush1.msra.mxu1 %v6913_v12 }
 0x442   :  { %1268 = vmatprep.subr.mxu0 %v6914_v13  ;;  %1339 = vmatprep.subr.mxu1 %v6915_v14 }
 0x443   :  { %1269 = vmatpush1.msra.mxu0 %v6916_v15  ;;  %1340 = vmatpush1.msra.mxu1 %v6917_v16 }
 0x444   :  { %1270 = vmatprep.subr.mxu0 %v6918_v18  ;;  %1341 = vmatprep.subr.mxu1 %v6919_v19 }
 0x445   :  { %1271 = vmatpush1.msra.mxu0 %v6920_v20  ;;  %1342 = vmatpush1.msra.mxu1 %v6921_v21 }
 0x446   :  { %1272 = vmatprep.subr.mxu0 %v6922_v22  ;;  %1343 = vmatprep.subr.mxu1 %v6923_v23 }
 0x447   :  { %1273 = vmatpush1.msra.mxu0 %v6924_v24  ;;  %1306 = vmatprep.mubr.f32.mxu0 %v6925_v25 }
 0x448   :  { %1344 = vmatpush1.msra.mxu1 %v6926_v27  ;;  %1377 = vmatprep.mubr.f32.mxu1 %v6925_v25 }
 0x449   :  { %1417 = vmatprep.subr.mxu0 %v5250_v36  ;;  %1488 = vmatprep.subr.mxu1 %v5253_v37 }
 0x4e8   :  { %v1133_v40 = vpop.f32.mrf.mxu0  ;;  %v1204_v47 = vpop.f32.mrf.mxu1 }
 0x4e9   :  { %v1209_v41 = vadd.f32 %v1133_v40, %v351_v39  ;;  %v1211_v7 = vadd.f32 %v1204_v47, %v464_v6  ;;  %v6945_v39 = vld [vmem:[#allocation57_spill] sm:$0xff]  ;;  %v5298_v40 = vld [vmem:[#allocation10 + $0x118] sm:$0xff]  ;;  %v5316_v47 = vld [vmem:[#allocation10 + $0xf0] sm:$0xff] }
 0x4ea   :  { %v1135_v42 = vpop.f32.mrf.mxu0  ;;  %v1206_v50 = vpop.f32.mrf.mxu1  ;;  %v5337_v6 = vld [vmem:[#allocation10 + $0xa0] sm:$0xff] }
 0x4eb   :  { %v3831_v43 = vmul.f32 -1.442695, %v1209_v41  ;;  %v1210_v46 = vadd.f32 %v1135_v42, %v6939_v45  ;;  %v1212_v58 = vadd.f32 %v1206_v50, %v466_v59  ;;  %v5301_v41 = vld [vmem:[#allocation10 + $0x100] sm:$0xff]  ;;  %v5304_v42 = vld [vmem:[#allocation10 + $0x110] sm:$0xff]  ;;  %v5310_v45 = vld [vmem:[#allocation10 + $0xf8] sm:$0xff] }
 0x4ec   :  { %v5322_v50 = vld [vmem:[#allocation10 + $0xd8] sm:$0xff]  ;;  %v5328_v59 = vld [vmem:[#allocation10 + $0xd0] sm:$0xff] }
 0x4ed   :  { %3994 = vpow2.f32 %v3831_v43  ;;  %v3832_v48 = vmul.f32 -1.442695, %v1210_v46  ;;  %v3833_v9 = vmul.f32 -1.442695, %v1212_v58  ;;  %v5307_v43 = vld [vmem:[#allocation10 + $0xe8] sm:$0xff]  ;;  %v5313_v46 = vld [vmem:[#allocation10 + $0xe0] sm:$0xff] }
 0x4ee   :  { %v5331_v58 = vld [vmem:[#allocation10 + $0xa8] sm:$0xff] }
 0x4ef   :  { %3996 = vpow2.f32 %v3832_v48  ;;  %v5319_v48 = vld [vmem:[#allocation10 + $0xc8] sm:$0xff] }
 0x4f0   :  { %3998 = vtanh.f32 %v1211_v7  ;;  %v5340_v7 = vld [vmem:[#allocation10 + $0xb0] sm:$0xff] }
 0x4f1   :  { %4000 = vpow2.f32 %v3833_v9  ;;  %v5343_v9 = vld [vmem:[#allocation10 + $0x88] sm:$0xff] }
 0x4fa   :  { %v3995_v10 = vpop.eup %3994 }
 0x4fb   :  { %v1216_v11 = vadd.f32 1.0, %v3995_v10  ;;  %v5346_v10 = vld [vmem:[#allocation10 + $0x98] sm:$0xff] }
 0x4fc   :  { %v3997_v12 = vpop.eup %3996  ;;  %6946 = vst [vmem:[#allocation66_spill] sm:$0xff] %v5346_v10 }
 0x4fd   :  { %4002 = vrcp.f32 %v1216_v11  ;;  %v1222_v13 = vadd.f32 1.0, %v3997_v12  ;;  %v3999_v14 = vpop.eup %3998  ;;  %v5349_v11 = vld [vmem:[#allocation10 + $0x80] sm:$0xff]  ;;  %v5352_v12 = vld [vmem:[#allocation10 + $0x90] sm:$0xff] }
 0x4fe   :  { %v4001_v15 = vpop.eup %4000  ;;  %6947 = vst [vmem:[#allocation30_spill] sm:$0xff] %v5349_v11  ;;  %6948 = vst [vmem:[#allocation31_spill] sm:$0xff] %v5352_v12 }
 0x4ff   :  { %4004 = vrcp.f32 %v1222_v13  ;;  %v1229_v20 = vadd.f32 1.0, %v4001_v15  ;;  %v5355_v13 = vld [vmem:[#allocation10 + $0x68] sm:$0xff]  ;;  %v5361_v15 = vld [vmem:[#allocation10 + $0x60] sm:$0xff] }
 0x500   :  { %6949 = vst [vmem:[#allocation33_spill] sm:$0xff] %v5355_v13  ;;  %6951 = vst [vmem:[#allocation35_spill] sm:$0xff] %v5361_v15 }
 0x501   :  { %4006 = vrcp.f32 %v1229_v20  ;;  %v5373_v20 = vld [vmem:[#allocation10 + $0x40] sm:$0xff] }
 0x502   :  { %6955 = vst [vmem:[#allocation38_spill] sm:$0xff] %v5373_v20 }
 0x50a   :  { %v4003_v16 = vpop.eup %4002 }
 0x50b   :  { %v1233_v18 = vmul.f32 %v4003_v16, %v3999_v14  ;;  %v5358_v14 = vld [vmem:[#allocation10 + $0x78] sm:$0xff]  ;;  %v5364_v16 = vld [vmem:[#allocation10 + $0x70] sm:$0xff] }
 0x50c   :  { %v4005_v19 = vpop.eup %4004  ;;  %6950 = vst [vmem:[#allocation32_spill] sm:$0xff] %v5358_v14  ;;  %6952 = vst [vmem:[#allocation34_spill] sm:$0xff] %v5364_v16 }
 0x50d   :  { %v1232_v21 = vmul.f32 %v4005_v19, %v5125_v62  ;;  %v6943_v62 = vld [vmem:[#allocation28_spill] sm:$0xff]  ;;  %v5370_v19 = vld [vmem:[#allocation10 + $0x58] sm:$0xff] }
 0x50e   :  { %v4007_v23 = vpop.eup %4006  ;;  %6954 = vst [vmem:[#allocation36_spill] sm:$0xff] %v5370_v19 }
 0x50f   :  { %v5264_v22 = vadd.f32 %v1233_v18, %v1232_v21  ;;  %v5367_v18 = vld [vmem:[#allocation10 + $0x48] sm:$0xff]  ;;  %v5376_v21 = vld [vmem:[#allocation10 + $0x50] sm:$0xff] }
 0x510   :  { %6953 = vst [vmem:[#allocation37_spill] sm:$0xff] %v5367_v18  ;;  %6956 = vst [vmem:[#allocation39_spill] sm:$0xff] %v5376_v21 }
 0x511   :  { %4008 = vtanh.f32 %v5264_v22 }
 0x51e   :  { %v4009_v24 = vpop.eup %4008 }
 0x51f   :  { %v5267_v27 = vmul.f32 %v4009_v24, %v4007_v23  ;;  %v5379_v23 = vld [vmem:[#allocation10 + $0x28] sm:$0xff]  ;;  %v5382_v24 = vld [vmem:[#allocation10 + $0x38] sm:$0xff] }
 0x520   :  { %6957 = vst [vmem:[#allocation41_spill] sm:$0xff] %v5379_v23  ;;  %6958 = vst [vmem:[#allocation40_spill] sm:$0xff] %v5382_v24 }
 0x521   :  { %6942 = vst [vmem:[#allocation67_spill] sm:$0xff] %v5267_v27  ;;  %1307 = vmatmul.mubr.f32.vlgmr.msra.gmra.mxu0 %v5267_v27  ;;  %1378 = vmatmul.mubr.f32.vlgmr.msra.gmra.mxu1 %v5267_v27  ;;  %v5385_v27 = vld [vmem:[#allocation10 + $0x20] sm:$0xff] }
 0x522   :  { %1418 = vmatpush1.msra.mxu0 %v5132_v57  ;;  %1489 = vmatpush1.msra.mxu1 %v5135_v2  ;;  %6959 = vst [vmem:[#allocation43_spill] sm:$0xff] %v5385_v27 }
 0x523   :  { %1419 = vmatprep.subr.mxu0 %v5138_v3  ;;  %1490 = vmatprep.subr.mxu1 %v5141_v4 }
 0x524   :  { %1420 = vmatpush1.msra.mxu0 %v5144_v1  ;;  %1491 = vmatpush1.msra.mxu1 %v5147_v63 }
 0x525   :  { %1421 = vmatprep.subr.mxu0 %v5150_v52  ;;  %1492 = vmatprep.subr.mxu1 %v5153_v17 }
 0x526   :  { %1422 = vmatpush1.msra.mxu0 %v5156_v55  ;;  %1493 = vmatpush1.msra.mxu1 %v5159_v35 }
 0x527   :  { %1423 = vmatprep.subr.mxu0 %v5162_v53  ;;  %1494 = vmatprep.subr.mxu1 %v5165_v26 }
 0x528   :  { %1424 = vmatpush1.msra.mxu0 %v5168_v28  ;;  %1495 = vmatpush1.msra.mxu1 %v5171_v29 }
 0x529   :  { %1425 = vmatprep.subr.mxu0 %v5174_v31  ;;  %1496 = vmatprep.subr.mxu1 %v5177_v32 }
 0x52a   :  { %1426 = vmatpush1.msra.mxu0 %v5180_v33  ;;  %1497 = vmatpush1.msra.mxu1 %v5183_v34 }
 0x52b   :  { %1427 = vmatprep.subr.mxu0 %v6943_v62  ;;  %1498 = vmatprep.subr.mxu1 %v6944_v38 }
 0x52c   :  { %1428 = vmatpush1.msra.mxu0 %v6945_v39  ;;  %1499 = vmatpush1.msra.mxu1 %v5195_v56 }
 0x52d   :  { %1429 = vmatprep.subr.mxu0 %v5198_v54  ;;  %1500 = vmatprep.subr.mxu1 %v5201_v44 }
 0x52e   :  { %1430 = vmatpush1.msra.mxu0 %v5204_v0  ;;  %1501 = vmatpush1.msra.mxu1 %v5207_v61 }
 0x52f   :  { %1431 = vmatprep.subr.mxu0 %v5210_v8  ;;  %1502 = vmatprep.subr.mxu1 %v5298_v40 }
 0x530   :  { %1432 = vmatpush1.msra.mxu0 %v5301_v41  ;;  %1503 = vmatpush1.msra.mxu1 %v5304_v42 }
 0x531   :  { %1433 = vmatprep.subr.mxu0 %v5307_v43  ;;  %1504 = vmatprep.subr.mxu1 %v5310_v45 }
 0x532   :  { %1434 = vmatpush1.msra.mxu0 %v5313_v46  ;;  %1505 = vmatpush1.msra.mxu1 %v5316_v47 }
 0x533   :  { %1435 = vmatprep.subr.mxu0 %v5319_v48  ;;  %1506 = vmatprep.subr.mxu1 %v5322_v50 }
 0x534   :  { %1436 = vmatpush1.msra.mxu0 %v5325_v49  ;;  %1507 = vmatpush1.msra.mxu1 %v5328_v59 }
 0x535   :  { %1437 = vmatprep.subr.mxu0 %v5331_v58  ;;  %1508 = vmatprep.subr.mxu1 %v5334_v5 }
 0x536   :  { %1438 = vmatpush1.msra.mxu0 %v5337_v6  ;;  %1509 = vmatpush1.msra.mxu1 %v5340_v7 }
 0x537   :  { %1439 = vmatprep.subr.mxu0 %v5343_v9  ;;  %1510 = vmatprep.subr.mxu1 %v5346_v10 }
 0x538   :  { %1440 = vmatpush1.msra.mxu0 %v5349_v11  ;;  %1511 = vmatpush1.msra.mxu1 %v5352_v12 }
 0x539   :  { %1441 = vmatprep.subr.mxu0 %v5355_v13  ;;  %1512 = vmatprep.subr.mxu1 %v5358_v14 }
 0x53a   :  { %1442 = vmatpush1.msra.mxu0 %v5361_v15  ;;  %1513 = vmatpush1.msra.mxu1 %v5364_v16 }
 0x53b   :  { %1443 = vmatprep.subr.mxu0 %v5367_v18  ;;  %1514 = vmatprep.subr.mxu1 %v5370_v19  ;;  %v5388_v19 = vld [vmem:[#allocation10 + $0x30] sm:$0xff] }
 0x53c   :  { %1444 = vmatpush1.msra.mxu0 %v5373_v20  ;;  %1515 = vmatpush1.msra.mxu1 %v5376_v21  ;;  %6960 = vst [vmem:[#allocation42_spill] sm:$0xff] %v5388_v19  ;;  %v5391_v20 = vld [vmem:[#allocation10 + $0x8] sm:$0xff]  ;;  %v5394_v21 = vld [vmem:[#allocation10 + $0x18] sm:$0xff] }
 0x53d   :  { %1445 = vmatprep.subr.mxu0 %v5379_v23  ;;  %1516 = vmatprep.subr.mxu1 %v5382_v24  ;;  %6961 = vst [vmem:[#allocation45_spill] sm:$0xff] %v5391_v20  ;;  %6962 = vst [vmem:[#allocation44_spill] sm:$0xff] %v5394_v21  ;;  %v5397_v23 = vld [vmem:[#allocation10] sm:$0xff]  ;;  %v5401_v24 = vld [vmem:[#allocation10 + $0x10] sm:$0xff] }
 0x53e   :  { %1446 = vmatpush1.msra.mxu0 %v5385_v27  ;;  %1517 = vmatpush1.msra.mxu1 %v5388_v19  ;;  %6963 = vst [vmem:[#allocation47_spill] sm:$0xff] %v5397_v23  ;;  %6964 = vst [vmem:[#allocation46_spill] sm:$0xff] %v5401_v24 }
 0x53f   :  { %1447 = vmatprep.subr.mxu0 %v5391_v20  ;;  %1518 = vmatprep.subr.mxu1 %v5394_v21  ;;  %v6965_v20 = vld [vmem:[#allocation62_spill] sm:$0xff] }
 0x540   :  { %1448 = vmatpush1.msra.mxu0 %v5397_v23  ;;  %1481 = vmatprep.mubr.f32.mxu0 %v6925_v25  ;;  %v357_v19 = vadd.f32 %v6965_v20, %v6929_v30  ;;  %v6966_v23 = vld [vmem:[#allocation63_spill] sm:$0xff] }
 0x541   :  { %1519 = vmatpush1.msra.mxu1 %v5401_v24  ;;  %1552 = vmatprep.mubr.f32.mxu1 %v6925_v25  ;;  %v6967_v25 = vld [vmem:[#allocation73_spill] sm:$0xff] }
 0x542   :  { %1592 = vmatprep.subr.mxu0 %v5250_v36  ;;  %1663 = vmatprep.subr.mxu1 %v5253_v37  ;;  %v472_v12 = vadd.f32 %v6967_v25, %v6874_v51  ;;  %v6968_v37 = vld [vmem:[#allocation72_spill] sm:$0xff] }
 0x543   :  { %v470_v11 = vadd.f32 %v6968_v37, %v4822_v60 }
 0x5e1   :  { %v1308_v21 = vpop.f32.mrf.mxu0  ;;  %v1379_v14 = vpop.f32.mrf.mxu1 }
 0x5e2   :  { %v1384_v27 = vadd.f32 %v1308_v21, %v357_v19  ;;  %v1386_v10 = vadd.f32 %v1379_v14, %v470_v11 }
 0x5e3   :  { %v1310_v18 = vpop.f32.mrf.mxu0  ;;  %v1381_v24 = vpop.f32.mrf.mxu1 }
 0x5e4   :  { %v3834_v16 = vmul.f32 -1.442695, %v1384_v27  ;;  %v1385_v15 = vadd.f32 %v1310_v18, %v6966_v23  ;;  %v1387_v36 = vadd.f32 %v1381_v24, %v472_v12 }
 0x5e6   :  { %4010 = vpow2.f32 %v3834_v16  ;;  %v3835_v13 = vmul.f32 -1.442695, %v1385_v15  ;;  %v3836_v20 = vmul.f32 -1.442695, %v1387_v36 }
 0x5e8   :  { %4012 = vpow2.f32 %v3835_v13 }
 0x5e9   :  { %4014 = vtanh.f32 %v1386_v10 }
 0x5ea   :  { %4016 = vpow2.f32 %v3836_v20 }
 0x5f3   :  { %v4011_v30 = vpop.eup %4010 }
 0x5f4   :  { %v1391_v19 = vadd.f32 1.0, %v4011_v30 }
 0x5f5   :  { %v4013_v27 = vpop.eup %4012 }
 0x5f6   :  { %4018 = vrcp.f32 %v1391_v19  ;;  %v1397_v16 = vadd.f32 1.0, %v4013_v27  ;;  %v4015_v15 = vpop.eup %4014 }
 0x5f7   :  { %v4017_v13 = vpop.eup %4016 }
 0x5f8   :  { %4020 = vrcp.f32 %v1397_v16  ;;  %v1404_v25 = vadd.f32 1.0, %v4017_v13 }
 0x5fa   :  { %4022 = vrcp.f32 %v1404_v25 }
 0x603   :  { %v4019_v18 = vpop.eup %4018 }
 0x604   :  { %v1408_v21 = vmul.f32 %v4019_v18, %v4015_v15 }
 0x605   :  { %v4021_v23 = vpop.eup %4020 }
 0x606   :  { %v1407_v12 = vmul.f32 %v4021_v23, %v5264_v22 }
 0x607   :  { %v4023_v30 = vpop.eup %4022 }
 0x608   :  { %v5415_v24 = vadd.f32 %v1408_v21, %v1407_v12 }
 0x60a   :  { %4024 = vtanh.f32 %v5415_v24 }
 0x617   :  { %v4025_v10 = vpop.eup %4024 }
 0x618   :  { %v5418_v11 = vmul.f32 %v4025_v10, %v4023_v30 }
 0x61a   :  { %1482 = vmatmul.mubr.f32.vlgmr.msra.gmra.mxu0 %v5418_v11  ;;  %1553 = vmatmul.mubr.f32.vlgmr.msra.gmra.mxu1 %v5418_v11 }
 0x61b   :  { %1593 = vmatpush1.msra.mxu0 %v5132_v57  ;;  %1664 = vmatpush1.msra.mxu1 %v5135_v2  ;;  %v6971_v57 = vld [vmem:[#allocation31_spill] sm:$0xff]  ;;  %v6972_v2 = vld [vmem:[#allocation33_spill] sm:$0xff] }
 0x61c   :  { %1594 = vmatprep.subr.mxu0 %v5138_v3  ;;  %1665 = vmatprep.subr.mxu1 %v5141_v4  ;;  %v6973_v3 = vld [vmem:[#allocation32_spill] sm:$0xff]  ;;  %v6974_v4 = vld [vmem:[#allocation35_spill] sm:$0xff] }
 0x61d   :  { %1595 = vmatpush1.msra.mxu0 %v5144_v1  ;;  %1666 = vmatpush1.msra.mxu1 %v5147_v63  ;;  %v6975_v1 = vld [vmem:[#allocation34_spill] sm:$0xff]  ;;  %v6976_v63 = vld [vmem:[#allocation37_spill] sm:$0xff] }
 0x61e   :  { %1596 = vmatprep.subr.mxu0 %v5150_v52  ;;  %1667 = vmatprep.subr.mxu1 %v5153_v17  ;;  %v6977_v52 = vld [vmem:[#allocation36_spill] sm:$0xff]  ;;  %v6978_v17 = vld [vmem:[#allocation38_spill] sm:$0xff] }
 0x61f   :  { %1597 = vmatpush1.msra.mxu0 %v5156_v55  ;;  %1668 = vmatpush1.msra.mxu1 %v5159_v35  ;;  %v6979_v55 = vld [vmem:[#allocation39_spill] sm:$0xff]  ;;  %v6980_v35 = vld [vmem:[#allocation41_spill] sm:$0xff] }
 0x620   :  { %1598 = vmatprep.subr.mxu0 %v5162_v53  ;;  %1669 = vmatprep.subr.mxu1 %v5165_v26  ;;  %v6981_v53 = vld [vmem:[#allocation40_spill] sm:$0xff]  ;;  %v6982_v26 = vld [vmem:[#allocation43_spill] sm:$0xff] }
 0x621   :  { %1599 = vmatpush1.msra.mxu0 %v5168_v28  ;;  %1670 = vmatpush1.msra.mxu1 %v5171_v29  ;;  %v6983_v28 = vld [vmem:[#allocation42_spill] sm:$0xff]  ;;  %v6984_v29 = vld [vmem:[#allocation45_spill] sm:$0xff] }
 0x622   :  { %1600 = vmatprep.subr.mxu0 %v5174_v31  ;;  %1671 = vmatprep.subr.mxu1 %v5177_v32  ;;  %v6985_v31 = vld [vmem:[#allocation44_spill] sm:$0xff]  ;;  %v6986_v32 = vld [vmem:[#allocation47_spill] sm:$0xff] }
 0x623   :  { %1601 = vmatpush1.msra.mxu0 %v5180_v33  ;;  %1672 = vmatpush1.msra.mxu1 %v5183_v34  ;;  %v6987_v33 = vmov 0.0   ;;  %v6988_v34 = vld [vmem:[#allocation46_spill] sm:$0xff] }
 0x624   :  { %1602 = vmatprep.subr.mxu0 %v6943_v62  ;;  %1673 = vmatprep.subr.mxu1 %v6944_v38 }
 0x625   :  { %1603 = vmatpush1.msra.mxu0 %v6945_v39  ;;  %1674 = vmatpush1.msra.mxu1 %v5195_v56  ;;  %v6991_v39 = vld [vmem:[#allocation65_spill] sm:$0xff] }
 0x626   :  { %1604 = vmatprep.subr.mxu0 %v5198_v54  ;;  %1675 = vmatprep.subr.mxu1 %v5201_v44  ;;  %v6969_v44 = vld [vmem:[#allocation66_spill] sm:$0xff] }
 0x627   :  { %1605 = vmatpush1.msra.mxu0 %v5204_v0  ;;  %1676 = vmatpush1.msra.mxu1 %v5207_v61  ;;  %v6970_v54 = vld [vmem:[#allocation30_spill] sm:$0xff]  ;;  %v6989_v0 = vld [vmem:[#allocation51_spill] sm:$0xff]  ;;  %v6990_v61 = vld [vmem:[#allocation64_spill] sm:$0xff] }
 0x628   :  { %1606 = vmatprep.subr.mxu0 %v5210_v8  ;;  %1677 = vmatprep.subr.mxu1 %v5298_v40  ;;  %v363_v8 = vadd.f32 %v6990_v61, %v6989_v0 }
 0x629   :  { %1607 = vmatpush1.msra.mxu0 %v5301_v41  ;;  %1678 = vmatpush1.msra.mxu1 %v5304_v42 }
 0x62a   :  { %1608 = vmatprep.subr.mxu0 %v5307_v43  ;;  %1679 = vmatprep.subr.mxu1 %v5310_v45  ;;  %v6992_v45 = vld [vmem:[#allocation75_spill] sm:$0xff] }
 0x62b   :  { %1609 = vmatpush1.msra.mxu0 %v5313_v46  ;;  %1680 = vmatpush1.msra.mxu1 %v5316_v47  ;;  %v478_v46 = vadd.f32 %v6992_v45, %v6874_v51 }
 0x62c   :  { %1610 = vmatprep.subr.mxu0 %v5319_v48  ;;  %1681 = vmatprep.subr.mxu1 %v5322_v50  ;;  %v6993_v48 = vld [vmem:[#allocation74_spill] sm:$0xff] }
 0x62d   :  { %1611 = vmatpush1.msra.mxu0 %v5325_v49  ;;  %1682 = vmatpush1.msra.mxu1 %v5328_v59  ;;  %v476_v50 = vadd.f32 %v6993_v48, %v4822_v60 }
 0x62e   :  { %1612 = vmatprep.subr.mxu0 %v5331_v58  ;;  %1683 = vmatprep.subr.mxu1 %v5334_v5 }
 0x62f   :  { %1613 = vmatpush1.msra.mxu0 %v5337_v6  ;;  %1684 = vmatpush1.msra.mxu1 %v5340_v7 }
 0x630   :  { %1614 = vmatprep.subr.mxu0 %v5343_v9  ;;  %1685 = vmatprep.subr.mxu1 %v6969_v44 }
 0x631   :  { %1615 = vmatpush1.msra.mxu0 %v6970_v54  ;;  %1686 = vmatpush1.msra.mxu1 %v6971_v57 }
 0x632   :  { %1616 = vmatprep.subr.mxu0 %v6972_v2  ;;  %1687 = vmatprep.subr.mxu1 %v6973_v3 }
 0x633   :  { %1617 = vmatpush1.msra.mxu0 %v6974_v4  ;;  %1688 = vmatpush1.msra.mxu1 %v6975_v1 }
 0x634   :  { %1618 = vmatprep.subr.mxu0 %v6976_v63  ;;  %1689 = vmatprep.subr.mxu1 %v6977_v52 }
 0x635   :  { %1619 = vmatpush1.msra.mxu0 %v6978_v17  ;;  %1690 = vmatpush1.msra.mxu1 %v6979_v55 }
 0x636   :  { %1620 = vmatprep.subr.mxu0 %v6980_v35  ;;  %1691 = vmatprep.subr.mxu1 %v6981_v53 }
 0x637   :  { %1621 = vmatpush1.msra.mxu0 %v6982_v26  ;;  %1692 = vmatpush1.msra.mxu1 %v6983_v28 }
 0x638   :  { %1622 = vmatprep.subr.mxu0 %v6984_v29  ;;  %1693 = vmatprep.subr.mxu1 %v6985_v31 }
 0x639   :  { %1623 = vmatpush1.msra.mxu0 %v6986_v32  ;;  %1656 = vmatprep.mubr.f32.mxu0 %v6987_v33 }
 0x63a   :  { %1694 = vmatpush1.msra.mxu1 %v6988_v34  ;;  %1727 = vmatprep.mubr.f32.mxu1 %v6987_v33 }
 0x6da   :  { %v1483_v56 = vpop.f32.mrf.mxu0  ;;  %v1554_v41 = vpop.f32.mrf.mxu1 }
 0x6db   :  { %v1559_v22 = vadd.f32 %v1483_v56, %v363_v8  ;;  %v1561_v49 = vadd.f32 %v1554_v41, %v476_v50 }
 0x6dc   :  { %v1485_v62 = vpop.f32.mrf.mxu0  ;;  %v1556_v43 = vpop.f32.mrf.mxu1 }
 0x6dd   :  { %v3837_v38 = vmul.f32 -1.442695, %v1559_v22  ;;  %v1560_v40 = vadd.f32 %v1485_v62, %v6991_v39  ;;  %v1562_v47 = vadd.f32 %v1556_v43, %v478_v46 }
 0x6df   :  { %4026 = vpow2.f32 %v3837_v38  ;;  %v3838_v42 = vmul.f32 -1.442695, %v1560_v40  ;;  %v3839_v59 = vmul.f32 -1.442695, %v1562_v47 }
 0x6e1   :  { %4028 = vpow2.f32 %v3838_v42 }
 0x6e2   :  { %4030 = vtanh.f32 %v1561_v49 }
 0x6e3   :  { %4032 = vpow2.f32 %v3839_v59 }
 0x6ec   :  { %v4027_v58 = vpop.eup %4026 }
 0x6ed   :  { %v1566_v5 = vadd.f32 1.0, %v4027_v58 }
 0x6ee   :  { %v4029_v6 = vpop.eup %4028 }
 0x6ef   :  { %4034 = vrcp.f32 %v1566_v5  ;;  %v1572_v7 = vadd.f32 1.0, %v4029_v6  ;;  %v4031_v9 = vpop.eup %4030 }
 0x6f0   :  { %v4033_v14 = vpop.eup %4032 }
 0x6f1   :  { %4036 = vrcp.f32 %v1572_v7  ;;  %v1579_v19 = vadd.f32 1.0, %v4033_v14 }
 0x6f3   :  { %4038 = vrcp.f32 %v1579_v19 }
 0x6fc   :  { %v4035_v36 = vpop.eup %4034 }
 0x6fd   :  { %v1583_v37 = vmul.f32 %v4035_v36, %v4031_v9 }
 0x6fe   :  { %v4037_v20 = vpop.eup %4036 }
 0x6ff   :  { %v1582_v27 = vmul.f32 %v4037_v20, %v5415_v24 }
 0x700   :  { %v4039_v15 = vpop.eup %4038 }
 0x701   :  { %v1584_v16 = vadd.f32 %v1583_v37, %v1582_v27 }
 0x703   :  { %4040 = vtanh.f32 %v1584_v16 }
 0x710   :  { %v4041_v13 = vpop.eup %4040 }
 0x711   :  { %v5494_v18 = vmul.f32 %v4041_v13, %v4039_v15 }
 0x713   :  { %1657 = vmatmul.mubr.f32.vlgmr.msra.gmra.mxu0 %v5494_v18  ;;  %1728 = vmatmul.mubr.f32.vlgmr.msra.gmra.mxu1 %v5494_v18 }
 0x714   :  { %4423 = shalt.err (!%p4420_p5)  }
 0x715   :  { %89 = dma.hbm_to_vmem [thread:$0]  %s6609_s4, 8192, %s87_s2, [#allocation6] }
 0x716   :  { %s4432_s21 = scalar_lea.vmem %s99_s19, 8192  ;;  %p4437_p7 = scmp.lt.s32.totalorder %s99_s19, %s99_s19 }
 0x717   :  { %p4433_p6 = scmp.ne.s32.totalorder %s99_s19, %s4432_s21  ;;  %p4438_p8 = scmp.lt.s32.totalorder %s4432_s21, %s4432_s21 }
 0x719   :  { %p4439_p9 = por %p4438_p8, %p4437_p7 }
 0x71b   :  { %p4440_p10 = pnand %p4439_p9, %p4433_p6 }
 0x71d   :  { %4443 = shalt.err (!%p4440_p10)  }
 0x71e   :  { %101 = dma.hbm_to_vmem [thread:$0]  %s6610_s5, 8192, %s99_s19, [#allocation6 + $0x1]  ;;  %v6994_v21 = vld [vmem:[#allocation76_spill] sm:$0xff]  ;;  %v6996_v24 = vld [vmem:[#allocation78_spill] sm:$0xff]  ;;  %v6997_v1 = vld [vmem:[#allocation79_spill] sm:$0xff] }
 0x71f   :  { %v369_v23 = vadd.f32 %v6994_v21, %v6989_v0  ;;  %v6995_v12 = vld [vmem:[#allocation56_spill] sm:$0xff]  ;;  %v484_v63 = vadd.f32 %v6997_v1, %v6874_v51  ;;  %v6998_v17 = vld [vmem:[#allocation77_spill] sm:$0xff] }
 0x720   :  { %v371_v30 = vadd.f32 %v6996_v24, %v6995_v12  ;;  %v482_v55 = vadd.f32 %v6998_v17, %v4822_v60 }
 0x7d3   :  { %v1658_v25 = vpop.f32.mrf.mxu0  ;;  %v1729_v2 = vpop.f32.mrf.mxu1 }
 0x7d4   :  { %v1734_v10 = vadd.f32 %v1658_v25, %v369_v23  ;;  %v1736_v35 = vadd.f32 %v1729_v2, %v482_v55 }
 0x7d5   :  { %v1660_v44 = vpop.f32.mrf.mxu0  ;;  %v1731_v4 = vpop.f32.mrf.mxu1 }
 0x7d6   :  { %v3840_v54 = vmul.f32 -1.442695, %v1734_v10  ;;  %v1735_v57 = vadd.f32 %v1660_v44, %v371_v30  ;;  %v1737_v52 = vadd.f32 %v1731_v4, %v484_v63 }
 0x7d8   :  { %4042 = vpow2.f32 %v3840_v54  ;;  %v3841_v3 = vmul.f32 -1.442695, %v1735_v57  ;;  %v3842_v53 = vmul.f32 -1.442695, %v1737_v52 }
 0x7da   :  { %4044 = vpow2.f32 %v3841_v3 }
 0x7db   :  { %4046 = vtanh.f32 %v1736_v35 }
 0x7dc   :  { %4048 = vpow2.f32 %v3842_v53 }
 0x7e5   :  { %v4043_v26 = vpop.eup %4042 }
 0x7e6   :  { %v1741_v28 = vadd.f32 1.0, %v4043_v26 }
 0x7e7   :  { %v4045_v29 = vpop.eup %4044 }
 0x7e8   :  { %4050 = vrcp.f32 %v1741_v28  ;;  %v1747_v31 = vadd.f32 1.0, %v4045_v29  ;;  %v4047_v32 = vpop.eup %4046 }
 0x7e9   :  { %v4049_v34 = vpop.eup %4048 }
 0x7ea   :  { %4052 = vrcp.f32 %v1747_v31  ;;  %v1754_v51 = vadd.f32 1.0, %v4049_v34 }
 0x7ec   :  { %4054 = vrcp.f32 %v1754_v51 }
 0x7f5   :  { %v4051_v0 = vpop.eup %4050 }
 0x7f6   :  { %v1758_v61 = vmul.f32 %v4051_v0, %v4047_v32 }
 0x7f7   :  { %v4053_v8 = vpop.eup %4052 }
 0x7f8   :  { %v1757_v56 = vmul.f32 %v4053_v8, %v1584_v16 }
 0x7f9   :  { %v4055_v60 = vpop.eup %4054 }
 0x7fa   :  { %v1759_v22 = vadd.f32 %v1758_v61, %v1757_v56 }
 0x7fc   :  { %4056 = vtanh.f32 %v1759_v22 }
 0x809   :  { %v4057_v62 = vpop.eup %4056 }
 0x80a   :  { %v5512_v38 = vmul.f32 %v4057_v62, %v4055_v60 }
 0x80b   :  { %4468 = dma.done.wait [#allocation6], 8192 }
 0x80c   :  { %4469 = vsyncadd [#allocation6], 4294959104 }
 0x80d   :  { %4470 = dma.done.wait [#allocation6 + $0x1], 8192 }
 0x80e   :  { %4471 = vsyncadd [#allocation6 + $0x1], 4294959104  ;;  %1991 = vmatprep.mubr.f32.mxu0 %v6987_v33  ;;  %2104 = vmatprep.mubr.f32.mxu1 %v6987_v33  ;;  %v1830_v39 = vld [vmem:[#allocation2 + $0x1e8] sm:$0xff]  ;;  %v1829_v40 = vld [vmem:[#allocation2 + $0x1e0] sm:$0xff]  ;;  %vm4484_vm0 = vmmov 0   ;;  %s4485_s2 = smov [#allocation13]  }
 0x80f   :  { %v1826_v41 = vld [vmem:[#allocation2 + $0x1c8] sm:$0xff]  ;;  %1927 = vmatprep.subr.mxu0 %v1830_v39  ;;  %v1825_v42 = vld [vmem:[#allocation2 + $0x1c0] sm:$0xff]  ;;  %v1832_v47 = vld [vmem:[#allocation2 + $0x1f8] sm:$0xff]  ;;  %s3797_s18 = sshll.u32 %s4485_s2, 4  ;;  %s3798_s18 = int_to_ptr.vmem [resolvable:$true] %s3797_s18 }
 0x810   :  { %1928 = vmatpush1.msra.mxu0 %v1829_v40  ;;  %v1822_v43 = vld [vmem:[#allocation2 + $0x1a8] sm:$0xff]  ;;  %v1821_v45 = vld [vmem:[#allocation2 + $0x1a0] sm:$0xff]  ;;  %2040 = vmatprep.subr.mxu1 %v1832_v47  ;;  %v1831_v50 = vld [vmem:[#allocation2 + $0x1f0] sm:$0xff]  ;;  %s4444_s19 = scalar_lea.vmem %s3798_s18, 128  ;;  %p4449_p12 = scmp.lt.s32.totalorder %s3798_s18, %s3798_s18 }
 0x811   :  { %1929 = vmatprep.subr.mxu0 %v1826_v41  ;;  %v1818_v46 = vld [vmem:[#allocation2 + $0x188] sm:$0xff]  ;;  %v1817_v48 = vld [vmem:[#allocation2 + $0x180] sm:$0xff]  ;;  %v1828_v49 = vld [vmem:[#allocation2 + $0x1d8] sm:$0xff]  ;;  %2041 = vmatpush1.msra.mxu1 %v1831_v50  ;;  %p4445_p11 = scmp.ne.s32.totalorder %s3798_s18, %s4444_s19  ;;  %p4450_p13 = scmp.lt.s32.totalorder %s4444_s19, %s4444_s19 }
 0x812   :  { %1930 = vmatpush1.msra.mxu0 %v1825_v42  ;;  %v1814_v59 = vld [vmem:[#allocation2 + $0x168] sm:$0xff]  ;;  %v1827_v58 = vld [vmem:[#allocation2 + $0x1d0] sm:$0xff]  ;;  %v1813_v5 = vld [vmem:[#allocation2 + $0x160] sm:$0xff]  ;;  %2042 = vmatprep.subr.mxu1 %v1828_v49 }
 0x813   :  { %1931 = vmatprep.subr.mxu0 %v1822_v43  ;;  %v1824_v6 = vld [vmem:[#allocation2 + $0x1b8] sm:$0xff]  ;;  %v1823_v7 = vld [vmem:[#allocation2 + $0x1b0] sm:$0xff]  ;;  %v1810_v9 = vld [vmem:[#allocation2 + $0x148] sm:$0xff]  ;;  %2043 = vmatpush1.msra.mxu1 %v1827_v58  ;;  %p4451_p0 = por %p4450_p13, %p4449_p12 }
 0x814   :  { %1932 = vmatpush1.msra.mxu0 %v1821_v45  ;;  %v1820_v14 = vld [vmem:[#allocation2 + $0x198] sm:$0xff]  ;;  %v1809_v36 = vld [vmem:[#allocation2 + $0x140] sm:$0xff]  ;;  %2044 = vmatprep.subr.mxu1 %v1824_v6  ;;  %v1819_v37 = vld [vmem:[#allocation2 + $0x190] sm:$0xff] }
 0x815   :  { %1933 = vmatprep.subr.mxu0 %v1818_v46  ;;  %v1806_v20 = vld [vmem:[#allocation2 + $0x128] sm:$0xff]  ;;  %2045 = vmatpush1.msra.mxu1 %v1823_v7  ;;  %v1816_v19 = vld [vmem:[#allocation2 + $0x178] sm:$0xff]  ;;  %v1805_v27 = vld [vmem:[#allocation2 + $0x120] sm:$0xff]  ;;  %p4452_p1 = pnand %p4451_p0, %p4445_p11 }
 0x816   :  { %1934 = vmatpush1.msra.mxu0 %v1817_v48  ;;  %2046 = vmatprep.subr.mxu1 %v1820_v14  ;;  %v1815_v16 = vld [vmem:[#allocation2 + $0x170] sm:$0xff]  ;;  %v1802_v15 = vld [vmem:[#allocation2 + $0x108] sm:$0xff]  ;;  %v1812_v13 = vld [vmem:[#allocation2 + $0x158] sm:$0xff] }
 0x817   :  { %1935 = vmatprep.subr.mxu0 %v1814_v59  ;;  %2047 = vmatpush1.msra.mxu1 %v1819_v37  ;;  %v1801_v21 = vld [vmem:[#allocation2 + $0x100] sm:$0xff]  ;;  %v1811_v23 = vld [vmem:[#allocation2 + $0x150] sm:$0xff]  ;;  %v1798_v25 = vld [vmem:[#allocation2 + $0xe8] sm:$0xff] }
 0x818   :  { %1936 = vmatpush1.msra.mxu0 %v1813_v5  ;;  %2048 = vmatprep.subr.mxu1 %v1816_v19  ;;  %v1808_v12 = vld [vmem:[#allocation2 + $0x138] sm:$0xff]  ;;  %v1797_v24 = vld [vmem:[#allocation2 + $0xe0] sm:$0xff]  ;;  %v1807_v30 = vld [vmem:[#allocation2 + $0x130] sm:$0xff] }
 0x819   :  { %1937 = vmatprep.subr.mxu0 %v1810_v9  ;;  %2049 = vmatpush1.msra.mxu1 %v1815_v16  ;;  %v1794_v10 = vld [vmem:[#allocation2 + $0xc8] sm:$0xff]  ;;  %v1804_v44 = vld [vmem:[#allocation2 + $0x118] sm:$0xff]  ;;  %v1793_v54 = vld [vmem:[#allocation2 + $0xc0] sm:$0xff] }
 0x81a   :  { %1938 = vmatpush1.msra.mxu0 %v1809_v36  ;;  %2050 = vmatprep.subr.mxu1 %v1812_v13  ;;  %v1803_v57 = vld [vmem:[#allocation2 + $0x110] sm:$0xff]  ;;  %v1790_v2 = vld [vmem:[#allocation2 + $0xa8] sm:$0xff]  ;;  %v1800_v3 = vld [vmem:[#allocation2 + $0xf8] sm:$0xff] }
 0x81b   :  { %1939 = vmatprep.subr.mxu0 %v1806_v20  ;;  %2051 = vmatpush1.msra.mxu1 %v1811_v23  ;;  %v1789_v4 = vld [vmem:[#allocation2 + $0xa0] sm:$0xff]  ;;  %v1799_v1 = vld [vmem:[#allocation2 + $0xf0] sm:$0xff]  ;;  %v1786_v63 = vld [vmem:[#allocation2 + $0x88] sm:$0xff] }
 0x81c   :  { %1940 = vmatpush1.msra.mxu0 %v1805_v27  ;;  %2052 = vmatprep.subr.mxu1 %v1808_v12  ;;  %v1796_v52 = vld [vmem:[#allocation2 + $0xd8] sm:$0xff]  ;;  %v1785_v17 = vld [vmem:[#allocation2 + $0x80] sm:$0xff]  ;;  %v1795_v55 = vld [vmem:[#allocation2 + $0xd0] sm:$0xff] }
 0x81d   :  { %1941 = vmatprep.subr.mxu0 %v1802_v15  ;;  %2053 = vmatpush1.msra.mxu1 %v1807_v30  ;;  %v1782_v35 = vld [vmem:[#allocation2 + $0x68] sm:$0xff]  ;;  %v1792_v53 = vld [vmem:[#allocation2 + $0xb8] sm:$0xff]  ;;  %v1781_v26 = vld [vmem:[#allocation2 + $0x60] sm:$0xff] }
 0x81e   :  { %1942 = vmatpush1.msra.mxu0 %v1801_v21  ;;  %2054 = vmatprep.subr.mxu1 %v1804_v44  ;;  %v1791_v28 = vld [vmem:[#allocation2 + $0xb0] sm:$0xff]  ;;  %v1778_v29 = vld [vmem:[#allocation2 + $0x48] sm:$0xff]  ;;  %v1788_v31 = vld [vmem:[#allocation2 + $0x98] sm:$0xff] }
 0x81f   :  { %1943 = vmatprep.subr.mxu0 %v1798_v25  ;;  %2055 = vmatpush1.msra.mxu1 %v1803_v57  ;;  %v1777_v32 = vld [vmem:[#allocation2 + $0x40] sm:$0xff]  ;;  %v1787_v34 = vld [vmem:[#allocation2 + $0x90] sm:$0xff]  ;;  %v1774_v0 = vld [vmem:[#allocation2 + $0x28] sm:$0xff] }
 0x820   :  { %1944 = vmatpush1.msra.mxu0 %v1797_v24  ;;  %2056 = vmatprep.subr.mxu1 %v1800_v3  ;;  %v1784_v61 = vld [vmem:[#allocation2 + $0x78] sm:$0xff]  ;;  %v1773_v8 = vld [vmem:[#allocation2 + $0x20] sm:$0xff]  ;;  %v1783_v51 = vld [vmem:[#allocation2 + $0x70] sm:$0xff] }
 0x821   :  { %1945 = vmatprep.subr.mxu0 %v1794_v10  ;;  %2057 = vmatpush1.msra.mxu1 %v1799_v1  ;;  %v1770_v56 = vld [vmem:[#allocation2 + $0x8] sm:$0xff]  ;;  %v1780_v22 = vld [vmem:[#allocation2 + $0x58] sm:$0xff]  ;;  %v1769_v60 = vld [vmem:[#allocation2] sm:$0xff] }
 0x822   :  { %1946 = vmatpush1.msra.mxu0 %v1793_v54  ;;  %2058 = vmatprep.subr.mxu1 %v1796_v52  ;;  %v1779_v62 = vld [vmem:[#allocation2 + $0x50] sm:$0xff]  ;;  %v1776_v39 = vld [vmem:[#allocation2 + $0x38] sm:$0xff]  ;;  %v6999_v42 = vld [vmem:[#allocation53_spill] sm:$0xff] }
 0x823   :  { %1947 = vmatprep.subr.mxu0 %v1790_v2  ;;  %2059 = vmatpush1.msra.mxu1 %v1795_v55  ;;  %v1775_v40 = vld [vmem:[#allocation2 + $0x30] sm:$0xff]  ;;  %v1772_v41 = vld [vmem:[#allocation2 + $0x18] sm:$0xff]  ;;  %v7000_v45 = vld [vmem:[#allocation52_spill] sm:$0xff] }
 0x824   :  { %1948 = vmatpush1.msra.mxu0 %v1789_v4  ;;  %2060 = vmatprep.subr.mxu1 %v1792_v53  ;;  %v1771_v43 = vld [vmem:[#allocation2 + $0x10] sm:$0xff]  ;;  %v7001_v46 = vld [vmem:[#allocation27_spill] sm:$0xff]  ;;  %v7002_v47 = vld [vmem:[#allocation29_spill] sm:$0xff] }
 0x825   :  { %1949 = vmatprep.subr.mxu0 %v1786_v63  ;;  %2061 = vmatpush1.msra.mxu1 %v1791_v28  ;;  %v7003_v48 = vld [vmem:[#allocation67_spill] sm:$0xff]  ;;  %v5548_v50 = vld [vmem:[#allocation3 + $0x1e8] sm:$0xff]  ;;  %v5553_v49 = vld [vmem:[#allocation3 + $0x1e0] sm:$0xff] }
 0x826   :  { %1950 = vmatpush1.msra.mxu0 %v1785_v17  ;;  %2062 = vmatprep.subr.mxu1 %v1788_v31  ;;  %7004 = vst [vmem:[#allocation48_spill] sm:$0xff] %v5548_v50  ;;  %v5559_v59 = vld [vmem:[#allocation3 + $0x1c8] sm:$0xff]  ;;  %v5565_v58 = vld [vmem:[#allocation3 + $0x1c0] sm:$0xff]  ;;  %v5568_v5 = vld [vmem:[#allocation3 + $0x1d0] sm:$0xff] }
 0x827   :  { %1951 = vmatprep.subr.mxu0 %v1782_v35  ;;  %2063 = vmatpush1.msra.mxu1 %v1787_v34  ;;  %v5571_v6 = vld [vmem:[#allocation3 + $0x1a8] sm:$0xff]  ;;  %v5574_v7 = vld [vmem:[#allocation3 + $0x1b8] sm:$0xff]  ;;  %v5577_v9 = vld [vmem:[#allocation3 + $0x1a0] sm:$0xff] }
 0x828   :  { %1952 = vmatpush1.msra.mxu0 %v1781_v26  ;;  %2064 = vmatprep.subr.mxu1 %v1784_v61  ;;  %v5580_v14 = vld [vmem:[#allocation3 + $0x1b0] sm:$0xff]  ;;  %v5583_v36 = vld [vmem:[#allocation3 + $0x188] sm:$0xff]  ;;  %v5586_v37 = vld [vmem:[#allocation3 + $0x198] sm:$0xff] }
 0x829   :  { %1953 = vmatprep.subr.mxu0 %v1778_v29  ;;  %2065 = vmatpush1.msra.mxu1 %v1783_v51  ;;  %v5589_v20 = vld [vmem:[#allocation3 + $0x180] sm:$0xff]  ;;  %v5592_v19 = vld [vmem:[#allocation3 + $0x190] sm:$0xff]  ;;  %v5595_v27 = vld [vmem:[#allocation3 + $0x168] sm:$0xff] }
 0x82a   :  { %1954 = vmatpush1.msra.mxu0 %v1777_v32  ;;  %2066 = vmatprep.subr.mxu1 %v1780_v22  ;;  %v5598_v16 = vld [vmem:[#allocation3 + $0x178] sm:$0xff]  ;;  %v5601_v15 = vld [vmem:[#allocation3 + $0x160] sm:$0xff]  ;;  %v5604_v13 = vld [vmem:[#allocation3 + $0x170] sm:$0xff] }
 0x82b   :  { %1955 = vmatprep.subr.mxu0 %v1774_v0  ;;  %2067 = vmatpush1.msra.mxu1 %v1779_v62  ;;  %v5607_v21 = vld [vmem:[#allocation3 + $0x148] sm:$0xff]  ;;  %v5610_v23 = vld [vmem:[#allocation3 + $0x158] sm:$0xff]  ;;  %v5613_v25 = vld [vmem:[#allocation3 + $0x140] sm:$0xff] }
 0x82c   :  { %1956 = vmatpush1.msra.mxu0 %v1773_v8  ;;  %2068 = vmatprep.subr.mxu1 %v1776_v39  ;;  %v5616_v12 = vld [vmem:[#allocation3 + $0x150] sm:$0xff]  ;;  %v5619_v24 = vld [vmem:[#allocation3 + $0x128] sm:$0xff]  ;;  %v5622_v30 = vld [vmem:[#allocation3 + $0x138] sm:$0xff] }
 0x82d   :  { %1957 = vmatprep.subr.mxu0 %v1770_v56  ;;  %2069 = vmatpush1.msra.mxu1 %v1775_v40  ;;  %v5625_v10 = vld [vmem:[#allocation3 + $0x120] sm:$0xff]  ;;  %v5628_v44 = vld [vmem:[#allocation3 + $0x130] sm:$0xff]  ;;  %v5631_v54 = vld [vmem:[#allocation3 + $0x108] sm:$0xff] }
 0x82e   :  { %1958 = vmatpush1.msra.mxu0 %v1769_v60  ;;  %2070 = vmatprep.subr.mxu1 %v1772_v41  ;;  %v5634_v57 = vld [vmem:[#allocation3 + $0x118] sm:$0xff]  ;;  %v5637_v2 = vld [vmem:[#allocation3 + $0x100] sm:$0xff]  ;;  %v5640_v3 = vld [vmem:[#allocation3 + $0x110] sm:$0xff] }
 0x82f   :  { %1992 = vmatmul.mubr.f32.vlgmr.msra.gmra.mxu0 %v6999_v42  ;;  %2071 = vmatpush1.msra.mxu1 %v1771_v43  ;;  %v5643_v4 = vld [vmem:[#allocation3 + $0xe8] sm:$0xff]  ;;  %v5646_v1 = vld [vmem:[#allocation3 + $0xf8] sm:$0xff]  ;;  %v5649_v63 = vld [vmem:[#allocation3 + $0xe0] sm:$0xff] }
 0x830   :  { %1997 = vmatprep.mubr.f32.mxu0 %v6987_v33  ;;  %2105 = vmatmul.mubr.f32.vlgmr.msra.gmra.mxu1 %v6999_v42  ;;  %v5652_v52 = vld [vmem:[#allocation3 + $0xc8] sm:$0xff]  ;;  %v5654_v17 = vld [vmem:[#allocation3 + $0xf0] sm:$0xff]  ;;  %v5658_v55 = vld [vmem:[#allocation3 + $0xc0] sm:$0xff] }
 0x831   :  { %2110 = vmatprep.mubr.f32.mxu1 %v6987_v33  ;;  %2209 = vmatprep.subr.mxu0 %v5548_v50  ;;  %v5660_v35 = vld [vmem:[#allocation3 + $0xd8] sm:$0xff]  ;;  %v5662_v53 = vld [vmem:[#allocation3 + $0xa8] sm:$0xff]  ;;  %v5666_v26 = vld [vmem:[#allocation3 + $0xd0] sm:$0xff] }
 0x832   :  { %2210 = vmatpush1.msra.mxu0 %v5553_v49  ;;  %v5668_v28 = vld [vmem:[#allocation3 + $0xa0] sm:$0xff]  ;;  %v5670_v29 = vld [vmem:[#allocation3 + $0xb8] sm:$0xff]  ;;  %v5674_v31 = vld [vmem:[#allocation3 + $0x88] sm:$0xff] }
 0x833   :  { %1998 = vmatmul.mubr.f32.gmra.mxu0 %v7000_v45  ;;  %2211 = vmatprep.subr.mxu0 %v5559_v59  ;;  %7006 = vst [vmem:[#allocation26_spill] sm:$0xff] %v5674_v31  ;;  %v5676_v32 = vld [vmem:[#allocation3 + $0xb0] sm:$0xff]  ;;  %v5680_v34 = vld [vmem:[#allocation3 + $0x80] sm:$0xff]  ;;  %v5682_v0 = vld [vmem:[#allocation3 + $0x98] sm:$0xff] }
 0x834   :  { %2003 = vmatprep.mubr.f32.mxu0 %v6987_v33  ;;  %2111 = vmatmul.mubr.f32.gmra.mxu1 %v7000_v45  ;;  %7007 = vst [vmem:[#allocation58_spill] sm:$0xff] %v5680_v34  ;;  %7008 = vst [vmem:[#allocation59_spill] sm:$0xff] %v5682_v0  ;;  %v5684_v61 = vld [vmem:[#allocation3 + $0x90] sm:$0xff]  ;;  %v5688_v8 = vld [vmem:[#allocation3 + $0x68] sm:$0xff] }
 0x835   :  { %2116 = vmatprep.mubr.f32.mxu1 %v6987_v33  ;;  %2212 = vmatpush1.msra.mxu0 %v5565_v58  ;;  %7009 = vst [vmem:[#allocation69_spill] sm:$0xff] %v5684_v61  ;;  %7010 = vst [vmem:[#allocation68_spill] sm:$0xff] %v5688_v8  ;;  %v5690_v51 = vld [vmem:[#allocation3 + $0x78] sm:$0xff]  ;;  %v5694_v56 = vld [vmem:[#allocation3 + $0x60] sm:$0xff] }
 0x836   :  { %2213 = vmatprep.subr.mxu0 %v5571_v6  ;;  %7011 = vst [vmem:[#allocation60_spill] sm:$0xff] %v5690_v51  ;;  %7012 = vst [vmem:[#allocation61_spill] sm:$0xff] %v5694_v56  ;;  %v5696_v22 = vld [vmem:[#allocation3 + $0x70] sm:$0xff]  ;;  %v5700_v60 = vld [vmem:[#allocation3 + $0x48] sm:$0xff] }
 0x837   :  { %2004 = vmatmul.mubr.f32.gmra.mxu0 %v7001_v46  ;;  %7013 = vst [vmem:[#allocation71_spill] sm:$0xff] %v5696_v22  ;;  %7014 = vst [vmem:[#allocation70_spill] sm:$0xff] %v5700_v60  ;;  %v5702_v62 = vld [vmem:[#allocation3 + $0x58] sm:$0xff]  ;;  %v5706_v39 = vld [vmem:[#allocation3 + $0x40] sm:$0xff] }
 0x838   :  { %2009 = vmatprep.mubr.f32.mxu0 %v6987_v33  ;;  %2117 = vmatmul.mubr.f32.gmra.mxu1 %v7001_v46  ;;  %7015 = vst [vmem:[#allocation28_spill] sm:$0xff] %v5702_v62  ;;  %7016 = vst [vmem:[#allocation55_spill] sm:$0xff] %v5706_v39  ;;  %v5708_v40 = vld [vmem:[#allocation3 + $0x50] sm:$0xff]  ;;  %v5712_v41 = vld [vmem:[#allocation3 + $0x28] sm:$0xff] }
 0x839   :  { %2122 = vmatprep.mubr.f32.mxu1 %v6987_v33  ;;  %2214 = vmatpush1.msra.mxu0 %v5577_v9  ;;  %7017 = vst [vmem:[#allocation57_spill] sm:$0xff] %v5708_v40  ;;  %7018 = vst [vmem:[#allocation62_spill] sm:$0xff] %v5712_v41  ;;  %v5714_v42 = vld [vmem:[#allocation3 + $0x38] sm:$0xff]  ;;  %v5718_v43 = vld [vmem:[#allocation3 + $0x20] sm:$0xff] }
 0x83a   :  { %2215 = vmatprep.subr.mxu0 %v5583_v36  ;;  %7019 = vst [vmem:[#allocation63_spill] sm:$0xff] %v5714_v42  ;;  %7020 = vst [vmem:[#allocation73_spill] sm:$0xff] %v5718_v43  ;;  %v5720_v45 = vld [vmem:[#allocation3 + $0x30] sm:$0xff]  ;;  %v5724_v46 = vld [vmem:[#allocation3 + $0x8] sm:$0xff] }
 0x83b   :  { %2010 = vmatmul.mubr.f32.gmra.mxu0 %v7002_v47  ;;  %7021 = vst [vmem:[#allocation72_spill] sm:$0xff] %v5720_v45  ;;  %7022 = vst [vmem:[#allocation66_spill] sm:$0xff] %v5724_v46 }
 0x83c   :  { %2015 = vmatprep.mubr.f32.mxu0 %v6987_v33  ;;  %2123 = vmatmul.mubr.f32.gmra.mxu1 %v7002_v47  ;;  %v5726_v47 = vld [vmem:[#allocation3 + $0x18] sm:$0xff] }
 0x83d   :  { %2128 = vmatprep.mubr.f32.mxu1 %v6987_v33  ;;  %2216 = vmatpush1.msra.mxu0 %v5589_v20  ;;  %7023 = vst [vmem:[#allocation30_spill] sm:$0xff] %v5726_v47 }
 0x83e   :  { %2217 = vmatprep.subr.mxu0 %v5595_v27 }
 0x83f   :  { %2016 = vmatmul.mubr.f32.gmra.mxu0 %v7003_v48 }
 0x840   :  { %2021 = vmatprep.mubr.f32.mxu0 %v6987_v33  ;;  %2129 = vmatmul.mubr.f32.gmra.mxu1 %v7003_v48  ;;  %v5730_v48 = vld [vmem:[#allocation3] sm:$0xff] }
 0x841   :  { %2134 = vmatprep.mubr.f32.mxu1 %v6987_v33  ;;  %2218 = vmatpush1.msra.mxu0 %v5601_v15  ;;  %7024 = vst [vmem:[#allocation31_spill] sm:$0xff] %v5730_v48 }
 0x842   :  { %2219 = vmatprep.subr.mxu0 %v5607_v21 }
 0x843   :  { %2022 = vmatmul.mubr.f32.gmra.mxu0 %v5418_v11 }
 0x844   :  { %2027 = vmatprep.mubr.f32.mxu0 %v6987_v33  ;;  %2135 = vmatmul.mubr.f32.gmra.mxu1 %v5418_v11  ;;  %v5550_v11 = vld [vmem:[#allocation3 + $0x1f8] sm:$0xff] }
 0x845   :  { %2140 = vmatprep.mubr.f32.mxu1 %v6987_v33  ;;  %7005 = vst [vmem:[#allocation25_spill] sm:$0xff] %v5550_v11  ;;  %2280 = vmatprep.subr.mxu1 %v5550_v11 }
 0x846   :  { %2220 = vmatpush1.msra.mxu0 %v5613_v25 }
 0x847   :  { %2028 = vmatmul.mubr.f32.gmra.mxu0 %v5494_v18  ;;  %2221 = vmatprep.subr.mxu0 %v5619_v24 }
 0x848   :  { %2033 = vmatprep.mubr.f32.mxu0 %v6987_v33  ;;  %2141 = vmatmul.mubr.f32.gmra.mxu1 %v5494_v18  ;;  %v5556_v18 = vld [vmem:[#allocation3 + $0x1f0] sm:$0xff] }
 0x849   :  { %2146 = vmatprep.mubr.f32.mxu1 %v6987_v33  ;;  %2281 = vmatpush1.msra.mxu1 %v5556_v18 }
 0x84a   :  { %2222 = vmatpush1.msra.mxu0 %v5625_v10 }
 0x84b   :  { %2034 = vmatmul.mubr.f32.gmra.mxu0 %v5512_v38  ;;  %2223 = vmatprep.subr.mxu0 %v5631_v54 }
 0x84c   :  { %2273 = vmatprep.mubr.f32.mxu0 %v6987_v33  ;;  %2147 = vmatmul.mubr.f32.gmra.mxu1 %v5512_v38  ;;  %v5562_v38 = vld [vmem:[#allocation3 + $0x1d8] sm:$0xff] }
 0x84d   :  { %2344 = vmatprep.mubr.f32.mxu1 %v6987_v33  ;;  %2282 = vmatprep.subr.mxu1 %v5562_v38  ;;  %v5732_v33 = vld [vmem:[#allocation3 + $0x10] sm:$0xff] }
 0x84e   :  { %2283 = vmatpush1.msra.mxu1 %v5568_v5  ;;  %2224 = vmatpush1.msra.mxu0 %v5637_v2  ;;  %7025 = vst [vmem:[#allocation33_spill] sm:$0xff] %v5732_v33 }
 0x84f   :  { %2284 = vmatprep.subr.mxu1 %v5574_v7  ;;  %2225 = vmatprep.subr.mxu0 %v5643_v4 }
 0x850   :  { %2285 = vmatpush1.msra.mxu1 %v5580_v14  ;;  %2226 = vmatpush1.msra.mxu0 %v5649_v63 }
 0x851   :  { %2286 = vmatprep.subr.mxu1 %v5586_v37  ;;  %2227 = vmatprep.subr.mxu0 %v5652_v52 }
 0x852   :  { %2287 = vmatpush1.msra.mxu1 %v5592_v19  ;;  %2228 = vmatpush1.msra.mxu0 %v5658_v55 }
 0x853   :  { %2288 = vmatprep.subr.mxu1 %v5598_v16  ;;  %2229 = vmatprep.subr.mxu0 %v5662_v53 }
 0x854   :  { %2289 = vmatpush1.msra.mxu1 %v5604_v13  ;;  %2230 = vmatpush1.msra.mxu0 %v5668_v28 }
 0x855   :  { %2290 = vmatprep.subr.mxu1 %v5610_v23  ;;  %2231 = vmatprep.subr.mxu0 %v5674_v31 }
 0x856   :  { %2291 = vmatpush1.msra.mxu1 %v5616_v12  ;;  %2232 = vmatpush1.msra.mxu0 %v5680_v34 }
 0x857   :  { %2292 = vmatprep.subr.mxu1 %v5622_v30  ;;  %2233 = vmatprep.subr.mxu0 %v5688_v8 }
 0x858   :  { %2293 = vmatpush1.msra.mxu1 %v5628_v44  ;;  %2234 = vmatpush1.msra.mxu0 %v5694_v56 }
 0x859   :  { %2294 = vmatprep.subr.mxu1 %v5634_v57  ;;  %2235 = vmatprep.subr.mxu0 %v5700_v60 }
 0x85a   :  { %2295 = vmatpush1.msra.mxu1 %v5640_v3  ;;  %2236 = vmatpush1.msra.mxu0 %v5706_v39 }
 0x85b   :  { %2296 = vmatprep.subr.mxu1 %v5646_v1  ;;  %2237 = vmatprep.subr.mxu0 %v5712_v41  ;;  %v7026_v41 = vld [vmem:[#allocation50_spill] sm:$0xff] }
 0x85c   :  { %2297 = vmatpush1.msra.mxu1 %v5654_v17  ;;  %2238 = vmatpush1.msra.mxu0 %v5718_v43 }
 0x85d   :  { %2298 = vmatprep.subr.mxu1 %v5660_v35  ;;  %2239 = vmatprep.subr.mxu0 %v5724_v46 }
 0x85e   :  { %2299 = vmatpush1.msra.mxu1 %v5666_v26  ;;  %2240 = vmatpush1.msra.mxu0 %v5730_v48  ;;  %v7027_v48 = vld [vmem:[#allocation49_spill] sm:$0xff] }
 0x85f   :  { %2300 = vmatprep.subr.mxu1 %v5670_v29  ;;  %2384 = vmatprep.subr.mxu0 %v5548_v50 }
 0x860   :  { %2301 = vmatpush1.msra.mxu1 %v5676_v32 }
 0x861   :  { %2302 = vmatprep.subr.mxu1 %v5682_v0 }
 0x862   :  { %2303 = vmatpush1.msra.mxu1 %v5684_v61 }
 0x863   :  { %2304 = vmatprep.subr.mxu1 %v5690_v51  ;;  %v7033_v51 = vld [vmem:[#allocation54_spill] sm:$0xff] }
 0x864   :  { %2305 = vmatpush1.msra.mxu1 %v5696_v22 }
 0x865   :  { %2306 = vmatprep.subr.mxu1 %v5702_v62  ;;  %v7028_v62 = vsub.s32 3, %v7027_v48 }
 0x866   :  { %2307 = vmatpush1.msra.mxu1 %v5708_v40 }
 0x867   :  { %2308 = vmatprep.subr.mxu1 %v5714_v42  ;;  %v1905_v42 = vld [vmem:[%s6611_s6] sm:$0xf] }
 0x868   :  { %2309 = vmatpush1.msra.mxu1 %v5720_v45  ;;  %v5746_v43 = vrot.slane %v1905_v42, %v7026_v41 }
 0x869   :  { %2310 = vmatprep.subr.mxu1 %v5726_v47 }
 0x86a   :  { %2311 = vmatpush1.msra.mxu1 %v5732_v33  ;;  %v5751_v33 = vrot.slane %v1905_v42, %v7028_v62 }
 0x86b   :  { %2455 = vmatprep.subr.mxu1 %v5550_v11 }
 0x86c   :  { %7029 = vst [vmem:[#allocation32_spill] sm:$0xff] %v5751_v33 }
 0x8ef   :  { %v1993_v45 = vpop.f32.mrf.mxu0 }
 0x8f0   :  { %v1994_v46 = vadd.f32 %v1993_v45, %v5746_v43  ;;  %v2106_v39 = vpop.f32.mrf.mxu1  ;;  %v5761_v45 = vrot.slane %v1905_v42, %v7033_v51 }
 0x8f1   :  { %v1995_v40 = vpop.f32.mrf.mxu0 }
 0x8f2   :  { %v3843_v47 = vmul.f32 -1.442695, %v1994_v46  ;;  %v2108_v11 = vpop.f32.mrf.mxu1  ;;  %7034 = vst [vmem:[#allocation36_spill] sm:$0xff] %v5761_v45 }
 0x8f3   :  { %v5753_v50 = vpop.f32.mrf.mxu0  ;;  %v2109_v22 = vadd.f32 %v2108_v11, %v5751_v33 }
 0x8f4   :  { %7030 = vst [vmem:[#allocation35_spill] sm:$0xff] %v5753_v50  ;;  %4122 = vpow2.f32 %v3843_v47  ;;  %v5758_v41 = vpop.f32.mrf.mxu1  ;;  %v7037_v50 = vsub.s32 2, %v7027_v48 }
 0x8f5   :  { %v5755_v60 = vpop.f32.mrf.mxu0  ;;  %7032 = vst [vmem:[#allocation37_spill] sm:$0xff] %v5758_v41  ;;  %v3844_v11 = vmul.f32 -1.442695, %v2109_v22 }
 0x8f6   :  { %7031 = vst [vmem:[#allocation34_spill] sm:$0xff] %v5755_v60  ;;  %v5766_v46 = vpop.f32.mrf.mxu1  ;;  %v5770_v47 = vrot.slane %v1905_v42, %v7037_v50 }
 0x8f7   :  { %v2005_v56 = vpop.f32.mrf.mxu0  ;;  %7036 = vst [vmem:[#allocation39_spill] sm:$0xff] %v5766_v46  ;;  %4124 = vpow2.f32 %v3844_v11 }
 0x8f8   :  { %v5764_v40 = vadd.f32 %v2005_v56, %v5746_v43  ;;  %v2118_v8 = vpop.f32.mrf.mxu1  ;;  %v2107_v42 = vadd.f32 %v2106_v39, %v5770_v47 }
 0x8f9   :  { %v2007_v62 = vpop.f32.mrf.mxu0  ;;  %v5776_v61 = vadd.f32 %v2118_v8, %v5770_v47 }
 0x8fa   :  { %7035 = vst [vmem:[#allocation38_spill] sm:$0xff] %v5764_v40  ;;  %v5773_v60 = vadd.f32 %v2007_v62, %v5761_v45  ;;  %v2120_v56 = vpop.f32.mrf.mxu1  ;;  %4126 = vtanh.f32 %v2107_v42 }
 0x8fb   :  { %v2011_v41 = vpop.f32.mrf.mxu0  ;;  %7039 = vst [vmem:[#allocation40_spill] sm:$0xff] %v5776_v61  ;;  %v5782_v46 = vadd.f32 %v2120_v56, %v5751_v33 }
 0x8fc   :  { %7038 = vst [vmem:[#allocation41_spill] sm:$0xff] %v5773_v60  ;;  %v5779_v51 = vadd.f32 %v2011_v41, %v5746_v43  ;;  %v2124_v22 = vpop.f32.mrf.mxu1 }
 0x8fd   :  { %v2013_v40 = vpop.f32.mrf.mxu0  ;;  %7041 = vst [vmem:[#allocation42_spill] sm:$0xff] %v5782_v46  ;;  %v5789_v62 = vadd.f32 %v2124_v22, %v5770_v47  ;;  %v7073_v46 = vld [vmem:[#allocation66_spill] sm:$0xff] }
 0x8fe   :  { %7040 = vst [vmem:[#allocation43_spill] sm:$0xff] %v5779_v51  ;;  %v5785_v50 = vadd.f32 %v2013_v40, %v5761_v45  ;;  %v2126_v51 = vpop.f32.mrf.mxu1 }
 0x8ff   :  { %v2017_v48 = vpop.f32.mrf.mxu0  ;;  %7043 = vst [vmem:[#allocation44_spill] sm:$0xff] %v5789_v62  ;;  %v5795_v56 = vadd.f32 %v2126_v51, %v5751_v33 }
 0x900   :  { %7042 = vst [vmem:[#allocation45_spill] sm:$0xff] %v5785_v50  ;;  %v5792_v8 = vadd.f32 %v2017_v48, %v5746_v43  ;;  %v2130_v39 = vpop.f32.mrf.mxu1  ;;  %v7072_v50 = vld [vmem:[#allocation72_spill] sm:$0xff] }
 0x901   :  { %v4123_v41 = vpop.eup %4122  ;;  %v2019_v61 = vpop.f32.mrf.mxu0  ;;  %7045 = vst [vmem:[#allocation46_spill] sm:$0xff] %v5795_v56  ;;  %v5801_v22 = vadd.f32 %v2130_v39, %v5770_v47 }
 0x902   :  { %7044 = vst [vmem:[#allocation47_spill] sm:$0xff] %v5792_v8  ;;  %v2191_v60 = vadd.f32 1.0, %v4123_v41  ;;  %v5798_v40 = vadd.f32 %v2019_v61, %v5761_v45  ;;  %v2132_v8 = vpop.f32.mrf.mxu1 }
 0x903   :  { %v2023_v11 = vpop.f32.mrf.mxu0  ;;  %7047 = vst [vmem:[#allocation64_spill] sm:$0xff] %v5801_v22  ;;  %v5807_v41 = vadd.f32 %v2132_v8, %v5751_v33 }
 0x904   :  { %7046 = vst [vmem:[#allocation51_spill] sm:$0xff] %v5798_v40  ;;  %4128 = vrcp.f32 %v2191_v60  ;;  %v5804_v48 = vadd.f32 %v2023_v11, %v5746_v43  ;;  %v2136_v61 = vpop.f32.mrf.mxu1 }
 0x905   :  { %v2025_v62 = vpop.f32.mrf.mxu0  ;;  %7049 = vst [vmem:[#allocation75_spill] sm:$0xff] %v5807_v41  ;;  %v5813_v42 = vadd.f32 %v2136_v61, %v5770_v47 }
 0x906   :  { %7048 = vst [vmem:[#allocation65_spill] sm:$0xff] %v5804_v48  ;;  %v5810_v51 = vadd.f32 %v2025_v62, %v5761_v45  ;;  %v2138_v39 = vpop.f32.mrf.mxu1  ;;  %v4125_v62 = vpop.eup %4124 }
 0x907   :  { %v2029_v40 = vpop.f32.mrf.mxu0  ;;  %7051 = vst [vmem:[#allocation76_spill] sm:$0xff] %v5813_v42  ;;  %v5819_v11 = vadd.f32 %v2138_v39, %v5751_v33  ;;  %v4127_v39 = vpop.eup %4126 }
 0x908   :  { %7050 = vst [vmem:[#allocation74_spill] sm:$0xff] %v5810_v51  ;;  %v5816_v60 = vadd.f32 %v2029_v40, %v5746_v43  ;;  %v2142_v8 = vpop.f32.mrf.mxu1 }
 0x909   :  { %v2031_v22 = vpop.f32.mrf.mxu0  ;;  %7053 = vst [vmem:[#allocation78_spill] sm:$0xff] %v5819_v11  ;;  %v5825_v51 = vadd.f32 %v2142_v8, %v5770_v47 }
 0x90a   :  { %7052 = vst [vmem:[#allocation56_spill] sm:$0xff] %v5816_v60  ;;  %v5822_v48 = vadd.f32 %v2031_v22, %v5761_v45  ;;  %v2144_v42 = vpop.f32.mrf.mxu1  ;;  %v2198_v60 = vadd.f32 1.0, %v4125_v62  ;;  %v7064_v62 = vld [vmem:[#allocation71_spill] sm:$0xff] }
 0x90b   :  { %v2035_v41 = vpop.f32.mrf.mxu0  ;;  %7055 = vst [vmem:[#allocation77_spill] sm:$0xff] %v5825_v51  ;;  %v5831_v40 = vadd.f32 %v2144_v42, %v5751_v33  ;;  %v7062_v42 = vld [vmem:[#allocation60_spill] sm:$0xff] }
 0x90c   :  { %7054 = vst [vmem:[#allocation79_spill] sm:$0xff] %v5822_v48  ;;  %v5828_v61 = vadd.f32 %v2035_v41, %v5746_v43  ;;  %v2148_v56 = vpop.f32.mrf.mxu1  ;;  %4130 = vrcp.f32 %v2198_v60  ;;  %v7063_v60 = vld [vmem:[#allocation61_spill] sm:$0xff] }
 0x90d   :  { %7057 = vst [vmem:[#allocation52_spill] sm:$0xff] %v5831_v40  ;;  %v5834_v11 = vadd.f32 %v2148_v56, %v5770_v47  ;;  %v7060_v56 = vld [vmem:[#allocation69_spill] sm:$0xff] }
 0x90e   :  { %7056 = vst [vmem:[#allocation53_spill] sm:$0xff] %v5828_v61  ;;  %v7069_v61 = vld [vmem:[#allocation62_spill] sm:$0xff]  ;;  %v7071_v40 = vld [vmem:[#allocation73_spill] sm:$0xff] }
 0x90f   :  { %7058 = vst [vmem:[#allocation27_spill] sm:$0xff] %v5834_v11  ;;  %v7068_v11 = vld [vmem:[#allocation57_spill] sm:$0xff] }
 0x911   :  { %v4129_v22 = vpop.eup %4128 }
 0x912   :  { %v5836_v48 = vmul.f32 %v4129_v22, %v4127_v39  ;;  %v7065_v39 = vld [vmem:[#allocation70_spill] sm:$0xff]  ;;  %v7066_v22 = vld [vmem:[#allocation28_spill] sm:$0xff] }
 0x914   :  { %4132 = vtanh.f32 %v5836_v48 }
 0x919   :  { %v4131_v8 = vpop.eup %4130 }
 0x921   :  { %v4133_v51 = vpop.eup %4132 }
 0x922   :  { %v5839_v41 = vmul.f32 %v4133_v51, %v4131_v8  ;;  %v7061_v51 = vld [vmem:[#allocation68_spill] sm:$0xff]  ;;  %v7067_v8 = vld [vmem:[#allocation55_spill] sm:$0xff] }
 0x924   :  { %7059 = vst [vmem:[#allocation29_spill] sm:$0xff] %v5839_v41  ;;  %2274 = vmatmul.mubr.f32.vlgmr.msra.gmra.mxu0 %v5839_v41  ;;  %2345 = vmatmul.mubr.f32.vlgmr.msra.gmra.mxu1 %v5839_v41  ;;  %v7070_v41 = vld [vmem:[#allocation63_spill] sm:$0xff] }
 0x925   :  { %2385 = vmatpush1.msra.mxu0 %v5553_v49  ;;  %2456 = vmatpush1.msra.mxu1 %v5556_v18 }
 0x926   :  { %2386 = vmatprep.subr.mxu0 %v5559_v59  ;;  %2457 = vmatprep.subr.mxu1 %v5562_v38 }
 0x927   :  { %2387 = vmatpush1.msra.mxu0 %v5565_v58  ;;  %2458 = vmatpush1.msra.mxu1 %v5568_v5 }
 0x928   :  { %2388 = vmatprep.subr.mxu0 %v5571_v6  ;;  %2459 = vmatprep.subr.mxu1 %v5574_v7 }
 0x929   :  { %2389 = vmatpush1.msra.mxu0 %v5577_v9  ;;  %2460 = vmatpush1.msra.mxu1 %v5580_v14 }
 0x92a   :  { %2390 = vmatprep.subr.mxu0 %v5583_v36  ;;  %2461 = vmatprep.subr.mxu1 %v5586_v37 }
 0x92b   :  { %2391 = vmatpush1.msra.mxu0 %v5589_v20  ;;  %2462 = vmatpush1.msra.mxu1 %v5592_v19 }
 0x92c   :  { %2392 = vmatprep.subr.mxu0 %v5595_v27  ;;  %2463 = vmatprep.subr.mxu1 %v5598_v16 }
 0x92d   :  { %2393 = vmatpush1.msra.mxu0 %v5601_v15  ;;  %2464 = vmatpush1.msra.mxu1 %v5604_v13 }
 0x92e   :  { %2394 = vmatprep.subr.mxu0 %v5607_v21  ;;  %2465 = vmatprep.subr.mxu1 %v5610_v23 }
 0x92f   :  { %2395 = vmatpush1.msra.mxu0 %v5613_v25  ;;  %2466 = vmatpush1.msra.mxu1 %v5616_v12 }
 0x930   :  { %2396 = vmatprep.subr.mxu0 %v5619_v24  ;;  %2467 = vmatprep.subr.mxu1 %v5622_v30 }
 0x931   :  { %2397 = vmatpush1.msra.mxu0 %v5625_v10  ;;  %2468 = vmatpush1.msra.mxu1 %v5628_v44 }
 0x932   :  { %2398 = vmatprep.subr.mxu0 %v5631_v54  ;;  %2469 = vmatprep.subr.mxu1 %v5634_v57 }
 0x933   :  { %2399 = vmatpush1.msra.mxu0 %v5637_v2  ;;  %2470 = vmatpush1.msra.mxu1 %v5640_v3 }
 0x934   :  { %2400 = vmatprep.subr.mxu0 %v5643_v4  ;;  %2471 = vmatprep.subr.mxu1 %v5646_v1 }
 0x935   :  { %2401 = vmatpush1.msra.mxu0 %v5649_v63  ;;  %2472 = vmatpush1.msra.mxu1 %v5654_v17 }
 0x936   :  { %2402 = vmatprep.subr.mxu0 %v5652_v52  ;;  %2473 = vmatprep.subr.mxu1 %v5660_v35 }
 0x937   :  { %2403 = vmatpush1.msra.mxu0 %v5658_v55  ;;  %2474 = vmatpush1.msra.mxu1 %v5666_v26 }
 0x938   :  { %2404 = vmatprep.subr.mxu0 %v5662_v53  ;;  %2475 = vmatprep.subr.mxu1 %v5670_v29 }
 0x939   :  { %2405 = vmatpush1.msra.mxu0 %v5668_v28  ;;  %2476 = vmatpush1.msra.mxu1 %v5676_v32 }
 0x93a   :  { %2406 = vmatprep.subr.mxu0 %v5674_v31  ;;  %2477 = vmatprep.subr.mxu1 %v5682_v0 }
 0x93b   :  { %2407 = vmatpush1.msra.mxu0 %v5680_v34  ;;  %2478 = vmatpush1.msra.mxu1 %v7060_v56 }
 0x93c   :  { %2408 = vmatprep.subr.mxu0 %v7061_v51  ;;  %2479 = vmatprep.subr.mxu1 %v7062_v42 }
 0x93d   :  { %2409 = vmatpush1.msra.mxu0 %v7063_v60  ;;  %2480 = vmatpush1.msra.mxu1 %v7064_v62  ;;  %v7074_v60 = vld [vmem:[#allocation30_spill] sm:$0xff]  ;;  %v7075_v62 = vld [vmem:[#allocation31_spill] sm:$0xff] }
 0x93e   :  { %2410 = vmatprep.subr.mxu0 %v7065_v39  ;;  %2481 = vmatprep.subr.mxu1 %v7066_v22  ;;  %v7076_v39 = vmov 0.0   ;;  %v7077_v22 = vld [vmem:[#allocation33_spill] sm:$0xff] }
 0x93f   :  { %2411 = vmatpush1.msra.mxu0 %v7067_v8  ;;  %2482 = vmatpush1.msra.mxu1 %v7068_v11  ;;  %v7078_v11 = vld [vmem:[#allocation48_spill] sm:$0xff] }
 0x940   :  { %2412 = vmatprep.subr.mxu0 %v7069_v61  ;;  %2483 = vmatprep.subr.mxu1 %v7070_v41  ;;  %v7079_v61 = vld [vmem:[#allocation25_spill] sm:$0xff]  ;;  %v5909_v41 = vpop.f32.mrf.mxu0 }
 0x941   :  { %2413 = vmatpush1.msra.mxu0 %v7071_v40  ;;  %2484 = vmatpush1.msra.mxu1 %v7072_v50  ;;  %7080 = vst [vmem:[#allocation67_spill] sm:$0xff] %v5909_v41  ;;  %v7081_v50 = vld [vmem:[#allocation35_spill] sm:$0xff] }
 0x942   :  { %2414 = vmatprep.subr.mxu0 %v7073_v46  ;;  %2485 = vmatprep.subr.mxu1 %v7074_v60  ;;  %v2000_v40 = vadd.f32 %v7081_v50, %v5746_v43  ;;  %v7082_v60 = vld [vmem:[#allocation34_spill] sm:$0xff]  ;;  %v7084_v41 = vld [vmem:[#allocation39_spill] sm:$0xff]  ;;  %v7085_v43 = vld [vmem:[#allocation37_spill] sm:$0xff] }
 0x943   :  { %2415 = vmatpush1.msra.mxu0 %v7075_v62  ;;  %2448 = vmatprep.mubr.f32.mxu0 %v7076_v39  ;;  %v2002_v8 = vadd.f32 %v7082_v60, %v5761_v45  ;;  %v5915_v62 = vpop.f32.mrf.mxu1  ;;  %v2115_v34 = vadd.f32 %v7084_v41, %v5751_v33  ;;  %v2113_v50 = vadd.f32 %v7085_v43, %v5770_v47  ;;  %v7087_v47 = vld [vmem:[#allocation26_spill] sm:$0xff]  ;;  %v7092_v43 = vld [vmem:[#allocation60_spill] sm:$0xff]  ;;  %v7106_v33 = vmov 0.0  }
 0x944   :  { %2486 = vmatpush1.msra.mxu1 %v7077_v22  ;;  %2519 = vmatprep.mubr.f32.mxu1 %v7076_v39  ;;  %7083 = vst [vmem:[#allocation49_spill] sm:$0xff] %v5915_v62 }
 0x945   :  { %2559 = vmatprep.subr.mxu0 %v7078_v11  ;;  %2630 = vmatprep.subr.mxu1 %v7079_v61 }
 0x9e4   :  { %v2275_v46 = vpop.f32.mrf.mxu0  ;;  %v2346_v39 = vpop.f32.mrf.mxu1 }
 0x9e5   :  { %v2351_v42 = vadd.f32 %v2275_v46, %v2000_v40  ;;  %v2353_v31 = vadd.f32 %v2346_v39, %v2113_v50  ;;  %v7090_v39 = vld [vmem:[#allocation69_spill] sm:$0xff] }
 0x9e6   :  { %v2277_v51 = vpop.f32.mrf.mxu0  ;;  %v2348_v61 = vpop.f32.mrf.mxu1  ;;  %v7093_v50 = vld [vmem:[#allocation61_spill] sm:$0xff] }
 0x9e7   :  { %v3845_v22 = vmul.f32 -1.442695, %v2351_v42  ;;  %v2352_v56 = vadd.f32 %v2277_v51, %v2002_v8  ;;  %v2354_v0 = vadd.f32 %v2348_v61, %v2115_v34  ;;  %v7091_v8 = vld [vmem:[#allocation68_spill] sm:$0xff] }
 0x9e9   :  { %4134 = vpow2.f32 %v3845_v22  ;;  %v3846_v11 = vmul.f32 -1.442695, %v2352_v56  ;;  %v3847_v60 = vmul.f32 -1.442695, %v2354_v0 }
 0x9eb   :  { %4136 = vpow2.f32 %v3846_v11 }
 0x9ec   :  { %4138 = vtanh.f32 %v2353_v31 }
 0x9ed   :  { %4140 = vpow2.f32 %v3847_v60  ;;  %v7094_v60 = vld [vmem:[#allocation71_spill] sm:$0xff] }
 0x9f6   :  { %v4135_v45 = vpop.eup %4134 }
 0x9f7   :  { %v2358_v62 = vadd.f32 1.0, %v4135_v45 }
 0x9f8   :  { %v4137_v46 = vpop.eup %4136 }
 0x9f9   :  { %4142 = vrcp.f32 %v2358_v62  ;;  %v2364_v40 = vadd.f32 1.0, %v4137_v46  ;;  %v4139_v56 = vpop.eup %4138  ;;  %v7089_v62 = vld [vmem:[#allocation58_spill] sm:$0xff] }
 0x9fa   :  { %v4141_v11 = vpop.eup %4140  ;;  %v7095_v46 = vld [vmem:[#allocation70_spill] sm:$0xff] }
 0x9fb   :  { %4144 = vrcp.f32 %v2364_v40  ;;  %v2371_v41 = vadd.f32 1.0, %v4141_v11  ;;  %v7096_v40 = vld [vmem:[#allocation28_spill] sm:$0xff]  ;;  %v7098_v11 = vld [vmem:[#allocation57_spill] sm:$0xff] }
 0x9fd   :  { %4146 = vrcp.f32 %v2371_v41  ;;  %v7102_v41 = vld [vmem:[#allocation72_spill] sm:$0xff] }
 0xa06   :  { %v4143_v51 = vpop.eup %4142 }
 0xa07   :  { %v2375_v42 = vmul.f32 %v4143_v51, %v4139_v56  ;;  %v7097_v56 = vld [vmem:[#allocation55_spill] sm:$0xff]  ;;  %v7099_v51 = vld [vmem:[#allocation62_spill] sm:$0xff] }
 0xa08   :  { %v4145_v22 = vpop.eup %4144 }
 0xa09   :  { %v2374_v34 = vmul.f32 %v4145_v22, %v5836_v48  ;;  %v7088_v48 = vld [vmem:[#allocation59_spill] sm:$0xff]  ;;  %v7101_v22 = vld [vmem:[#allocation73_spill] sm:$0xff] }
 0xa0a   :  { %v4147_v0 = vpop.eup %4146 }
 0xa0b   :  { %v5922_v61 = vadd.f32 %v2375_v42, %v2374_v34  ;;  %v7100_v42 = vld [vmem:[#allocation63_spill] sm:$0xff]  ;;  %v7103_v34 = vld [vmem:[#allocation66_spill] sm:$0xff] }
 0xa0d   :  { %4148 = vtanh.f32 %v5922_v61 }
 0xa1a   :  { %v4149_v31 = vpop.eup %4148 }
 0xa1b   :  { %v5925_v45 = vmul.f32 %v4149_v31, %v4147_v0  ;;  %v7104_v0 = vld [vmem:[#allocation30_spill] sm:$0xff]  ;;  %v7105_v31 = vld [vmem:[#allocation31_spill] sm:$0xff] }
 0xa1d   :  { %7086 = vst [vmem:[#allocation35_spill] sm:$0xff] %v5925_v45  ;;  %2449 = vmatmul.mubr.f32.vlgmr.msra.gmra.mxu0 %v5925_v45  ;;  %2520 = vmatmul.mubr.f32.vlgmr.msra.gmra.mxu1 %v5925_v45  ;;  %v7107_v45 = vld [vmem:[#allocation33_spill] sm:$0xff] }
 0xa1e   :  { %2560 = vmatpush1.msra.mxu0 %v5553_v49  ;;  %2631 = vmatpush1.msra.mxu1 %v5556_v18 }
 0xa1f   :  { %2561 = vmatprep.subr.mxu0 %v5559_v59  ;;  %2632 = vmatprep.subr.mxu1 %v5562_v38 }
 0xa20   :  { %2562 = vmatpush1.msra.mxu0 %v5565_v58  ;;  %2633 = vmatpush1.msra.mxu1 %v5568_v5 }
 0xa21   :  { %2563 = vmatprep.subr.mxu0 %v5571_v6  ;;  %2634 = vmatprep.subr.mxu1 %v5574_v7 }
 0xa22   :  { %2564 = vmatpush1.msra.mxu0 %v5577_v9  ;;  %2635 = vmatpush1.msra.mxu1 %v5580_v14 }
 0xa23   :  { %2565 = vmatprep.subr.mxu0 %v5583_v36  ;;  %2636 = vmatprep.subr.mxu1 %v5586_v37 }
 0xa24   :  { %2566 = vmatpush1.msra.mxu0 %v5589_v20  ;;  %2637 = vmatpush1.msra.mxu1 %v5592_v19 }
 0xa25   :  { %2567 = vmatprep.subr.mxu0 %v5595_v27  ;;  %2638 = vmatprep.subr.mxu1 %v5598_v16 }
 0xa26   :  { %2568 = vmatpush1.msra.mxu0 %v5601_v15  ;;  %2639 = vmatpush1.msra.mxu1 %v5604_v13 }
 0xa27   :  { %2569 = vmatprep.subr.mxu0 %v5607_v21  ;;  %2640 = vmatprep.subr.mxu1 %v5610_v23 }
 0xa28   :  { %2570 = vmatpush1.msra.mxu0 %v5613_v25  ;;  %2641 = vmatpush1.msra.mxu1 %v5616_v12 }
 0xa29   :  { %2571 = vmatprep.subr.mxu0 %v5619_v24  ;;  %2642 = vmatprep.subr.mxu1 %v5622_v30 }
 0xa2a   :  { %2572 = vmatpush1.msra.mxu0 %v5625_v10  ;;  %2643 = vmatpush1.msra.mxu1 %v5628_v44 }
 0xa2b   :  { %2573 = vmatprep.subr.mxu0 %v5631_v54  ;;  %2644 = vmatprep.subr.mxu1 %v5634_v57 }
 0xa2c   :  { %2574 = vmatpush1.msra.mxu0 %v5637_v2  ;;  %2645 = vmatpush1.msra.mxu1 %v5640_v3 }
 0xa2d   :  { %2575 = vmatprep.subr.mxu0 %v5643_v4  ;;  %2646 = vmatprep.subr.mxu1 %v5646_v1 }
 0xa2e   :  { %2576 = vmatpush1.msra.mxu0 %v5649_v63  ;;  %2647 = vmatpush1.msra.mxu1 %v5654_v17 }
 0xa2f   :  { %2577 = vmatprep.subr.mxu0 %v5652_v52  ;;  %2648 = vmatprep.subr.mxu1 %v5660_v35 }
 0xa30   :  { %2578 = vmatpush1.msra.mxu0 %v5658_v55  ;;  %2649 = vmatpush1.msra.mxu1 %v5666_v26 }
 0xa31   :  { %2579 = vmatprep.subr.mxu0 %v5662_v53  ;;  %2650 = vmatprep.subr.mxu1 %v5670_v29 }
 0xa32   :  { %2580 = vmatpush1.msra.mxu0 %v5668_v28  ;;  %2651 = vmatpush1.msra.mxu1 %v5676_v32 }
 0xa33   :  { %2581 = vmatprep.subr.mxu0 %v7087_v47  ;;  %2652 = vmatprep.subr.mxu1 %v7088_v48 }
 0xa34   :  { %2582 = vmatpush1.msra.mxu0 %v7089_v62  ;;  %2653 = vmatpush1.msra.mxu1 %v7090_v39 }
 0xa35   :  { %2583 = vmatprep.subr.mxu0 %v7091_v8  ;;  %2654 = vmatprep.subr.mxu1 %v7092_v43  ;;  %v7113_v43 = vld [vmem:[#allocation40_spill] sm:$0xff] }
 0xa36   :  { %2584 = vmatpush1.msra.mxu0 %v7093_v50  ;;  %2655 = vmatpush1.msra.mxu1 %v7094_v60  ;;  %v7112_v50 = vld [vmem:[#allocation42_spill] sm:$0xff] }
 0xa37   :  { %2585 = vmatprep.subr.mxu0 %v7095_v46  ;;  %2656 = vmatprep.subr.mxu1 %v7096_v40 }
 0xa38   :  { %2586 = vmatpush1.msra.mxu0 %v7097_v56  ;;  %2657 = vmatpush1.msra.mxu1 %v7098_v11  ;;  %v7108_v11 = vld [vmem:[#allocation48_spill] sm:$0xff] }
 0xa39   :  { %2587 = vmatprep.subr.mxu0 %v7099_v51  ;;  %2658 = vmatprep.subr.mxu1 %v7100_v42  ;;  %v7109_v51 = vld [vmem:[#allocation25_spill] sm:$0xff] }
 0xa3a   :  { %2588 = vmatpush1.msra.mxu0 %v7101_v22  ;;  %2659 = vmatpush1.msra.mxu1 %v7102_v41  ;;  %v7110_v22 = vld [vmem:[#allocation38_spill] sm:$0xff] }
 0xa3b   :  { %2589 = vmatprep.subr.mxu0 %v7103_v34  ;;  %2660 = vmatprep.subr.mxu1 %v7104_v0  ;;  %v7111_v34 = vld [vmem:[#allocation41_spill] sm:$0xff] }
 0xa3c   :  { %2590 = vmatpush1.msra.mxu0 %v7105_v31  ;;  %2623 = vmatprep.mubr.f32.mxu0 %v7106_v33 }
 0xa3d   :  { %2661 = vmatpush1.msra.mxu1 %v7107_v45  ;;  %2694 = vmatprep.mubr.f32.mxu1 %v7106_v33 }
 0xa3e   :  { %2734 = vmatprep.subr.mxu0 %v7108_v11  ;;  %2805 = vmatprep.subr.mxu1 %v7109_v51 }
 0xadd   :  { %v2450_v42 = vpop.f32.mrf.mxu0  ;;  %v2521_v0 = vpop.f32.mrf.mxu1 }
 0xade   :  { %v2526_v56 = vadd.f32 %v2450_v42, %v7110_v22  ;;  %v2528_v33 = vadd.f32 %v2521_v0, %v7113_v43  ;;  %v7129_v0 = vld [vmem:[#allocation30_spill] sm:$0xff] }
 0xadf   :  { %v2452_v41 = vpop.f32.mrf.mxu0  ;;  %v2523_v60 = vpop.f32.mrf.mxu1 }
 0xae0   :  { %v3848_v40 = vmul.f32 -1.442695, %v2526_v56  ;;  %v2527_v46 = vadd.f32 %v2452_v41, %v7111_v34  ;;  %v2529_v45 = vadd.f32 %v2523_v60, %v7112_v50  ;;  %v7126_v60 = vld [vmem:[#allocation73_spill] sm:$0xff] }
 0xae2   :  { %4150 = vpow2.f32 %v3848_v40  ;;  %v3849_v31 = vmul.f32 -1.442695, %v2527_v46  ;;  %v3850_v8 = vmul.f32 -1.442695, %v2529_v45 }
 0xae4   :  { %4152 = vpow2.f32 %v3849_v31 }
 0xae5   :  { %4154 = vtanh.f32 %v2528_v33 }
 0xae6   :  { %4156 = vpow2.f32 %v3850_v8  ;;  %v7125_v8 = vld [vmem:[#allocation63_spill] sm:$0xff] }
 0xaef   :  { %v4151_v11 = vpop.eup %4150 }
 0xaf0   :  { %v2533_v39 = vadd.f32 1.0, %v4151_v11  ;;  %v7127_v11 = vld [vmem:[#allocation72_spill] sm:$0xff] }
 0xaf1   :  { %v4153_v51 = vpop.eup %4152 }
 0xaf2   :  { %4158 = vrcp.f32 %v2533_v39  ;;  %v2539_v42 = vadd.f32 1.0, %v4153_v51  ;;  %v4155_v56 = vpop.eup %4154  ;;  %v7124_v39 = vld [vmem:[#allocation62_spill] sm:$0xff] }
 0xaf3   :  { %v4157_v22 = vpop.eup %4156  ;;  %v7128_v51 = vld [vmem:[#allocation66_spill] sm:$0xff] }
 0xaf4   :  { %4160 = vrcp.f32 %v2539_v42  ;;  %v2546_v34 = vadd.f32 1.0, %v4157_v22  ;;  %v7130_v42 = vld [vmem:[#allocation31_spill] sm:$0xff]  ;;  %v7132_v22 = vld [vmem:[#allocation33_spill] sm:$0xff] }
 0xaf6   :  { %4162 = vrcp.f32 %v2546_v34  ;;  %v7135_v34 = vld [vmem:[#allocation43_spill] sm:$0xff] }
 0xaff   :  { %v4159_v40 = vpop.eup %4158 }
 0xb00   :  { %v2550_v41 = vmul.f32 %v4159_v40, %v4155_v56  ;;  %v7131_v56 = vmov 0.0   ;;  %v7133_v40 = vld [vmem:[#allocation48_spill] sm:$0xff] }
 0xb01   :  { %v4161_v46 = vpop.eup %4160 }
 0xb02   :  { %v2549_v31 = vmul.f32 %v4161_v46, %v5922_v61  ;;  %v7123_v61 = vld [vmem:[#allocation57_spill] sm:$0xff] }
 0xb03   :  { %v4163_v45 = vpop.eup %4162 }
 0xb04   :  { %v6000_v50 = vadd.f32 %v2550_v41, %v2549_v31  ;;  %v7134_v41 = vld [vmem:[#allocation25_spill] sm:$0xff] }
 0xb06   :  { %4164 = vtanh.f32 %v6000_v50 }
 0xb13   :  { %v4165_v33 = vpop.eup %4164 }
 0xb14   :  { %v6003_v43 = vmul.f32 %v4165_v33, %v4163_v45 }
 0xb16   :  { %7114 = vst [vmem:[#allocation34_spill] sm:$0xff] %v6003_v43  ;;  %2624 = vmatmul.mubr.f32.vlgmr.msra.gmra.mxu0 %v6003_v43  ;;  %2695 = vmatmul.mubr.f32.vlgmr.msra.gmra.mxu1 %v6003_v43  ;;  %v7136_v43 = vld [vmem:[#allocation45_spill] sm:$0xff] }
 0xb17   :  { %2735 = vmatpush1.msra.mxu0 %v5553_v49  ;;  %2806 = vmatpush1.msra.mxu1 %v5556_v18  ;;  %v7115_v49 = vld [vmem:[#allocation69_spill] sm:$0xff]  ;;  %v7116_v18 = vld [vmem:[#allocation68_spill] sm:$0xff] }
 0xb18   :  { %2736 = vmatprep.subr.mxu0 %v5559_v59  ;;  %2807 = vmatprep.subr.mxu1 %v5562_v38  ;;  %v7117_v59 = vld [vmem:[#allocation60_spill] sm:$0xff]  ;;  %v7118_v38 = vld [vmem:[#allocation61_spill] sm:$0xff] }
 0xb19   :  { %2737 = vmatpush1.msra.mxu0 %v5565_v58  ;;  %2808 = vmatpush1.msra.mxu1 %v5568_v5  ;;  %v7119_v58 = vld [vmem:[#allocation71_spill] sm:$0xff]  ;;  %v7120_v5 = vld [vmem:[#allocation70_spill] sm:$0xff] }
 0xb1a   :  { %2738 = vmatprep.subr.mxu0 %v5571_v6  ;;  %2809 = vmatprep.subr.mxu1 %v5574_v7  ;;  %v7121_v6 = vld [vmem:[#allocation28_spill] sm:$0xff]  ;;  %v7122_v7 = vld [vmem:[#allocation55_spill] sm:$0xff] }
 0xb1b   :  { %2739 = vmatpush1.msra.mxu0 %v5577_v9  ;;  %2810 = vmatpush1.msra.mxu1 %v5580_v14 }
 0xb1c   :  { %2740 = vmatprep.subr.mxu0 %v5583_v36  ;;  %2811 = vmatprep.subr.mxu1 %v5586_v37 }
 0xb1d   :  { %2741 = vmatpush1.msra.mxu0 %v5589_v20  ;;  %2812 = vmatpush1.msra.mxu1 %v5592_v19 }
 0xb1e   :  { %2742 = vmatprep.subr.mxu0 %v5595_v27  ;;  %2813 = vmatprep.subr.mxu1 %v5598_v16 }
 0xb1f   :  { %2743 = vmatpush1.msra.mxu0 %v5601_v15  ;;  %2814 = vmatpush1.msra.mxu1 %v5604_v13 }
 0xb20   :  { %2744 = vmatprep.subr.mxu0 %v5607_v21  ;;  %2815 = vmatprep.subr.mxu1 %v5610_v23 }
 0xb21   :  { %2745 = vmatpush1.msra.mxu0 %v5613_v25  ;;  %2816 = vmatpush1.msra.mxu1 %v5616_v12 }
 0xb22   :  { %2746 = vmatprep.subr.mxu0 %v5619_v24  ;;  %2817 = vmatprep.subr.mxu1 %v5622_v30 }
 0xb23   :  { %2747 = vmatpush1.msra.mxu0 %v5625_v10  ;;  %2818 = vmatpush1.msra.mxu1 %v5628_v44 }
 0xb24   :  { %2748 = vmatprep.subr.mxu0 %v5631_v54  ;;  %2819 = vmatprep.subr.mxu1 %v5634_v57 }
 0xb25   :  { %2749 = vmatpush1.msra.mxu0 %v5637_v2  ;;  %2820 = vmatpush1.msra.mxu1 %v5640_v3 }
 0xb26   :  { %2750 = vmatprep.subr.mxu0 %v5643_v4  ;;  %2821 = vmatprep.subr.mxu1 %v5646_v1 }
 0xb27   :  { %2751 = vmatpush1.msra.mxu0 %v5649_v63  ;;  %2822 = vmatpush1.msra.mxu1 %v5654_v17 }
 0xb28   :  { %2752 = vmatprep.subr.mxu0 %v5652_v52  ;;  %2823 = vmatprep.subr.mxu1 %v5660_v35 }
 0xb29   :  { %2753 = vmatpush1.msra.mxu0 %v5658_v55  ;;  %2824 = vmatpush1.msra.mxu1 %v5666_v26 }
 0xb2a   :  { %2754 = vmatprep.subr.mxu0 %v5662_v53  ;;  %2825 = vmatprep.subr.mxu1 %v5670_v29 }
 0xb2b   :  { %2755 = vmatpush1.msra.mxu0 %v5668_v28  ;;  %2826 = vmatpush1.msra.mxu1 %v5676_v32 }
 0xb2c   :  { %2756 = vmatprep.subr.mxu0 %v7087_v47  ;;  %2827 = vmatprep.subr.mxu1 %v7088_v48 }
 0xb2d   :  { %2757 = vmatpush1.msra.mxu0 %v7089_v62  ;;  %2828 = vmatpush1.msra.mxu1 %v7115_v49 }
 0xb2e   :  { %2758 = vmatprep.subr.mxu0 %v7116_v18  ;;  %2829 = vmatprep.subr.mxu1 %v7117_v59 }
 0xb2f   :  { %2759 = vmatpush1.msra.mxu0 %v7118_v38  ;;  %2830 = vmatpush1.msra.mxu1 %v7119_v58 }
 0xb30   :  { %2760 = vmatprep.subr.mxu0 %v7120_v5  ;;  %2831 = vmatprep.subr.mxu1 %v7121_v6 }
 0xb31   :  { %2761 = vmatpush1.msra.mxu0 %v7122_v7  ;;  %2832 = vmatpush1.msra.mxu1 %v7123_v61 }
 0xb32   :  { %2762 = vmatprep.subr.mxu0 %v7124_v39  ;;  %2833 = vmatprep.subr.mxu1 %v7125_v8  ;;  %v7138_v8 = vld [vmem:[#allocation44_spill] sm:$0xff] }
 0xb33   :  { %2763 = vmatpush1.msra.mxu0 %v7126_v60  ;;  %2834 = vmatpush1.msra.mxu1 %v7127_v11  ;;  %v7137_v60 = vld [vmem:[#allocation46_spill] sm:$0xff] }
 0xb34   :  { %2764 = vmatprep.subr.mxu0 %v7128_v51  ;;  %2835 = vmatprep.subr.mxu1 %v7129_v0 }
 0xb35   :  { %2765 = vmatpush1.msra.mxu0 %v7130_v42  ;;  %2798 = vmatprep.mubr.f32.mxu0 %v7131_v56 }
 0xb36   :  { %2836 = vmatpush1.msra.mxu1 %v7132_v22  ;;  %2869 = vmatprep.mubr.f32.mxu1 %v7131_v56 }
 0xb37   :  { %2909 = vmatprep.subr.mxu0 %v7133_v40  ;;  %2980 = vmatprep.subr.mxu1 %v7134_v41 }
 0xbd6   :  { %v2625_v46 = vpop.f32.mrf.mxu0  ;;  %v2696_v0 = vpop.f32.mrf.mxu1 }
 0xbd7   :  { %v2701_v31 = vadd.f32 %v2625_v46, %v7135_v34  ;;  %v2703_v56 = vadd.f32 %v2696_v0, %v7138_v8 }
 0xbd8   :  { %v2627_v45 = vpop.f32.mrf.mxu0  ;;  %v2698_v11 = vpop.f32.mrf.mxu1 }
 0xbd9   :  { %v3851_v33 = vmul.f32 -1.442695, %v2701_v31  ;;  %v2702_v51 = vadd.f32 %v2627_v45, %v7136_v43  ;;  %v2704_v22 = vadd.f32 %v2698_v11, %v7137_v60 }
 0xbdb   :  { %4166 = vpow2.f32 %v3851_v33  ;;  %v3852_v42 = vmul.f32 -1.442695, %v2702_v51  ;;  %v3853_v39 = vmul.f32 -1.442695, %v2704_v22  ;;  %v6097_v22 = vld [vmem:[#allocation3 + $0x1c0] sm:$0xff] }
 0xbdd   :  { %4168 = vpow2.f32 %v3852_v42 }
 0xbde   :  { %4170 = vtanh.f32 %v2703_v56  ;;  %v6094_v56 = vld [vmem:[#allocation3 + $0x1d8] sm:$0xff] }
 0xbdf   :  { %4172 = vpow2.f32 %v3853_v39  ;;  %v6088_v39 = vld [vmem:[#allocation3 + $0x1f0] sm:$0xff] }
 0xbe8   :  { %v4167_v40 = vpop.eup %4166 }
 0xbe9   :  { %v2708_v61 = vadd.f32 1.0, %v4167_v40  ;;  %v6100_v40 = vld [vmem:[#allocation3 + $0x1d0] sm:$0xff] }
 0xbea   :  { %v4169_v41 = vpop.eup %4168 }
 0xbeb   :  { %4174 = vrcp.f32 %v2708_v61  ;;  %v2714_v46 = vadd.f32 1.0, %v4169_v41  ;;  %v4171_v34 = vpop.eup %4170  ;;  %v6085_v61 = vld [vmem:[#allocation3 + $0x1e0] sm:$0xff]  ;;  %v6103_v41 = vld [vmem:[#allocation3 + $0x1a8] sm:$0xff] }
 0xbec   :  { %v4173_v43 = vpop.eup %4172 }
 0xbed   :  { %4176 = vrcp.f32 %v2714_v46  ;;  %v2721_v42 = vadd.f32 1.0, %v4173_v43  ;;  %v6106_v46 = vld [vmem:[#allocation3 + $0x1b8] sm:$0xff]  ;;  %v6203_v43 = vld [vmem:[#allocation3 + $0x180] sm:$0xff] }
 0xbef   :  { %4178 = vrcp.f32 %v2721_v42  ;;  %v6215_v42 = vld [vmem:[#allocation3 + $0x160] sm:$0xff] }
 0xbf8   :  { %v4175_v31 = vpop.eup %4174 }
 0xbf9   :  { %v2725_v45 = vmul.f32 %v4175_v31, %v4171_v34  ;;  %v6200_v34 = vld [vmem:[#allocation3 + $0x198] sm:$0xff]  ;;  %v6206_v31 = vld [vmem:[#allocation3 + $0x190] sm:$0xff] }
 0xbfa   :  { %v4177_v51 = vpop.eup %4176 }
 0xbfb   :  { %v2724_v33 = vmul.f32 %v4177_v51, %v6000_v50  ;;  %v6091_v50 = vld [vmem:[#allocation3 + $0x1c8] sm:$0xff]  ;;  %v6212_v51 = vld [vmem:[#allocation3 + $0x178] sm:$0xff] }
 0xbfc   :  { %v4179_v8 = vpop.eup %4178 }
 0xbfd   :  { %v6078_v60 = vadd.f32 %v2725_v45, %v2724_v33  ;;  %v6209_v45 = vld [vmem:[#allocation3 + $0x168] sm:$0xff]  ;;  %v6218_v33 = vld [vmem:[#allocation3 + $0x170] sm:$0xff] }
 0xbff   :  { %4180 = vtanh.f32 %v6078_v60 }
 0xc0c   :  { %v4181_v11 = vpop.eup %4180 }
 0xc0d   :  { %v6081_v0 = vmul.f32 %v4181_v11, %v4179_v8  ;;  %v6224_v8 = vld [vmem:[#allocation3 + $0x158] sm:$0xff]  ;;  %v6227_v11 = vld [vmem:[#allocation3 + $0x140] sm:$0xff] }
 0xc0f   :  { %7139 = vst [vmem:[#allocation39_spill] sm:$0xff] %v6081_v0  ;;  %2799 = vmatmul.mubr.f32.vlgmr.msra.gmra.mxu0 %v6081_v0  ;;  %2870 = vmatmul.mubr.f32.vlgmr.msra.gmra.mxu1 %v6081_v0  ;;  %v6344_v0 = vld [vmem:[#allocation3 + $0x18] sm:$0xff] }
 0xc10   :  { %2910 = vmatpush1.msra.mxu0 %v6085_v61  ;;  %2981 = vmatpush1.msra.mxu1 %v6088_v39  ;;  %7169 = vst [vmem:[#allocation55_spill] sm:$0xff] %v6344_v0 }
 0xc11   :  { %2911 = vmatprep.subr.mxu0 %v6091_v50  ;;  %2982 = vmatprep.subr.mxu1 %v6094_v56 }
 0xc12   :  { %2912 = vmatpush1.msra.mxu0 %v6097_v22  ;;  %2983 = vmatpush1.msra.mxu1 %v6100_v40 }
 0xc13   :  { %2913 = vmatprep.subr.mxu0 %v6103_v41  ;;  %2984 = vmatprep.subr.mxu1 %v6106_v46 }
 0xc14   :  { %2914 = vmatpush1.msra.mxu0 %v5577_v9  ;;  %2985 = vmatpush1.msra.mxu1 %v5580_v14  ;;  %v7140_v9 = vld [vmem:[#allocation57_spill] sm:$0xff]  ;;  %v7141_v14 = vld [vmem:[#allocation62_spill] sm:$0xff] }
 0xc15   :  { %2915 = vmatprep.subr.mxu0 %v5583_v36  ;;  %2986 = vmatprep.subr.mxu1 %v5586_v37  ;;  %v7142_v36 = vld [vmem:[#allocation63_spill] sm:$0xff]  ;;  %v7143_v37 = vld [vmem:[#allocation73_spill] sm:$0xff] }
 0xc16   :  { %2916 = vmatpush1.msra.mxu0 %v5589_v20  ;;  %2987 = vmatpush1.msra.mxu1 %v5592_v19  ;;  %v7144_v20 = vld [vmem:[#allocation72_spill] sm:$0xff]  ;;  %v7145_v19 = vld [vmem:[#allocation66_spill] sm:$0xff] }
 0xc17   :  { %2917 = vmatprep.subr.mxu0 %v5595_v27  ;;  %2988 = vmatprep.subr.mxu1 %v5598_v16  ;;  %v7146_v27 = vld [vmem:[#allocation30_spill] sm:$0xff]  ;;  %v7147_v16 = vld [vmem:[#allocation31_spill] sm:$0xff] }
 0xc18   :  { %2918 = vmatpush1.msra.mxu0 %v5601_v15  ;;  %2989 = vmatpush1.msra.mxu1 %v5604_v13  ;;  %v7148_v15 = vmov 0.0   ;;  %v7149_v13 = vld [vmem:[#allocation33_spill] sm:$0xff] }
 0xc19   :  { %2919 = vmatprep.subr.mxu0 %v5607_v21  ;;  %2990 = vmatprep.subr.mxu1 %v5610_v23  ;;  %v6165_v21 = vld [vmem:[#allocation3 + $0x1e8] sm:$0xff]  ;;  %v6168_v23 = vld [vmem:[#allocation3 + $0x1f8] sm:$0xff] }
 0xc1a   :  { %2920 = vmatpush1.msra.mxu0 %v5613_v25  ;;  %2991 = vmatpush1.msra.mxu1 %v5616_v12  ;;  %v7150_v12 = vld [vmem:[#allocation47_spill] sm:$0xff] }
 0xc1b   :  { %2921 = vmatprep.subr.mxu0 %v5619_v24  ;;  %2992 = vmatprep.subr.mxu1 %v5622_v30 }
 0xc1c   :  { %2922 = vmatpush1.msra.mxu0 %v5625_v10  ;;  %2993 = vmatpush1.msra.mxu1 %v5628_v44  ;;  %v7151_v44 = vld [vmem:[#allocation51_spill] sm:$0xff] }
 0xc1d   :  { %2923 = vmatprep.subr.mxu0 %v5631_v54  ;;  %2994 = vmatprep.subr.mxu1 %v5634_v57 }
 0xc1e   :  { %2924 = vmatpush1.msra.mxu0 %v5637_v2  ;;  %2995 = vmatpush1.msra.mxu1 %v5640_v3 }
 0xc1f   :  { %2925 = vmatprep.subr.mxu0 %v5643_v4  ;;  %2996 = vmatprep.subr.mxu1 %v5646_v1  ;;  %v7152_v4 = vld [vmem:[#allocation75_spill] sm:$0xff] }
 0xc20   :  { %2926 = vmatpush1.msra.mxu0 %v5649_v63  ;;  %2997 = vmatpush1.msra.mxu1 %v5654_v17  ;;  %v7153_v63 = vld [vmem:[#allocation64_spill] sm:$0xff] }
 0xc21   :  { %2927 = vmatprep.subr.mxu0 %v5652_v52  ;;  %2998 = vmatprep.subr.mxu1 %v5660_v35 }
 0xc22   :  { %2928 = vmatpush1.msra.mxu0 %v5658_v55  ;;  %2999 = vmatpush1.msra.mxu1 %v5666_v26 }
 0xc23   :  { %2929 = vmatprep.subr.mxu0 %v5662_v53  ;;  %3000 = vmatprep.subr.mxu1 %v5670_v29 }
 0xc24   :  { %2930 = vmatpush1.msra.mxu0 %v5668_v28  ;;  %3001 = vmatpush1.msra.mxu1 %v5676_v32 }
 0xc25   :  { %2931 = vmatprep.subr.mxu0 %v7087_v47  ;;  %3002 = vmatprep.subr.mxu1 %v7088_v48 }
 0xc26   :  { %2932 = vmatpush1.msra.mxu0 %v7089_v62  ;;  %3003 = vmatpush1.msra.mxu1 %v7115_v49 }
 0xc27   :  { %2933 = vmatprep.subr.mxu0 %v7116_v18  ;;  %3004 = vmatprep.subr.mxu1 %v7117_v59 }
 0xc28   :  { %2934 = vmatpush1.msra.mxu0 %v7118_v38  ;;  %3005 = vmatpush1.msra.mxu1 %v7119_v58 }
 0xc29   :  { %2935 = vmatprep.subr.mxu0 %v7120_v5  ;;  %3006 = vmatprep.subr.mxu1 %v7121_v6  ;;  %v6191_v5 = vld [vmem:[#allocation3 + $0x1a0] sm:$0xff]  ;;  %v6194_v6 = vld [vmem:[#allocation3 + $0x1b0] sm:$0xff] }
 0xc2a   :  { %2936 = vmatpush1.msra.mxu0 %v7122_v7  ;;  %3007 = vmatpush1.msra.mxu1 %v7140_v9  ;;  %v6197_v7 = vld [vmem:[#allocation3 + $0x188] sm:$0xff]  ;;  %v6230_v9 = vld [vmem:[#allocation3 + $0x150] sm:$0xff] }
 0xc2b   :  { %2937 = vmatprep.subr.mxu0 %v7141_v14  ;;  %3008 = vmatprep.subr.mxu1 %v7142_v36  ;;  %v6233_v14 = vld [vmem:[#allocation3 + $0x128] sm:$0xff]  ;;  %v6236_v36 = vld [vmem:[#allocation3 + $0x138] sm:$0xff] }
 0xc2c   :  { %2938 = vmatpush1.msra.mxu0 %v7143_v37  ;;  %3009 = vmatpush1.msra.mxu1 %v7144_v20  ;;  %v6239_v37 = vld [vmem:[#allocation3 + $0x120] sm:$0xff]  ;;  %v6242_v20 = vld [vmem:[#allocation3 + $0x130] sm:$0xff] }
 0xc2d   :  { %2939 = vmatprep.subr.mxu0 %v7145_v19  ;;  %3010 = vmatprep.subr.mxu1 %v7146_v27  ;;  %v6245_v19 = vld [vmem:[#allocation3 + $0x108] sm:$0xff]  ;;  %v6248_v27 = vld [vmem:[#allocation3 + $0x118] sm:$0xff] }
 0xc2e   :  { %2940 = vmatpush1.msra.mxu0 %v7147_v16  ;;  %2973 = vmatprep.mubr.f32.mxu0 %v7148_v15  ;;  %v6251_v16 = vld [vmem:[#allocation3 + $0x100] sm:$0xff] }
 0xc2f   :  { %3011 = vmatpush1.msra.mxu1 %v7149_v13  ;;  %3044 = vmatprep.mubr.f32.mxu1 %v7148_v15  ;;  %v6254_v13 = vld [vmem:[#allocation3 + $0x110] sm:$0xff] }
 0xc30   :  { %3084 = vmatprep.subr.mxu0 %v6165_v21  ;;  %3155 = vmatprep.subr.mxu1 %v6168_v23 }
 0xccf   :  { %v2800_v25 = vpop.f32.mrf.mxu0  ;;  %v2871_v57 = vpop.f32.mrf.mxu1 }
 0xcd0   :  { %v2876_v24 = vadd.f32 %v2800_v25, %v7150_v12  ;;  %v2878_v52 = vadd.f32 %v2871_v57, %v7153_v63  ;;  %v6257_v25 = vld [vmem:[#allocation3 + $0xe8] sm:$0xff]  ;;  %v6260_v12 = vld [vmem:[#allocation3 + $0xf8] sm:$0xff]  ;;  %v6278_v57 = vld [vmem:[#allocation3 + $0xd0] sm:$0xff] }
 0xcd1   :  { %v2802_v30 = vpop.f32.mrf.mxu0  ;;  %v2873_v3 = vpop.f32.mrf.mxu1  ;;  %v6293_v63 = vld [vmem:[#allocation3 + $0x88] sm:$0xff] }
 0xcd2   :  { %v3854_v10 = vmul.f32 -1.442695, %v2876_v24  ;;  %v2877_v54 = vadd.f32 %v2802_v30, %v7151_v44  ;;  %v2879_v1 = vadd.f32 %v2873_v3, %v7152_v4  ;;  %v6263_v24 = vld [vmem:[#allocation3 + $0xe0] sm:$0xff]  ;;  %v6266_v30 = vld [vmem:[#allocation3 + $0xf0] sm:$0xff]  ;;  %v6272_v44 = vld [vmem:[#allocation3 + $0xd8] sm:$0xff] }
 0xcd3   :  { %v6284_v3 = vld [vmem:[#allocation3 + $0xb8] sm:$0xff]  ;;  %v6287_v4 = vld [vmem:[#allocation3 + $0xa0] sm:$0xff] }
 0xcd4   :  { %4182 = vpow2.f32 %v3854_v10  ;;  %v3855_v2 = vmul.f32 -1.442695, %v2877_v54  ;;  %v3856_v17 = vmul.f32 -1.442695, %v2879_v1  ;;  %v6269_v10 = vld [vmem:[#allocation3 + $0xc8] sm:$0xff]  ;;  %v6275_v54 = vld [vmem:[#allocation3 + $0xc0] sm:$0xff] }
 0xcd5   :  { %v6290_v1 = vld [vmem:[#allocation3 + $0xb0] sm:$0xff] }
 0xcd6   :  { %4184 = vpow2.f32 %v3855_v2  ;;  %v6281_v2 = vld [vmem:[#allocation3 + $0xa8] sm:$0xff] }
 0xcd7   :  { %4186 = vtanh.f32 %v2878_v52  ;;  %v6296_v52 = vld [vmem:[#allocation3 + $0x98] sm:$0xff] }
 0xcd8   :  { %4188 = vpow2.f32 %v3856_v17  ;;  %v6299_v17 = vld [vmem:[#allocation3 + $0x80] sm:$0xff] }
 0xce1   :  { %v4183_v55 = vpop.eup %4182 }
 0xce2   :  { %v2883_v35 = vadd.f32 1.0, %v4183_v55  ;;  %v6302_v55 = vld [vmem:[#allocation3 + $0x90] sm:$0xff] }
 0xce3   :  { %v4185_v53 = vpop.eup %4184  ;;  %7155 = vst [vmem:[#allocation26_spill] sm:$0xff] %v6302_v55 }
 0xce4   :  { %4190 = vrcp.f32 %v2883_v35  ;;  %v2889_v26 = vadd.f32 1.0, %v4185_v53  ;;  %v4187_v28 = vpop.eup %4186  ;;  %v6305_v35 = vld [vmem:[#allocation3 + $0x68] sm:$0xff]  ;;  %v6308_v53 = vld [vmem:[#allocation3 + $0x78] sm:$0xff] }
 0xce5   :  { %v4189_v29 = vpop.eup %4188  ;;  %7156 = vst [vmem:[#allocation59_spill] sm:$0xff] %v6305_v35  ;;  %7157 = vst [vmem:[#allocation58_spill] sm:$0xff] %v6308_v53 }
 0xce6   :  { %4192 = vrcp.f32 %v2889_v26  ;;  %v2896_v62 = vadd.f32 1.0, %v4189_v29  ;;  %v6311_v26 = vld [vmem:[#allocation3 + $0x60] sm:$0xff]  ;;  %v6317_v29 = vld [vmem:[#allocation3 + $0x48] sm:$0xff] }
 0xce7   :  { %7158 = vst [vmem:[#allocation38_spill] sm:$0xff] %v6311_v26  ;;  %7160 = vst [vmem:[#allocation42_spill] sm:$0xff] %v6317_v29 }
 0xce8   :  { %4194 = vrcp.f32 %v2896_v62  ;;  %v6329_v62 = vld [vmem:[#allocation3 + $0x28] sm:$0xff] }
 0xce9   :  { %7164 = vst [vmem:[#allocation60_spill] sm:$0xff] %v6329_v62 }
 0xcf1   :  { %v4191_v32 = vpop.eup %4190 }
 0xcf2   :  { %v2900_v47 = vmul.f32 %v4191_v32, %v4187_v28  ;;  %v6314_v28 = vld [vmem:[#allocation3 + $0x70] sm:$0xff]  ;;  %v6320_v32 = vld [vmem:[#allocation3 + $0x58] sm:$0xff] }
 0xcf3   :  { %v4193_v48 = vpop.eup %4192  ;;  %7159 = vst [vmem:[#allocation41_spill] sm:$0xff] %v6314_v28  ;;  %7161 = vst [vmem:[#allocation40_spill] sm:$0xff] %v6320_v32 }
 0xcf4   :  { %v2899_v49 = vmul.f32 %v4193_v48, %v6078_v60  ;;  %v6221_v60 = vld [vmem:[#allocation3 + $0x148] sm:$0xff]  ;;  %v6326_v48 = vld [vmem:[#allocation3 + $0x50] sm:$0xff] }
 0xcf5   :  { %v4195_v59 = vpop.eup %4194  ;;  %7163 = vst [vmem:[#allocation68_spill] sm:$0xff] %v6326_v48 }
 0xcf6   :  { %v6176_v18 = vadd.f32 %v2900_v47, %v2899_v49  ;;  %v6323_v47 = vld [vmem:[#allocation3 + $0x40] sm:$0xff]  ;;  %v6332_v49 = vld [vmem:[#allocation3 + $0x38] sm:$0xff] }
 0xcf7   :  { %7162 = vst [vmem:[#allocation69_spill] sm:$0xff] %v6323_v47  ;;  %7165 = vst [vmem:[#allocation61_spill] sm:$0xff] %v6332_v49 }
 0xcf8   :  { %4196 = vtanh.f32 %v6176_v18 }
 0xd05   :  { %v4197_v38 = vpop.eup %4196 }
 0xd06   :  { %v6179_v58 = vmul.f32 %v4197_v38, %v4195_v59  ;;  %v6335_v59 = vld [vmem:[#allocation3 + $0x20] sm:$0xff]  ;;  %v6338_v38 = vld [vmem:[#allocation3 + $0x30] sm:$0xff] }
 0xd07   :  { %7166 = vst [vmem:[#allocation71_spill] sm:$0xff] %v6335_v59  ;;  %7167 = vst [vmem:[#allocation70_spill] sm:$0xff] %v6338_v38 }
 0xd08   :  { %7154 = vst [vmem:[#allocation37_spill] sm:$0xff] %v6179_v58  ;;  %2974 = vmatmul.mubr.f32.vlgmr.msra.gmra.mxu0 %v6179_v58  ;;  %3045 = vmatmul.mubr.f32.vlgmr.msra.gmra.mxu1 %v6179_v58  ;;  %v6341_v58 = vld [vmem:[#allocation3 + $0x8] sm:$0xff] }
 0xd09   :  { %3085 = vmatpush1.msra.mxu0 %v6085_v61  ;;  %3156 = vmatpush1.msra.mxu1 %v6088_v39  ;;  %7168 = vst [vmem:[#allocation28_spill] sm:$0xff] %v6341_v58 }
 0xd0a   :  { %3086 = vmatprep.subr.mxu0 %v6091_v50  ;;  %3157 = vmatprep.subr.mxu1 %v6094_v56 }
 0xd0b   :  { %3087 = vmatpush1.msra.mxu0 %v6097_v22  ;;  %3158 = vmatpush1.msra.mxu1 %v6100_v40 }
 0xd0c   :  { %3088 = vmatprep.subr.mxu0 %v6103_v41  ;;  %3159 = vmatprep.subr.mxu1 %v6106_v46 }
 0xd0d   :  { %3089 = vmatpush1.msra.mxu0 %v6191_v5  ;;  %3160 = vmatpush1.msra.mxu1 %v6194_v6 }
 0xd0e   :  { %3090 = vmatprep.subr.mxu0 %v6197_v7  ;;  %3161 = vmatprep.subr.mxu1 %v6200_v34 }
 0xd0f   :  { %3091 = vmatpush1.msra.mxu0 %v6203_v43  ;;  %3162 = vmatpush1.msra.mxu1 %v6206_v31 }
 0xd10   :  { %3092 = vmatprep.subr.mxu0 %v6209_v45  ;;  %3163 = vmatprep.subr.mxu1 %v6212_v51 }
 0xd11   :  { %3093 = vmatpush1.msra.mxu0 %v6215_v42  ;;  %3164 = vmatpush1.msra.mxu1 %v6218_v33 }
 0xd12   :  { %3094 = vmatprep.subr.mxu0 %v6221_v60  ;;  %3165 = vmatprep.subr.mxu1 %v6224_v8 }
 0xd13   :  { %3095 = vmatpush1.msra.mxu0 %v6227_v11  ;;  %3166 = vmatpush1.msra.mxu1 %v6230_v9 }
 0xd14   :  { %3096 = vmatprep.subr.mxu0 %v6233_v14  ;;  %3167 = vmatprep.subr.mxu1 %v6236_v36 }
 0xd15   :  { %3097 = vmatpush1.msra.mxu0 %v6239_v37  ;;  %3168 = vmatpush1.msra.mxu1 %v6242_v20 }
 0xd16   :  { %3098 = vmatprep.subr.mxu0 %v6245_v19  ;;  %3169 = vmatprep.subr.mxu1 %v6248_v27 }
 0xd17   :  { %3099 = vmatpush1.msra.mxu0 %v6251_v16  ;;  %3170 = vmatpush1.msra.mxu1 %v6254_v13 }
 0xd18   :  { %3100 = vmatprep.subr.mxu0 %v6257_v25  ;;  %3171 = vmatprep.subr.mxu1 %v6260_v12 }
 0xd19   :  { %3101 = vmatpush1.msra.mxu0 %v6263_v24  ;;  %3172 = vmatpush1.msra.mxu1 %v6266_v30 }
 0xd1a   :  { %3102 = vmatprep.subr.mxu0 %v6269_v10  ;;  %3173 = vmatprep.subr.mxu1 %v6272_v44 }
 0xd1b   :  { %3103 = vmatpush1.msra.mxu0 %v6275_v54  ;;  %3174 = vmatpush1.msra.mxu1 %v6278_v57 }
 0xd1c   :  { %3104 = vmatprep.subr.mxu0 %v6281_v2  ;;  %3175 = vmatprep.subr.mxu1 %v6284_v3 }
 0xd1d   :  { %3105 = vmatpush1.msra.mxu0 %v6287_v4  ;;  %3176 = vmatpush1.msra.mxu1 %v6290_v1 }
 0xd1e   :  { %3106 = vmatprep.subr.mxu0 %v6293_v63  ;;  %3177 = vmatprep.subr.mxu1 %v6296_v52 }
 0xd1f   :  { %3107 = vmatpush1.msra.mxu0 %v6299_v17  ;;  %3178 = vmatpush1.msra.mxu1 %v6302_v55 }
 0xd20   :  { %3108 = vmatprep.subr.mxu0 %v6305_v35  ;;  %3179 = vmatprep.subr.mxu1 %v6308_v53  ;;  %v7175_v53 = vld [vmem:[#allocation76_spill] sm:$0xff] }
 0xd21   :  { %3109 = vmatpush1.msra.mxu0 %v6311_v26  ;;  %3180 = vmatpush1.msra.mxu1 %v6314_v28  ;;  %v7174_v26 = vld [vmem:[#allocation78_spill] sm:$0xff] }
 0xd22   :  { %3110 = vmatprep.subr.mxu0 %v6317_v29  ;;  %3181 = vmatprep.subr.mxu1 %v6320_v32 }
 0xd23   :  { %3111 = vmatpush1.msra.mxu0 %v6323_v47  ;;  %3182 = vmatpush1.msra.mxu1 %v6326_v48  ;;  %v7173_v47 = vld [vmem:[#allocation74_spill] sm:$0xff] }
 0xd24   :  { %3112 = vmatprep.subr.mxu0 %v6329_v62  ;;  %3183 = vmatprep.subr.mxu1 %v6332_v49  ;;  %v6347_v62 = vld [vmem:[#allocation3] sm:$0xff]  ;;  %v6351_v49 = vld [vmem:[#allocation3 + $0x10] sm:$0xff] }
 0xd25   :  { %3113 = vmatpush1.msra.mxu0 %v6335_v59  ;;  %3184 = vmatpush1.msra.mxu1 %v6338_v38  ;;  %7170 = vst [vmem:[#allocation48_spill] sm:$0xff] %v6347_v62  ;;  %7171 = vst [vmem:[#allocation25_spill] sm:$0xff] %v6351_v49  ;;  %v7172_v38 = vld [vmem:[#allocation65_spill] sm:$0xff] }
 0xd26   :  { %3114 = vmatprep.subr.mxu0 %v6341_v58  ;;  %3185 = vmatprep.subr.mxu1 %v6344_v0 }
 0xd27   :  { %3115 = vmatpush1.msra.mxu0 %v6347_v62  ;;  %3148 = vmatprep.mubr.f32.mxu0 %v7148_v15 }
 0xd28   :  { %3186 = vmatpush1.msra.mxu1 %v6351_v49  ;;  %3219 = vmatprep.mubr.f32.mxu1 %v7148_v15 }
 0xd29   :  { %3259 = vmatprep.subr.mxu0 %v6165_v21  ;;  %3330 = vmatprep.subr.mxu1 %v6168_v23 }
 0xdc8   :  { %v2975_v58 = vpop.f32.mrf.mxu0  ;;  %v3046_v62 = vpop.f32.mrf.mxu1 }
 0xdc9   :  { %v3051_v59 = vadd.f32 %v2975_v58, %v7172_v38  ;;  %v3053_v15 = vadd.f32 %v3046_v62, %v7175_v53 }
 0xdca   :  { %v2977_v0 = vpop.f32.mrf.mxu0  ;;  %v3048_v28 = vpop.f32.mrf.mxu1 }
 0xdcb   :  { %v3857_v48 = vmul.f32 -1.442695, %v3051_v59  ;;  %v3052_v32 = vadd.f32 %v2977_v0, %v7173_v47  ;;  %v3054_v49 = vadd.f32 %v3048_v28, %v7174_v26 }
 0xdcd   :  { %4198 = vpow2.f32 %v3857_v48  ;;  %v3858_v29 = vmul.f32 -1.442695, %v3052_v32  ;;  %v3859_v35 = vmul.f32 -1.442695, %v3054_v49  ;;  %v3468_v49 = vld [vmem:[%s6612_s7 + $0xf0] sm:$0xff] }
 0xdcf   :  { %4200 = vpow2.f32 %v3858_v29 }
 0xdd0   :  { %4202 = vtanh.f32 %v3053_v15 }
 0xdd1   :  { %4204 = vpow2.f32 %v3859_v35 }
 0xdda   :  { %v4199_v21 = vpop.eup %4198 }
 0xddb   :  { %v3058_v55 = vadd.f32 1.0, %v4199_v21  ;;  %v3467_v21 = vld [vmem:[%s6612_s7 + $0xe8] sm:$0xff] }
 0xddc   :  { %v4201_v23 = vpop.eup %4200 }
 0xddd   :  { %4206 = vrcp.f32 %v3058_v55  ;;  %v3064_v58 = vadd.f32 1.0, %v4201_v23  ;;  %v4203_v59 = vpop.eup %4202  ;;  %v3466_v23 = vld [vmem:[%s6612_s7 + $0xe0] sm:$0xff] }
 0xdde   :  { %v4205_v0 = vpop.eup %4204 }
 0xddf   :  { %4208 = vrcp.f32 %v3064_v58  ;;  %v3071_v29 = vadd.f32 1.0, %v4205_v0  ;;  %v3465_v58 = vld [vmem:[%s6612_s7 + $0xd8] sm:$0xff]  ;;  %v3463_v0 = vld [vmem:[%s6612_s7 + $0xc8] sm:$0xff] }
 0xde1   :  { %4210 = vrcp.f32 %v3071_v29  ;;  %v3459_v29 = vld [vmem:[%s6612_s7 + $0xa8] sm:$0xff] }
 0xdea   :  { %v4207_v47 = vpop.eup %4206 }
 0xdeb   :  { %v3075_v48 = vmul.f32 %v4207_v47, %v4203_v59  ;;  %v3464_v59 = vld [vmem:[%s6612_s7 + $0xd0] sm:$0xff]  ;;  %v3462_v47 = vld [vmem:[%s6612_s7 + $0xc0] sm:$0xff] }
 0xdec   :  { %v4209_v32 = vpop.eup %4208 }
 0xded   :  { %v3074_v38 = vmul.f32 %v4209_v32, %v6176_v18  ;;  %v7184_v18 = vld [vmem:[#allocation68_spill] sm:$0xff]  ;;  %v3460_v32 = vld [vmem:[%s6612_s7 + $0xb0] sm:$0xff] }
 0xdee   :  { %v4211_v53 = vpop.eup %4210 }
 0xdef   :  { %v6362_v26 = vadd.f32 %v3075_v48, %v3074_v38  ;;  %v3461_v48 = vld [vmem:[%s6612_s7 + $0xb8] sm:$0xff]  ;;  %v3458_v38 = vld [vmem:[%s6612_s7 + $0xa0] sm:$0xff] }
 0xdf1   :  { %4212 = vtanh.f32 %v6362_v26 }
 0xdfe   :  { %v4213_v15 = vpop.eup %4212 }
 0xdff   :  { %v6365_v28 = vmul.f32 %v4213_v15, %v4211_v53  ;;  %v3456_v53 = vld [vmem:[%s6612_s7 + $0x90] sm:$0xff]  ;;  %v3455_v15 = vld [vmem:[%s6612_s7 + $0x88] sm:$0xff] }
 0xe01   :  { %3149 = vmatmul.mubr.f32.vlgmr.msra.gmra.mxu0 %v6365_v28  ;;  %3220 = vmatmul.mubr.f32.vlgmr.msra.gmra.mxu1 %v6365_v28 }
 0xe02   :  { %3260 = vmatpush1.msra.mxu0 %v6085_v61  ;;  %3331 = vmatpush1.msra.mxu1 %v6088_v39  ;;  %v7176_v61 = vld [vmem:[#allocation26_spill] sm:$0xff]  ;;  %v7177_v39 = vld [vmem:[#allocation59_spill] sm:$0xff] }
 0xe03   :  { %3261 = vmatprep.subr.mxu0 %v6091_v50  ;;  %3332 = vmatprep.subr.mxu1 %v6094_v56  ;;  %v7178_v50 = vld [vmem:[#allocation58_spill] sm:$0xff] }
 0xe04   :  { %3262 = vmatpush1.msra.mxu0 %v6097_v22  ;;  %3333 = vmatpush1.msra.mxu1 %v6100_v40  ;;  %v7179_v56 = vld [vmem:[#allocation38_spill] sm:$0xff]  ;;  %v7180_v22 = vld [vmem:[#allocation41_spill] sm:$0xff] }
 0xe05   :  { %3263 = vmatprep.subr.mxu0 %v6103_v41  ;;  %3334 = vmatprep.subr.mxu1 %v6106_v46  ;;  %v7181_v40 = vld [vmem:[#allocation42_spill] sm:$0xff]  ;;  %v7182_v41 = vld [vmem:[#allocation40_spill] sm:$0xff]  ;;  %v7183_v46 = vld [vmem:[#allocation69_spill] sm:$0xff] }
 0xe06   :  { %3264 = vmatpush1.msra.mxu0 %v6191_v5  ;;  %3335 = vmatpush1.msra.mxu1 %v6194_v6  ;;  %v7185_v5 = vld [vmem:[#allocation60_spill] sm:$0xff]  ;;  %v7186_v6 = vld [vmem:[#allocation61_spill] sm:$0xff] }
 0xe07   :  { %3265 = vmatprep.subr.mxu0 %v6197_v7  ;;  %3336 = vmatprep.subr.mxu1 %v6200_v34  ;;  %v7187_v7 = vld [vmem:[#allocation71_spill] sm:$0xff]  ;;  %v7188_v34 = vld [vmem:[#allocation70_spill] sm:$0xff] }
 0xe08   :  { %3266 = vmatpush1.msra.mxu0 %v6203_v43  ;;  %3337 = vmatpush1.msra.mxu1 %v6206_v31  ;;  %v7189_v43 = vld [vmem:[#allocation28_spill] sm:$0xff]  ;;  %v7190_v31 = vld [vmem:[#allocation55_spill] sm:$0xff] }
 0xe09   :  { %3267 = vmatprep.subr.mxu0 %v6209_v45  ;;  %3338 = vmatprep.subr.mxu1 %v6212_v51  ;;  %v7191_v45 = vld [vmem:[#allocation48_spill] sm:$0xff]  ;;  %v7192_v51 = vmov 0.0  }
 0xe0a   :  { %3268 = vmatpush1.msra.mxu0 %v6215_v42  ;;  %3339 = vmatpush1.msra.mxu1 %v6218_v33  ;;  %v7193_v42 = vld [vmem:[#allocation25_spill] sm:$0xff]  ;;  %v3469_v33 = vld [vmem:[%s6612_s7 + $0xf8] sm:$0xff] }
 0xe0b   :  { %3269 = vmatprep.subr.mxu0 %v6221_v60  ;;  %3340 = vmatprep.subr.mxu1 %v6224_v8  ;;  %v7194_v8 = vld [vmem:[#allocation56_spill] sm:$0xff] }
 0xe0c   :  { %3270 = vmatpush1.msra.mxu0 %v6227_v11  ;;  %3341 = vmatpush1.msra.mxu1 %v6230_v9 }
 0xe0d   :  { %3271 = vmatprep.subr.mxu0 %v6233_v14  ;;  %3342 = vmatprep.subr.mxu1 %v6236_v36  ;;  %v7195_v36 = vld [vmem:[#allocation79_spill] sm:$0xff] }
 0xe0e   :  { %3272 = vmatpush1.msra.mxu0 %v6239_v37  ;;  %3343 = vmatpush1.msra.mxu1 %v6242_v20 }
 0xe0f   :  { %3273 = vmatprep.subr.mxu0 %v6245_v19  ;;  %3344 = vmatprep.subr.mxu1 %v6248_v27 }
 0xe10   :  { %3274 = vmatpush1.msra.mxu0 %v6251_v16  ;;  %3345 = vmatpush1.msra.mxu1 %v6254_v13  ;;  %v7196_v16 = vld [vmem:[#allocation52_spill] sm:$0xff] }
 0xe11   :  { %3275 = vmatprep.subr.mxu0 %v6257_v25  ;;  %3346 = vmatprep.subr.mxu1 %v6260_v12  ;;  %v7197_v25 = vld [vmem:[#allocation77_spill] sm:$0xff] }
 0xe12   :  { %3276 = vmatpush1.msra.mxu0 %v6263_v24  ;;  %3347 = vmatpush1.msra.mxu1 %v6266_v30 }
 0xe13   :  { %3277 = vmatprep.subr.mxu0 %v6269_v10  ;;  %3348 = vmatprep.subr.mxu1 %v6272_v44 }
 0xe14   :  { %3278 = vmatpush1.msra.mxu0 %v6275_v54  ;;  %3349 = vmatpush1.msra.mxu1 %v6278_v57 }
 0xe15   :  { %3279 = vmatprep.subr.mxu0 %v6281_v2  ;;  %3350 = vmatprep.subr.mxu1 %v6284_v3 }
 0xe16   :  { %3280 = vmatpush1.msra.mxu0 %v6287_v4  ;;  %3351 = vmatpush1.msra.mxu1 %v6290_v1 }
 0xe17   :  { %3281 = vmatprep.subr.mxu0 %v6293_v63  ;;  %3352 = vmatprep.subr.mxu1 %v6296_v52 }
 0xe18   :  { %3282 = vmatpush1.msra.mxu0 %v6299_v17  ;;  %3353 = vmatpush1.msra.mxu1 %v7176_v61  ;;  %v3454_v61 = vld [vmem:[%s6612_s7 + $0x80] sm:$0xff] }
 0xe19   :  { %3283 = vmatprep.subr.mxu0 %v7177_v39  ;;  %3354 = vmatprep.subr.mxu1 %v7178_v50  ;;  %v3453_v39 = vld [vmem:[%s6612_s7 + $0x78] sm:$0xff]  ;;  %v3452_v50 = vld [vmem:[%s6612_s7 + $0x70] sm:$0xff] }
 0xe1a   :  { %3284 = vmatpush1.msra.mxu0 %v7179_v56  ;;  %3355 = vmatpush1.msra.mxu1 %v7180_v22  ;;  %v3451_v56 = vld [vmem:[%s6612_s7 + $0x68] sm:$0xff]  ;;  %v3450_v22 = vld [vmem:[%s6612_s7 + $0x60] sm:$0xff] }
 0xe1b   :  { %3285 = vmatprep.subr.mxu0 %v7181_v40  ;;  %3356 = vmatprep.subr.mxu1 %v7182_v41  ;;  %v3449_v40 = vld [vmem:[%s6612_s7 + $0x58] sm:$0xff]  ;;  %v3448_v41 = vld [vmem:[%s6612_s7 + $0x50] sm:$0xff] }
 0xe1c   :  { %3286 = vmatpush1.msra.mxu0 %v7183_v46  ;;  %3357 = vmatpush1.msra.mxu1 %v7184_v18  ;;  %v3447_v46 = vld [vmem:[%s6612_s7 + $0x48] sm:$0xff]  ;;  %v3446_v18 = vld [vmem:[%s6612_s7 + $0x40] sm:$0xff] }
 0xe1d   :  { %3287 = vmatprep.subr.mxu0 %v7185_v5  ;;  %3358 = vmatprep.subr.mxu1 %v7186_v6  ;;  %v3445_v5 = vld [vmem:[%s6612_s7 + $0x38] sm:$0xff]  ;;  %v3444_v6 = vld [vmem:[%s6612_s7 + $0x30] sm:$0xff] }
 0xe1e   :  { %3288 = vmatpush1.msra.mxu0 %v7187_v7  ;;  %3359 = vmatpush1.msra.mxu1 %v7188_v34  ;;  %v3443_v7 = vld [vmem:[%s6612_s7 + $0x28] sm:$0xff]  ;;  %v3442_v34 = vld [vmem:[%s6612_s7 + $0x20] sm:$0xff] }
 0xe1f   :  { %3289 = vmatprep.subr.mxu0 %v7189_v43  ;;  %3360 = vmatprep.subr.mxu1 %v7190_v31  ;;  %v3441_v43 = vld [vmem:[%s6612_s7 + $0x18] sm:$0xff]  ;;  %v3440_v31 = vld [vmem:[%s6612_s7 + $0x10] sm:$0xff] }
 0xe20   :  { %3290 = vmatpush1.msra.mxu0 %v7191_v45  ;;  %3323 = vmatprep.mubr.f32.mxu0 %v7192_v51  ;;  %v3439_v45 = vld [vmem:[%s6612_s7 + $0x8] sm:$0xff] }
 0xe21   :  { %3361 = vmatpush1.msra.mxu1 %v7193_v42  ;;  %3394 = vmatprep.mubr.f32.mxu1 %v7192_v51  ;;  %v3438_v42 = vld [vmem:[%s6612_s7] sm:$0xff] }
 0xe22   :  { %3887 = vmatprep.subr.mxu1 %v7192_v51  ;;  %3482 = vmatprep.subr.mxu0 %v3469_v33  ;;  %v7198_v33 = vld [vmem:[#allocation29_spill] sm:$0xff] }
 0xec1   :  { %v3150_v60 = vpop.f32.mrf.mxu0  ;;  %v3221_v20 = vpop.f32.mrf.mxu1 }
 0xec2   :  { %v3226_v11 = vadd.f32 %v3150_v60, %v7194_v8  ;;  %v3228_v12 = vadd.f32 %v3221_v20, %v7197_v25  ;;  %v7199_v60 = vld [vmem:[#allocation35_spill] sm:$0xff]  ;;  %v7200_v8 = vld [vmem:[#allocation34_spill] sm:$0xff] }
 0xec3   :  { %v3152_v9 = vpop.f32.mrf.mxu0  ;;  %v3223_v27 = vpop.f32.mrf.mxu1 }
 0xec4   :  { %v3860_v14 = vmul.f32 -1.442695, %v3226_v11  ;;  %v3227_v37 = vadd.f32 %v3152_v9, %v7195_v36  ;;  %v3229_v13 = vadd.f32 %v3223_v27, %v7196_v16  ;;  %v7201_v11 = vld [vmem:[#allocation39_spill] sm:$0xff]  ;;  %v7202_v9 = vld [vmem:[#allocation37_spill] sm:$0xff]  ;;  %v7203_v36 = vld [vmem:[#allocation36_spill] sm:$0xff] }
 0xec6   :  { %4214 = vpow2.f32 %v3860_v14  ;;  %v3861_v19 = vmul.f32 -1.442695, %v3227_v37  ;;  %v3862_v24 = vmul.f32 -1.442695, %v3229_v13  ;;  %v7204_v37 = vld [vmem:[#allocation67_spill] sm:$0xff] }
 0xec7   :  { %v2038_v20 = vadd.f32 %v7204_v37, %v7203_v36 }
 0xec8   :  { %4216 = vpow2.f32 %v3861_v19  ;;  %v7205_v19 = vld [vmem:[#allocation53_spill] sm:$0xff] }
 0xec9   :  { %4218 = vtanh.f32 %v3228_v12 }
 0xeca   :  { %4220 = vpow2.f32 %v3862_v24 }
 0xed3   :  { %v4215_v30 = vpop.eup %4214 }
 0xed4   :  { %v3233_v10 = vadd.f32 1.0, %v4215_v30 }
 0xed5   :  { %v4217_v44 = vpop.eup %4216 }
 0xed6   :  { %4222 = vrcp.f32 %v3233_v10  ;;  %v3239_v54 = vadd.f32 1.0, %v4217_v44  ;;  %v4219_v57 = vpop.eup %4218  ;;  %v7206_v10 = vld [vmem:[#allocation32_spill] sm:$0xff]  ;;  %v7207_v44 = vld [vmem:[#allocation49_spill] sm:$0xff] }
 0xed7   :  { %v4221_v2 = vpop.eup %4220 }
 0xed8   :  { %4224 = vrcp.f32 %v3239_v54  ;;  %v3246_v63 = vadd.f32 1.0, %v4221_v2  ;;  %v2151_v54 = vadd.f32 %v7207_v44, %v7206_v10  ;;  %v7208_v2 = vld [vmem:[#allocation27_spill] sm:$0xff] }
 0xeda   :  { %4226 = vrcp.f32 %v3246_v63 }
 0xee3   :  { %v4223_v3 = vpop.eup %4222 }
 0xee4   :  { %v3250_v4 = vmul.f32 %v4223_v3, %v4219_v57 }
 0xee5   :  { %v4225_v1 = vpop.eup %4224 }
 0xee6   :  { %v3249_v52 = vmul.f32 %v4225_v1, %v6362_v26  ;;  %v3457_v26 = vld [vmem:[%s6612_s7 + $0x98] sm:$0xff] }
 0xee7   :  { %v4227_v55 = vpop.eup %4226 }
 0xee8   :  { %v6442_v17 = vadd.f32 %v3250_v4, %v3249_v52 }
 0xeea   :  { %4228 = vtanh.f32 %v6442_v17 }
 0xef7   :  { %v4229_v35 = vpop.eup %4228 }
 0xef8   :  { %v6445_v62 = vmul.f32 %v4229_v35, %v4227_v55 }
 0xefa   :  { %3324 = vmatmul.mubr.f32.vlgmr.msra.gmra.mxu0 %v6445_v62  ;;  %3395 = vmatmul.mubr.f32.vlgmr.msra.gmra.mxu1 %v6445_v62 }
 0xefb   :  { %3483 = vmatpush1.msra.mxu0 %v3468_v49  ;;  %3546 = vmatprep.mubr.f32.mxu0 %v7192_v51 }
 0xefc   :  { %3484 = vmatprep.subr.mxu0 %v3467_v21  ;;  %3919 = vmatprep.mubr.msk.f32.mxu1 %vm4484_vm0, %v7192_v51 }
 0xefd   :  { %3485 = vmatpush1.msra.mxu0 %v3466_v23 }
 0xefe   :  { %3486 = vmatprep.subr.mxu0 %v3465_v58 }
 0xeff   :  { %3487 = vmatpush1.msra.mxu0 %v3464_v59 }
 0xf00   :  { %3488 = vmatprep.subr.mxu0 %v3463_v0 }
 0xf01   :  { %3489 = vmatpush1.msra.mxu0 %v3462_v47 }
 0xf02   :  { %3490 = vmatprep.subr.mxu0 %v3461_v48 }
 0xf03   :  { %3491 = vmatpush1.msra.mxu0 %v3460_v32 }
 0xf04   :  { %3492 = vmatprep.subr.mxu0 %v3459_v29 }
 0xf05   :  { %3493 = vmatpush1.msra.mxu0 %v3458_v38 }
 0xf06   :  { %3494 = vmatprep.subr.mxu0 %v3457_v26 }
 0xf07   :  { %3495 = vmatpush1.msra.mxu0 %v3456_v53 }
 0xf08   :  { %3496 = vmatprep.subr.mxu0 %v3455_v15 }
 0xf09   :  { %3497 = vmatpush1.msra.mxu0 %v3454_v61 }
 0xf0a   :  { %3498 = vmatprep.subr.mxu0 %v3453_v39 }
 0xf0b   :  { %3499 = vmatpush1.msra.mxu0 %v3452_v50 }
 0xf0c   :  { %3500 = vmatprep.subr.mxu0 %v3451_v56 }
 0xf0d   :  { %3501 = vmatpush1.msra.mxu0 %v3450_v22 }
 0xf0e   :  { %3502 = vmatprep.subr.mxu0 %v3449_v40 }
 0xf0f   :  { %3503 = vmatpush1.msra.mxu0 %v3448_v41 }
 0xf10   :  { %3504 = vmatprep.subr.mxu0 %v3447_v46 }
 0xf11   :  { %3505 = vmatpush1.msra.mxu0 %v3446_v18 }
 0xf12   :  { %3506 = vmatprep.subr.mxu0 %v3445_v5  ;;  %v3470_v5 = vld [vmem:[%s6613_s8] sm:$0x3] }
 0xf13   :  { %3507 = vmatpush1.msra.mxu0 %v3444_v6  ;;  %v7209_v6 = vld [vmem:[#allocation50_spill] sm:$0xff] }
 0xf14   :  { %3508 = vmatprep.subr.mxu0 %v3443_v7  ;;  %v3475_v7 = vrot.slane %v3470_v5, %v7209_v6  ;;  %v3697_v6 = vld [vmem:[#allocation12] sm:$0xff] }
 0xf15   :  { %3509 = vmatpush1.msra.mxu0 %v3442_v34  ;;  %v7210_v34 = vld [vmem:[#allocation54_spill] sm:$0xff] }
 0xf16   :  { %3510 = vmatprep.subr.mxu0 %v3441_v43  ;;  %v3479_v43 = vrot.slane %v3470_v5, %v7210_v34  ;;  %v3698_v5 = vld [vmem:[#allocation12 + $0x8] sm:$0xff] }
 0xf17   :  { %3511 = vmatpush1.msra.mxu0 %v3440_v31 }
 0xf18   :  { %3512 = vmatprep.subr.mxu0 %v3439_v45 }
 0xf19   :  { %3513 = vmatpush1.msra.mxu0 %v3438_v42 }
 0xf1a   :  { %3547 = vmatmul.mubr.f32.vlgmr.msra.gmra.mxu0 %v7198_v33 }
 0xf1b   :  { %3551 = vmatprep.mubr.f32.mxu0 %v7192_v51 }
 0xf1e   :  { %3552 = vmatmul.mubr.f32.gmra.mxu0 %v7199_v60 }
 0xf1f   :  { %3556 = vmatprep.mubr.f32.mxu0 %v7192_v51 }
 0xf22   :  { %3557 = vmatmul.mubr.f32.gmra.mxu0 %v7200_v8 }
 0xf23   :  { %3561 = vmatprep.mubr.f32.mxu0 %v7192_v51 }
 0xf26   :  { %3562 = vmatmul.mubr.f32.gmra.mxu0 %v7201_v11 }
 0xf27   :  { %3566 = vmatprep.mubr.f32.mxu0 %v7192_v51 }
 0xf2a   :  { %3567 = vmatmul.mubr.f32.gmra.mxu0 %v7202_v9 }
 0xf2b   :  { %3571 = vmatprep.mubr.f32.mxu0 %v7192_v51 }
 0xf2e   :  { %3572 = vmatmul.mubr.f32.gmra.mxu0 %v6365_v28 }
 0xf2f   :  { %3576 = vmatprep.mubr.f32.mxu0 %v7192_v51 }
 0xf32   :  { %3577 = vmatmul.mubr.f32.gmra.mxu0 %v6445_v62 }
 0xf33   :  { %3581 = vmatprep.mubr.f32.mxu0 %v7192_v51 }
 0xfba   :  { %v3325_v14 = vpop.f32.mrf.mxu0  ;;  %v3396_v12 = vpop.f32.mrf.mxu1 }
 0xfbb   :  { %v3401_v27 = vadd.f32 %v3325_v14, %v7205_v19  ;;  %v3403_v3 = vadd.f32 %v3396_v12, %v7208_v2  ;;  %v3866_v2 = vld [vmem:[%s6614_s9] ss:$0 sm:$0xff] }
 0xfbc   :  { %v3327_v16 = vpop.f32.mrf.mxu0  ;;  %v3398_v30 = vpop.f32.mrf.mxu1 }
 0xfbd   :  { %v3863_v13 = vmul.f32 -1.442695, %v3401_v27  ;;  %v3402_v25 = vadd.f32 %v3327_v16, %v2038_v20  ;;  %v3404_v57 = vadd.f32 %v3398_v30, %v2151_v54 }
 0xfbf   :  { %4230 = vpow2.f32 %v3863_v13  ;;  %v3864_v24 = vmul.f32 -1.442695, %v3402_v25  ;;  %v3865_v4 = vmul.f32 -1.442695, %v3404_v57 }
 0xfc1   :  { %4232 = vpow2.f32 %v3864_v24 }
 0xfc2   :  { %4234 = vtanh.f32 %v3403_v3 }
 0xfc3   :  { %4236 = vpow2.f32 %v3865_v4 }
 0xfcc   :  { %v4231_v1 = vpop.eup %4230 }
 0xfcd   :  { %v3408_v63 = vadd.f32 1.0, %v4231_v1 }
 0xfce   :  { %v4233_v52 = vpop.eup %4232 }
 0xfcf   :  { %4238 = vrcp.f32 %v3408_v63  ;;  %v3414_v55 = vadd.f32 1.0, %v4233_v52  ;;  %v4235_v35 = vpop.eup %4234 }
 0xfd0   :  { %v4237_v21 = vpop.eup %4236 }
 0xfd1   :  { %4240 = vrcp.f32 %v3414_v55  ;;  %v3421_v47 = vadd.f32 1.0, %v4237_v21 }
 0xfd3   :  { %4242 = vrcp.f32 %v3421_v47 }
 0xfda   :  { %v3548_v49 = vpop.f32.mrf.mxu0 }
 0xfdb   :  { %v3549_v42 = vadd.f32 %v3548_v49, %v3475_v7 }
 0xfdc   :  { %v4239_v23 = vpop.eup %4238  ;;  %v3550_v58 = vpop.f32.mrf.mxu0 }
 0xfdd   :  { %v3425_v59 = vmul.f32 %v4239_v23, %v4235_v35 }
 0xfde   :  { %v4241_v0 = vpop.eup %4240  ;;  %v3553_v48 = vpop.f32.mrf.mxu0 }
 0xfdf   :  { %v3424_v32 = vmul.f32 %v4241_v0, %v6442_v17  ;;  %v3554_v20 = vadd.f32 %v3553_v48, %v3475_v7 }
 0xfe0   :  { %v3555_v29 = vpop.f32.mrf.mxu0  ;;  %v4243_v22 = vpop.eup %4242 }
 0xfe1   :  { %v3426_v38 = vadd.f32 %v3425_v59, %v3424_v32  ;;  %v3712_v29 = vld [vmem:[#allocation12 + $0x78] sm:$0xff] }
 0xfe2   :  { %v3558_v26 = vpop.f32.mrf.mxu0  ;;  %3888 = vmatpush3.msra.mxu1 %v3712_v29 }
 0xfe3   :  { %4244 = vtanh.f32 %v3426_v38  ;;  %v3559_v14 = vadd.f32 %v3558_v26, %v3475_v7  ;;  %v3711_v38 = vld [vmem:[#allocation12 + $0x70] sm:$0xff]  ;;  %3889 = vmatprep.subr.mxu1 %v7192_v51  ;;  %v3710_v26 = vld [vmem:[#allocation12 + $0x68] sm:$0xff] }
 0xfe4   :  { %v3560_v53 = vpop.f32.mrf.mxu0  ;;  %3890 = vmatpush3.msra.mxu1 %v3711_v38 }
 0xfe5   :  { %3891 = vmatprep.subr.mxu1 %v7192_v51  ;;  %v3709_v53 = vld [vmem:[#allocation12 + $0x60] sm:$0xff] }
 0xfe6   :  { %v3563_v15 = vpop.f32.mrf.mxu0  ;;  %3892 = vmatpush3.msra.mxu1 %v3710_v26 }
 0xfe7   :  { %v3564_v36 = vadd.f32 %v3563_v15, %v3475_v7  ;;  %3893 = vmatprep.subr.mxu1 %v7192_v51  ;;  %v3708_v15 = vld [vmem:[#allocation12 + $0x58] sm:$0xff] }
 0xfe8   :  { %v3565_v61 = vpop.f32.mrf.mxu0  ;;  %3894 = vmatpush3.msra.mxu1 %v3709_v53 }
 0xfe9   :  { %3895 = vmatprep.subr.mxu1 %v7192_v51  ;;  %v3707_v61 = vld [vmem:[#allocation12 + $0x50] sm:$0xff] }
 0xfea   :  { %v3568_v39 = vpop.f32.mrf.mxu0  ;;  %3896 = vmatpush3.msra.mxu1 %v3708_v15 }
 0xfeb   :  { %v3569_v12 = vadd.f32 %v3568_v39, %v3475_v7  ;;  %3897 = vmatprep.subr.mxu1 %v7192_v51  ;;  %v3706_v39 = vld [vmem:[#allocation12 + $0x48] sm:$0xff] }
 0xfec   :  { %v3570_v50 = vpop.f32.mrf.mxu0  ;;  %3898 = vmatpush3.msra.mxu1 %v3707_v61 }
 0xfed   :  { %3899 = vmatprep.subr.mxu1 %v7192_v51  ;;  %v3705_v50 = vld [vmem:[#allocation12 + $0x40] sm:$0xff] }
 0xfee   :  { %v3573_v56 = vpop.f32.mrf.mxu0  ;;  %3900 = vmatpush3.msra.mxu1 %v3706_v39 }
 0xfef   :  { %v3574_v25 = vadd.f32 %v3573_v56, %v3475_v7  ;;  %3901 = vmatprep.subr.mxu1 %v7192_v51  ;;  %v3704_v56 = vld [vmem:[#allocation12 + $0x38] sm:$0xff] }
 0xff0   :  { %v4245_v40 = vpop.eup %4244  ;;  %v3575_v41 = vpop.f32.mrf.mxu0  ;;  %3902 = vmatpush3.msra.mxu1 %v3705_v50 }
 0xff1   :  { %v6564_v46 = vmul.f32 %v4245_v40, %v4243_v22  ;;  %3903 = vmatprep.subr.mxu1 %v7192_v51  ;;  %v3703_v22 = vld [vmem:[#allocation12 + $0x30] sm:$0xff]  ;;  %v3702_v40 = vld [vmem:[#allocation12 + $0x28] sm:$0xff]  ;;  %v3701_v41 = vld [vmem:[#allocation12 + $0x20] sm:$0xff] }
 0xff2   :  { %v3578_v18 = vpop.f32.mrf.mxu0  ;;  %3904 = vmatpush3.msra.mxu1 %v3704_v56 }
 0xff3   :  { %3582 = vmatmul.mubr.f32.gmra.mxu0 %v6564_v46  ;;  %v3579_v44 = vadd.f32 %v3578_v18, %v3475_v7  ;;  %3905 = vmatprep.subr.mxu1 %v7192_v51  ;;  %v3700_v18 = vld [vmem:[#allocation12 + $0x18] sm:$0xff] }
 0xff4   :  { %v3580_v17 = vpop.f32.mrf.mxu0  ;;  %3906 = vmatpush3.msra.mxu1 %v3703_v22 }
 0xff5   :  { %3907 = vmatprep.subr.mxu1 %v7192_v51  ;;  %v3699_v17 = vld [vmem:[#allocation12 + $0x10] sm:$0xff] }
 0xff6   :  { %3908 = vmatpush3.msra.mxu1 %v3702_v40 }
 0xff7   :  { %3909 = vmatprep.subr.mxu1 %v7192_v51 }
 0xff8   :  { %3910 = vmatpush3.msra.mxu1 %v3701_v41 }
 0xff9   :  { %3911 = vmatprep.subr.mxu1 %v7192_v51 }
 0xffa   :  { %3912 = vmatpush3.msra.mxu1 %v3700_v18 }
 0xffb   :  { %3913 = vmatprep.subr.mxu1 %v7192_v51 }
 0xffc   :  { %3914 = vmatpush3.msra.mxu1 %v3699_v17 }
 0xffd   :  { %3915 = vmatprep.subr.mxu1 %v7192_v51 }
 0xffe   :  { %3916 = vmatpush3.msra.mxu1 %v3698_v5 }
 0xfff   :  { %3917 = vmatprep.subr.mxu1 %v7192_v51 }
0x1000   :  { %3918 = vmatpush3.msra.mxu1 %v3697_v6 }
0x10b3   :  { %v3583_v31 = vpop.f32.mrf.mxu0 }
0x10b4   :  { %v3584_v10 = vadd.f32 %v3583_v31, %v3475_v7 }
0x10b5   :  { %v3585_v45 = vpop.f32.mrf.mxu0 }
0x10b6   :  { %v3586_v37 = vadd.f32 %v3585_v45, %v3479_v43 }
0x10b8   :  { %v3590_v19 = vadd.f32 %v3586_v37, %v3559_v14  ;;  %v3588_v27 = vadd.f32 %v3586_v37, %v3549_v42  ;;  %v3591_v16 = vadd.f32 %v3586_v37, %v3564_v36  ;;  %v3589_v13 = vadd.f32 %v3586_v37, %v3554_v20 }
0x10b9   :  { %v3593_v24 = vadd.f32 %v3586_v37, %v3574_v25  ;;  %v3592_v30 = vadd.f32 %v3586_v37, %v3569_v12  ;;  %v3595_v54 = vadd.f32 %v3586_v37, %v3584_v10  ;;  %v3594_v57 = vadd.f32 %v3586_v37, %v3579_v44 }
0x10ba   :  { %4246 = vtanh.f32 %v3590_v19 }
0x10bb   :  { %4248 = vtanh.f32 %v3588_v27 }
0x10bc   :  { %4250 = vtanh.f32 %v3591_v16 }
0x10bd   :  { %4252 = vtanh.f32 %v3589_v13 }
0x10be   :  { %4254 = vtanh.f32 %v3593_v24 }
0x10bf   :  { %4256 = vtanh.f32 %v3592_v30 }
0x10c0   :  { %4258 = vtanh.f32 %v3595_v54 }
0x10c1   :  { %4260 = vtanh.f32 %v3594_v57 }
0x10c7   :  { %v4247_v3 = vpop.eup %4246 }
0x10c8   :  { %v4249_v4 = vpop.eup %4248  ;;  %v3613_v1 = vmul.f32 %v4247_v3, %v3866_v2 }
0x10c9   :  { %v4251_v63 = vpop.eup %4250  ;;  %v3611_v52 = vmul.f32 %v4249_v4, %v3866_v2 }
0x10ca   :  { %v4253_v55 = vpop.eup %4252  ;;  %3623 = vadd.xlane.f32.xlu1 %v3613_v1  ;;  %v3614_v35 = vmul.f32 %v4251_v63, %v3866_v2 }
0x10cb   :  { %3619 = vadd.xlane.f32.xlu0 %v3611_v52  ;;  %v4255_v49 = vpop.eup %4254  ;;  %v3612_v21 = vmul.f32 %v4253_v55, %v3866_v2 }
0x10cc   :  { %v4257_v23 = vpop.eup %4256  ;;  %v3616_v58 = vmul.f32 %v4255_v49, %v3866_v2 }
0x10cd   :  { %v4259_v59 = vpop.eup %4258  ;;  %v3615_v0 = vmul.f32 %v4257_v23, %v3866_v2 }
0x10ce   :  { %3625 = vadd.xlane.f32.xlu1 %v3614_v35  ;;  %v4261_v47 = vpop.eup %4260  ;;  %v3618_v48 = vmul.f32 %v4259_v59, %v3866_v2 }
0x10cf   :  { %3621 = vadd.xlane.f32.xlu0 %v3612_v21  ;;  %v3617_v32 = vmul.f32 %v4261_v47, %v3866_v2 }
0x10d2   :  { %3629 = vadd.xlane.f32.xlu1 %v3616_v58 }
0x10d3   :  { %3627 = vadd.xlane.f32.xlu0 %v3615_v0 }
0x10d6   :  { %3633 = vadd.xlane.f32.xlu1 %v3618_v48 }
0x10d7   :  { %3631 = vadd.xlane.f32.xlu0 %v3617_v32 }
0x1153   :  { %v3624_v7 = vpop.xlane.xlu1 %3623 }
0x1154   :  { %v3620_v34 = vpop.xlane.xlu0 %3619 }
0x1157   :  { %v3626_v43 = vpop.xlane.xlu1 %3625 }
0x1158   :  { %v3622_v31 = vpop.xlane.xlu0 %3621 }
0x115b   :  { %v3630_v45 = vpop.xlane.xlu1 %3629 }
0x115c   :  { %v3628_v42 = vpop.xlane.xlu0 %3627  ;;  %v3636_v14 = vmax.f32 %v3622_v31, %v3630_v45 }
0x115d   :  { %v3635_v36 = vmax.f32 %v3620_v34, %v3628_v42 }
0x115f   :  { %v3634_v37 = vpop.xlane.xlu1 %3633  ;;  %v3639_v16 = vmax.f32 %v3635_v36, %v3636_v14 }
0x1160   :  { %v3632_v20 = vpop.xlane.xlu0 %3631  ;;  %v3638_v19 = vmax.f32 %v3626_v43, %v3634_v37 }
0x1161   :  { %v3637_v27 = vmax.f32 %v3624_v7, %v3632_v20 }
0x1163   :  { %v3640_v13 = vmax.f32 %v3637_v27, %v3638_v19 }
0x1165   :  { %v3641_v25 = vmax.f32 %v3639_v16, %v3640_v13 }
0x1167   :  { %v3642_v12 = vsub.f32 %v3620_v34, %v3641_v25  ;;  %v3643_v24 = vsub.f32 %v3622_v31, %v3641_v25  ;;  %v3644_v30 = vsub.f32 %v3624_v7, %v3641_v25  ;;  %v3645_v51 = vsub.f32 %v3626_v43, %v3641_v25 }
0x1168   :  { %v3646_v54 = vsub.f32 %v3628_v42, %v3641_v25  ;;  %v3647_v2 = vsub.f32 %v3630_v45, %v3641_v25  ;;  %v3648_v4 = vsub.f32 %v3632_v20, %v3641_v25  ;;  %v3649_v63 = vsub.f32 %v3634_v37, %v3641_v25 }
0x1169   :  { %v3650_v10 = vmul.f32 1.442695, %v3642_v12  ;;  %v3652_v44 = vmul.f32 1.442695, %v3643_v24  ;;  %v3654_v57 = vmul.f32 1.442695, %v3644_v30 }
0x116a   :  { %v3656_v3 = vmul.f32 1.442695, %v3645_v51  ;;  %v3658_v1 = vmul.f32 1.442695, %v3646_v54  ;;  %v3660_v52 = vmul.f32 1.442695, %v3647_v2 }
0x116b   :  { %4262 = vpow2.f32 %v3650_v10  ;;  %v3662_v55 = vmul.f32 1.442695, %v3648_v4  ;;  %v3664_v35 = vmul.f32 1.442695, %v3649_v63 }
0x116c   :  { %4264 = vpow2.f32 %v3652_v44 }
0x116d   :  { %4266 = vpow2.f32 %v3654_v57 }
0x116e   :  { %4268 = vpow2.f32 %v3656_v3 }
0x116f   :  { %4270 = vpow2.f32 %v3658_v1 }
0x1170   :  { %4272 = vpow2.f32 %v3660_v52 }
0x1171   :  { %4274 = vpow2.f32 %v3662_v55 }
0x1172   :  { %4276 = vpow2.f32 %v3664_v35 }
0x1178   :  { %v4263_v49 = vpop.eup %4262 }
0x1179   :  { %v4265_v21 = vpop.eup %4264 }
0x117a   :  { %v3666_v23 = vadd.f32 %v4265_v21, %v4263_v49  ;;  %v4267_v58 = vpop.eup %4266 }
0x117b   :  { %v4269_v0 = vpop.eup %4268 }
0x117c   :  { %v3667_v59 = vadd.f32 %v4267_v58, %v3666_v23  ;;  %v4271_v48 = vpop.eup %4270 }
0x117d   :  { %v4273_v29 = vpop.eup %4272 }
0x117e   :  { %v3668_v47 = vadd.f32 %v4269_v0, %v3667_v59  ;;  %v4275_v26 = vpop.eup %4274 }
0x117f   :  { %v4277_v15 = vpop.eup %4276 }
0x1180   :  { %v3669_v32 = vadd.f32 %v4271_v48, %v3668_v47 }
0x1182   :  { %v3670_v38 = vadd.f32 %v4273_v29, %v3669_v32 }
0x1184   :  { %v3671_v53 = vadd.f32 %v4275_v26, %v3670_v38 }
0x1186   :  { %v3672_v61 = vadd.f32 %v4277_v15, %v3671_v53 }
0x1188   :  { %4278 = vrcp.f32 %v3672_v61 }
0x1195   :  { %v4279_v39 = vpop.eup %4278 }
0x1196   :  { %v3674_v50 = vmul.f32 %v4279_v39, %v4263_v49  ;;  %v3675_v56 = vmul.f32 %v4279_v39, %v4265_v21  ;;  %v3676_v22 = vmul.f32 %v4279_v39, %v4267_v58  ;;  %v3677_v40 = vmul.f32 %v4279_v39, %v4269_v0 }
0x1197   :  { %v3678_v17 = vmul.f32 %v4279_v39, %v4271_v48  ;;  %v3679_v7 = vmul.f32 %v4279_v39, %v4273_v29  ;;  %v3680_v31 = vmul.f32 %v4279_v39, %v4275_v26  ;;  %v3681_v14 = vmul.f32 %v4279_v39, %v4277_v15 }
0x1198   :  { %v3682_v41 = vmul.f32 %v3674_v50, %v7198_v33  ;;  %v3683_v18 = vmul.f32 %v3675_v56, %v7199_v60  ;;  %v3684_v5 = vmul.f32 %v3676_v22, %v7200_v8  ;;  %v3685_v34 = vmul.f32 %v3677_v40, %v7201_v11  ;;  %v3867_v11 = vld [vmem:[%s6616_s11] ss:$0 sm:$0xff] }
0x1199   :  { %v3686_v45 = vmul.f32 %v3678_v17, %v7202_v9  ;;  %v3687_v36 = vmul.f32 %v3679_v7, %v6365_v28  ;;  %v3688_v33 = vmul.f32 %v3680_v31, %v6445_v62  ;;  %v3689_v60 = vmul.f32 %v3681_v14, %v6564_v46 }
0x119a   :  { %v3690_v6 = vadd.f32 %v3683_v18, %v3682_v41 }
0x119c   :  { %v3691_v43 = vadd.f32 %v3690_v6, %v3684_v5 }
0x119e   :  { %v3692_v42 = vadd.f32 %v3691_v43, %v3685_v34 }
0x11a0   :  { %v3693_v37 = vadd.f32 %v3692_v42, %v3686_v45 }
0x11a2   :  { %v3694_v20 = vadd.f32 %v3693_v37, %v3687_v36 }
0x11a4   :  { %v3695_v19 = vadd.f32 %v3694_v20, %v3688_v33 }
0x11a6   :  { %v3696_v8 = vadd.f32 %v3695_v19, %v3689_v60 }
0x11a8   :  { %3920 = vmatmul.mubr.f32.vlgmr.msra.gmra.mxu1 %v3696_v8 }
0x1268   :  { %v3786_v9 = vpop.f32.mrf.mxu1 }
0x1269   :  { %v3787_v27 = vadd.f32 %v3867_v11, %v3786_v9 }
0x126a   :  { %v3921_v16 = vpop.f32.mrf.mxu1 }
0x126b   :  { %3790 = vst [vmem:[#allocation13] sm:$0xff] %v3787_v27 }
0x126c   :  { %4455 = shalt.err (!%p4452_p1)
}
0x126d   :  { %3800 = dma.vmem_to_hbm [thread:$0]  %s3798_s18, 128, %s6617_s12, [#allocation9]  }
0x126e   :  { %4472 = dma.done.wait [#allocation9], 128  }
0x126f   :  { %4473 = vsyncadd [#allocation9], 4294967168 }
0x1270   :  { %3804 = vsyncpa [#allocation8], 1 }
0x1271   :  { %3805 = vsyncpa [#allocation11], 1 }
0x1272   :  { %3806 = vsyncpa [#allocation9], 1 }
0x1273   :  { %3807 = vsyncmov [#allocation6] }
0x1276   :  { %s3808_s11 = vpop.sfrf %3807 }
0x1277   :  { %p3868_p2 = scmp.ne.s32.totalorder %s3808_s11, 0 }
0x1279   :  { %3812 = shalt.err (%p3868_p2)  }
0x127a   :  { %3814 = vsyncmov [#allocation6 + $0x1] }
0x127d   :  { %s3815_s10 = vpop.sfrf %3814 }
0x127e   :  { %p3869_p3 = scmp.ne.s32.totalorder %s3815_s10, 0 }
0x1280   :  { %3819 = shalt.err (%p3869_p3)  }

</bundles_post_ra>
